<compile_context>
chip_gen: v5e
topology: v5e:2x2
jax: 0.10.0
libtpu: 0.0.40
codegen_flags: <defaults>
</compile_context>

<pallas_src>
import jax
import jax.numpy as jnp
from jax.experimental import pallas as pl
from jax.experimental.pallas import tpu as pltpu

N_CH = 128   # `N` in the PyTorch module
B = 2
H = 8
W = 8


def _resblock_kernel(x_ref, w1_hbm, w2_hbm, out_ref,
                     w1_ref, w2_ref, p_ref, y1_ref, res_ref, dma_sem):
    """Whole (tiny) problem in one kernel invocation.

    x_ref  : (B, H+2, W_PAD, C) f32   zero-padded NHWC input (W_PAD mult. of 8)
    w1_hbm : (9*C, C) bf16 in HBM     conv1 taps, K-stacked row-major (dy,dx,ci)
    w2_hbm : (9*C, C) bf16 in HBM     conv2 taps
    out_ref: (B, H, W, C) f32
    w1_ref : (9*C, C) bf16 VMEM       manual-DMA destination for w1
    w2_ref : (9*C, C) bf16 VMEM       manual-DMA destination for w2
    p_ref  : (B*H*W, 9*C) bf16 VMEM   shared im2col scratch (conv1 then conv2)
    y1_ref : (B, H+2, W_PAD, C) f32   padded LeakyReLU(conv1(x)) scratch
    res_ref: (B*H*W, C) f32 VMEM      identity-shortcut stash
    dma_sem: DMA semaphores (2,)
    """
    b, h_pad, w_pad, c = x_ref.shape
    h = h_pad - 2
    w = out_ref.shape[2]
    m = b * h * w
    n_rows = b * h_pad * w_pad

    # ---- overlap both weight DMAs (HBM -> VMEM) with the im2col fills ----
    w1_cp = pltpu.make_async_copy(w1_hbm, w1_ref, dma_sem.at[0])
    w2_cp = pltpu.make_async_copy(w2_hbm, w2_ref, dma_sem.at[1])
    w1_cp.start()
    w2_cp.start()

    def fill_im2col(src_ref, capture_residual):
        """Build the (m, 9*C) bf16 im2col matrix for a 3x3 SAME conv."""
        flat = src_ref[...].reshape(n_rows, c)
        for dx in range(3):
            if dx > 0:
                # Shift columns left by one more via an XLU roll on the
                # flattened sublane axis (incremental: dx=2 derives from dx=1).
                # Wrap-around garbage lands only in sliced-away columns.
                flat = pltpu.roll(flat, n_rows - 1, axis=0)
            tap4 = flat.reshape(b, h_pad, w_pad, c)
            if capture_residual and dx == 1:
                # The (dy=1, dx=1) tap is exactly the un-padded input, i.e. the
                # identity shortcut -> stash in f32 (no misaligned re-read).
                res_ref[...] = tap4[:, 1:1 + h, :w, :].reshape(m, c)
            for dy in range(3):
                k = 3 * dy + dx
                patch = tap4[:, dy:dy + h, :w, :].reshape(m, c)
                p_ref[:, k * c:(k + 1) * c] = patch.astype(jnp.bfloat16)

    # ---- conv1: im2col + ONE fused (m,9C)x(9C,C) bf16 matmul ----
    fill_im2col(x_ref, capture_residual=True)
    w1_cp.wait()
    acc1 = jnp.dot(p_ref[...], w1_ref[...], preferred_element_type=jnp.float32)
    y1 = jnp.where(acc1 > 0, acc1, 0.1 * acc1)            # LeakyReLU(0.1)

    # ---- write padded intermediate into scratch with aligned stores ----
    zrow = jnp.zeros((b, 1, w_pad, c), jnp.float32)
    y1_ref[:, 0:1, :, :] = zrow                  # top SAME-padding row
    y1_ref[:, h + 1:h + 2, :, :] = zrow          # bottom SAME-padding row
    y1_rows = jnp.concatenate(
        [y1.reshape(b, h, w, c),
         jnp.zeros((b, h, w_pad - w, c), jnp.float32)], axis=2)  # (b,h,16,c)
    # Roll by +1 along the flattened sublane axis: cols 1..w hold y1,
    # col 0 and cols w+1.. hold zeros (left/right SAME padding).
    y1_rows = pltpu.roll(y1_rows.reshape(b * h * w_pad, c), 1, axis=0)
    y1_ref[:, 1:1 + h, :, :] = y1_rows.reshape(b, h, w_pad, c)

    # ---- conv2: same fused matmul + identity shortcut ----
    fill_im2col(y1_ref, capture_residual=False)
    w2_cp.wait()
    acc2 = jnp.dot(p_ref[...], w2_ref[...], preferred_element_type=jnp.float32)
    out = acc2 + res_ref[...]
    out_ref[...] = out.reshape(b, h, w, c).astype(out_ref.dtype)


def residual_block(x_nchw, w1, w2):
    """x_nchw: (B, C, H, W) f32;  w1, w2: (3, 3, C, C) HWIO f32."""
    x = jnp.transpose(x_nchw, (0, 2, 3, 1))                     # NHWC
    b, h, w, c = x.shape
    h_pad = h + 2
    w_pad = ((w + 2 + 7) // 8) * 8                              # W+2 rounded to 8
    assert w_pad >= w + 2, "roll column-shift trick needs >= 2 pad cols"
    x_pad = jnp.pad(x, ((0, 0), (1, 1), (1, w_pad - w - 1), (0, 0)))
    m = b * h * w

    # K-stacked weights (9*C, C), row order (dy, dx, ci); bf16 MXU operands.
    w1s = w1.reshape(9 * c, c).astype(jnp.bfloat16)
    w2s = w2.reshape(9 * c, c).astype(jnp.bfloat16)

    out_nhwc = pl.pallas_call(
        _resblock_kernel,
        out_shape=jax.ShapeDtypeStruct((b, h, w, c), x.dtype),
        grid_spec=pltpu.PrefetchScalarGridSpec(
            num_scalar_prefetch=0,
            grid=(1,),                      # batch folded into the matmul M dim
            in_specs=[
                pl.BlockSpec((b, h_pad, w_pad, c), lambda i: (0, 0, 0, 0)),
                pl.BlockSpec(memory_space=pl.ANY),   # w1 stays in HBM (manual DMA)
                pl.BlockSpec(memory_space=pl.ANY),   # w2 stays in HBM (manual DMA)
            ],
            out_specs=pl.BlockSpec((b, h, w, c), lambda i: (0, 0, 0, 0)),
            scratch_shapes=[
                pltpu.VMEM((9 * c, c), jnp.bfloat16),            # w1 VMEM dst
                pltpu.VMEM((9 * c, c), jnp.bfloat16),            # w2 VMEM dst
                pltpu.VMEM((m, 9 * c), jnp.bfloat16),            # shared im2col
                pltpu.VMEM((b, h_pad, w_pad, c), jnp.float32),   # padded y1
                pltpu.VMEM((m, c), jnp.float32),                 # residual stash
                pltpu.SemaphoreType.DMA((2,)),
            ],
        ),
        compiler_params=pltpu.CompilerParams(
            dimension_semantics=("arbitrary",)),
    )(x_pad, w1s, w2s)

    return jnp.transpose(out_nhwc, (0, 3, 1, 2))                 # back to NCHW


def residual_block_ref(x_nchw, w1, w2):
    """Pure-JAX f32 reference (matches the PyTorch forward)."""
    x = jnp.transpose(x_nchw, (0, 2, 3, 1))
    dn = jax.lax.conv_dimension_numbers(x.shape, w1.shape,
                                        ('NHWC', 'HWIO', 'NHWC'))
    y1 = jax.lax.conv_general_dilated(x, w1, (1, 1), 'SAME',
                                      dimension_numbers=dn)
    y1 = jnp.where(y1 > 0, y1, 0.1 * y1)
    y2 = jax.lax.conv_general_dilated(y1, w2, (1, 1), 'SAME',
                                      dimension_numbers=dn)
    out = y2 + x
    return jnp.transpose(out, (0, 3, 1, 2))


if __name__ == "__main__":
    key = jax.random.PRNGKey(0)
    kx, k1, k2 = jax.random.split(key, 3)

    # Deterministic synthetic params (Conv2d(N, N, 3, bias=False) -> HWIO here).
    fan_in = N_CH * 3 * 3
    bound = 1.0 / jnp.sqrt(jnp.float32(fan_in))
    w1 = jax.random.uniform(k1, (3, 3, N_CH, N_CH), jnp.float32, -bound, bound)
    w2 = jax.random.uniform(k2, (3, 3, N_CH, N_CH), jnp.float32, -bound, bound)

    x = jax.random.normal(kx, (B, N_CH, H, W), jnp.float32)     # NCHW input

    out = jax.block_until_ready(residual_block(x, w1, w2))
    ref = jax.block_until_ready(residual_block_ref(x, w1, w2))

    assert out.shape == (B, N_CH, H, W)
    err = jnp.max(jnp.abs(out - ref))
    # Tolerance deliberately relaxed: the kernel uses bf16 MXU operands with
    # f32 accumulation, while the reference convolution runs in f32.
    assert jnp.allclose(out, ref, atol=3e-2, rtol=3e-2), f"max abs err {err}"
    print("KERNEL_OK")
</pallas_src>

<mosaic_0001>
module attributes {stable_mosaic.version = 11 : i64} {
  func.func @_resblock_kernel(%arg0: i32, %arg1: memref<2x10x16x128xf32, #tpu.memory_space<vmem>>, %arg2: memref<1152x128xbf16, #tpu.memory_space<any>>, %arg3: memref<1152x128xbf16, #tpu.memory_space<any>>, %arg4: memref<2x8x8x128xf32, #tpu.memory_space<vmem>>, %arg5: memref<1152x128xbf16, #tpu.memory_space<vmem>>, %arg6: memref<1152x128xbf16, #tpu.memory_space<vmem>>, %arg7: memref<128x1152xbf16, #tpu.memory_space<vmem>>, %arg8: memref<2x10x16x128xf32, #tpu.memory_space<vmem>>, %arg9: memref<128x128xf32, #tpu.memory_space<vmem>>, %arg10: memref<2x!tpu.dma_semaphore, #tpu.memory_space<semaphore_mem>>) attributes {dimension_semantics = [#tpu.dimension_semantics<arbitrary>], iteration_bounds = array<i64: 1>, scalar_prefetch = 0 : i64, scratch_operands = 6 : i64, tpu.core_type = #tpu.core_type<tc>, window_params = [{pipeline_mode = #tpu.pipeline_mode<synchronous>, transform_indices = @transform_0, window_bounds = array<i64: 2, 10, 16, 128>}, {}, {}, {pipeline_mode = #tpu.pipeline_mode<synchronous>, transform_indices = @transform_3, window_bounds = array<i64: 2, 8, 8, 128>}]} {
    %c0_i32 = arith.constant 0 : i32
    %0 = tpu.memref_slice %arg10[%c0_i32] : memref<2x!tpu.dma_semaphore, #tpu.memory_space<semaphore_mem>> -> memref<1x!tpu.dma_semaphore, #tpu.memory_space<semaphore_mem>>
    %1 = tpu.memref_squeeze %0 : memref<1x!tpu.dma_semaphore, #tpu.memory_space<semaphore_mem>> -> memref<!tpu.dma_semaphore, #tpu.memory_space<semaphore_mem>>
    tpu.enqueue_dma source(%arg2 : memref<1152x128xbf16, #tpu.memory_space<any>>) target(%arg5 : memref<1152x128xbf16, #tpu.memory_space<vmem>>) target_semaphore(%1 : memref<!tpu.dma_semaphore, #tpu.memory_space<semaphore_mem>>)
    %c1_i32 = arith.constant 1 : i32
    %2 = tpu.memref_slice %arg10[%c1_i32] : memref<2x!tpu.dma_semaphore, #tpu.memory_space<semaphore_mem>> -> memref<1x!tpu.dma_semaphore, #tpu.memory_space<semaphore_mem>>
    %3 = tpu.memref_squeeze %2 : memref<1x!tpu.dma_semaphore, #tpu.memory_space<semaphore_mem>> -> memref<!tpu.dma_semaphore, #tpu.memory_space<semaphore_mem>>
    tpu.enqueue_dma source(%arg3 : memref<1152x128xbf16, #tpu.memory_space<any>>) target(%arg6 : memref<1152x128xbf16, #tpu.memory_space<vmem>>) target_semaphore(%3 : memref<!tpu.dma_semaphore, #tpu.memory_space<semaphore_mem>>)
    %c0 = arith.constant 0 : index
    %c0_0 = arith.constant 0 : index
    %c0_1 = arith.constant 0 : index
    %c0_2 = arith.constant 0 : index
    %4 = vector.load %arg1[%c0, %c0_0, %c0_1, %c0_2] : memref<2x10x16x128xf32, #tpu.memory_space<vmem>>, vector<2x10x16x128xf32>
    %5 = vector.shape_cast %4 : vector<2x10x16x128xf32> to vector<320x128xf32>
    %6 = vector.shape_cast %5 : vector<320x128xf32> to vector<2x10x16x128xf32>
    %7 = vector.extract_strided_slice %6 {offsets = [0, 0, 0, 0], sizes = [2, 8, 8, 128], strides = [1, 1, 1, 1]} : vector<2x10x16x128xf32> to vector<2x8x8x128xf32>
    %8 = vector.shape_cast %7 : vector<2x8x8x128xf32> to vector<128x128xf32>
    %9 = arith.truncf %8 : vector<128x128xf32> to vector<128x128xbf16>
    %c0_3 = arith.constant 0 : index
    %c0_4 = arith.constant 0 : index
    %10 = vector.load %arg7[%c0_3, %c0_4] : memref<128x1152xbf16, #tpu.memory_space<vmem>>, vector<128x128xbf16>
    tpu.vector_store %arg7[%c0_3, %c0_4], %9 {strides = array<i32>} : memref<128x1152xbf16, #tpu.memory_space<vmem>>, vector<128x128xbf16>,
    %11 = vector.extract_strided_slice %6 {offsets = [0, 1, 0, 0], sizes = [2, 8, 8, 128], strides = [1, 1, 1, 1]} : vector<2x10x16x128xf32> to vector<2x8x8x128xf32>
    %12 = vector.shape_cast %11 : vector<2x8x8x128xf32> to vector<128x128xf32>
    %13 = arith.truncf %12 : vector<128x128xf32> to vector<128x128xbf16>
    %c0_5 = arith.constant 0 : index
    %c384 = arith.constant 384 : index
    %14 = vector.load %arg7[%c0_5, %c384] : memref<128x1152xbf16, #tpu.memory_space<vmem>>, vector<128x128xbf16>
    tpu.vector_store %arg7[%c0_5, %c384], %13 {strides = array<i32>} : memref<128x1152xbf16, #tpu.memory_space<vmem>>, vector<128x128xbf16>,
    %15 = vector.extract_strided_slice %6 {offsets = [0, 2, 0, 0], sizes = [2, 8, 8, 128], strides = [1, 1, 1, 1]} : vector<2x10x16x128xf32> to vector<2x8x8x128xf32>
    %16 = vector.shape_cast %15 : vector<2x8x8x128xf32> to vector<128x128xf32>
    %17 = arith.truncf %16 : vector<128x128xf32> to vector<128x128xbf16>
    %c0_6 = arith.constant 0 : index
    %c768 = arith.constant 768 : index
    %18 = vector.load %arg7[%c0_6, %c768] : memref<128x1152xbf16, #tpu.memory_space<vmem>>, vector<128x128xbf16>
    tpu.vector_store %arg7[%c0_6, %c768], %17 {strides = array<i32>} : memref<128x1152xbf16, #tpu.memory_space<vmem>>, vector<128x128xbf16>,
    %c319_i32 = arith.constant 319 : i32
    %19 = tpu.dynamic_rotate %5 by %c319_i32 dim 0 : vector<320x128xf32>, i32 -> vector<320x128xf32>
    %20 = vector.shape_cast %19 : vector<320x128xf32> to vector<2x10x16x128xf32>
    %21 = vector.extract_strided_slice %20 {offsets = [0, 1, 0, 0], sizes = [2, 8, 8, 128], strides = [1, 1, 1, 1]} : vector<2x10x16x128xf32> to vector<2x8x8x128xf32>
    %22 = vector.shape_cast %21 : vector<2x8x8x128xf32> to vector<128x128xf32>
    %c0_7 = arith.constant 0 : index
    %c0_8 = arith.constant 0 : index
    %23 = vector.load %arg9[%c0_7, %c0_8] : memref<128x128xf32, #tpu.memory_space<vmem>>, vector<128x128xf32>
    tpu.vector_store %arg9[%c0_7, %c0_8], %22 {strides = array<i32>} : memref<128x128xf32, #tpu.memory_space<vmem>>, vector<128x128xf32>,
    %24 = vector.extract_strided_slice %20 {offsets = [0, 0, 0, 0], sizes = [2, 8, 8, 128], strides = [1, 1, 1, 1]} : vector<2x10x16x128xf32> to vector<2x8x8x128xf32>
    %25 = vector.shape_cast %24 : vector<2x8x8x128xf32> to vector<128x128xf32>
    %26 = arith.truncf %25 : vector<128x128xf32> to vector<128x128xbf16>
    %c0_9 = arith.constant 0 : index
    %c128 = arith.constant 128 : index
    %27 = vector.load %arg7[%c0_9, %c128] : memref<128x1152xbf16, #tpu.memory_space<vmem>>, vector<128x128xbf16>
    tpu.vector_store %arg7[%c0_9, %c128], %26 {strides = array<i32>} : memref<128x1152xbf16, #tpu.memory_space<vmem>>, vector<128x128xbf16>,
    %28 = vector.extract_strided_slice %20 {offsets = [0, 1, 0, 0], sizes = [2, 8, 8, 128], strides = [1, 1, 1, 1]} : vector<2x10x16x128xf32> to vector<2x8x8x128xf32>
    %29 = vector.shape_cast %28 : vector<2x8x8x128xf32> to vector<128x128xf32>
    %30 = arith.truncf %29 : vector<128x128xf32> to vector<128x128xbf16>
    %c0_10 = arith.constant 0 : index
    %c512 = arith.constant 512 : index
    %31 = vector.load %arg7[%c0_10, %c512] : memref<128x1152xbf16, #tpu.memory_space<vmem>>, vector<128x128xbf16>
    tpu.vector_store %arg7[%c0_10, %c512], %30 {strides = array<i32>} : memref<128x1152xbf16, #tpu.memory_space<vmem>>, vector<128x128xbf16>,
    %32 = vector.extract_strided_slice %20 {offsets = [0, 2, 0, 0], sizes = [2, 8, 8, 128], strides = [1, 1, 1, 1]} : vector<2x10x16x128xf32> to vector<2x8x8x128xf32>
    %33 = vector.shape_cast %32 : vector<2x8x8x128xf32> to vector<128x128xf32>
    %34 = arith.truncf %33 : vector<128x128xf32> to vector<128x128xbf16>
    %c0_11 = arith.constant 0 : index
    %c896 = arith.constant 896 : index
    %35 = vector.load %arg7[%c0_11, %c896] : memref<128x1152xbf16, #tpu.memory_space<vmem>>, vector<128x128xbf16>
    tpu.vector_store %arg7[%c0_11, %c896], %34 {strides = array<i32>} : memref<128x1152xbf16, #tpu.memory_space<vmem>>, vector<128x128xbf16>,
    %c319_i32_12 = arith.constant 319 : i32
    %36 = tpu.dynamic_rotate %19 by %c319_i32_12 dim 0 : vector<320x128xf32>, i32 -> vector<320x128xf32>
    %37 = vector.shape_cast %36 : vector<320x128xf32> to vector<2x10x16x128xf32>
    %38 = vector.extract_strided_slice %37 {offsets = [0, 0, 0, 0], sizes = [2, 8, 8, 128], strides = [1, 1, 1, 1]} : vector<2x10x16x128xf32> to vector<2x8x8x128xf32>
    %39 = vector.shape_cast %38 : vector<2x8x8x128xf32> to vector<128x128xf32>
    %40 = arith.truncf %39 : vector<128x128xf32> to vector<128x128xbf16>
    %c0_13 = arith.constant 0 : index
    %c256 = arith.constant 256 : index
    %41 = vector.load %arg7[%c0_13, %c256] : memref<128x1152xbf16, #tpu.memory_space<vmem>>, vector<128x128xbf16>
    tpu.vector_store %arg7[%c0_13, %c256], %40 {strides = array<i32>} : memref<128x1152xbf16, #tpu.memory_space<vmem>>, vector<128x128xbf16>,
    %42 = vector.extract_strided_slice %37 {offsets = [0, 1, 0, 0], sizes = [2, 8, 8, 128], strides = [1, 1, 1, 1]} : vector<2x10x16x128xf32> to vector<2x8x8x128xf32>
    %43 = vector.shape_cast %42 : vector<2x8x8x128xf32> to vector<128x128xf32>
    %44 = arith.truncf %43 : vector<128x128xf32> to vector<128x128xbf16>
    %c0_14 = arith.constant 0 : index
    %c640 = arith.constant 640 : index
    %45 = vector.load %arg7[%c0_14, %c640] : memref<128x1152xbf16, #tpu.memory_space<vmem>>, vector<128x128xbf16>
    tpu.vector_store %arg7[%c0_14, %c640], %44 {strides = array<i32>} : memref<128x1152xbf16, #tpu.memory_space<vmem>>, vector<128x128xbf16>,
    %46 = vector.extract_strided_slice %37 {offsets = [0, 2, 0, 0], sizes = [2, 8, 8, 128], strides = [1, 1, 1, 1]} : vector<2x10x16x128xf32> to vector<2x8x8x128xf32>
    %47 = vector.shape_cast %46 : vector<2x8x8x128xf32> to vector<128x128xf32>
    %48 = arith.truncf %47 : vector<128x128xf32> to vector<128x128xbf16>
    %c0_15 = arith.constant 0 : index
    %c1024 = arith.constant 1024 : index
    %49 = vector.load %arg7[%c0_15, %c1024] : memref<128x1152xbf16, #tpu.memory_space<vmem>>, vector<128x128xbf16>
    tpu.vector_store %arg7[%c0_15, %c1024], %48 {strides = array<i32>} : memref<128x1152xbf16, #tpu.memory_space<vmem>>, vector<128x128xbf16>,
    %c0_i32_16 = arith.constant 0 : i32
    %50 = tpu.memref_slice %arg10[%c0_i32_16] : memref<2x!tpu.dma_semaphore, #tpu.memory_space<semaphore_mem>> -> memref<1x!tpu.dma_semaphore, #tpu.memory_space<semaphore_mem>>
    %51 = tpu.memref_squeeze %50 : memref<1x!tpu.dma_semaphore, #tpu.memory_space<semaphore_mem>> -> memref<!tpu.dma_semaphore, #tpu.memory_space<semaphore_mem>>
    tpu.wait_dma2 semaphore(%51 : memref<!tpu.dma_semaphore, #tpu.memory_space<semaphore_mem>>) src(%arg2 : memref<1152x128xbf16, #tpu.memory_space<any>>) dst(%arg5 : memref<1152x128xbf16, #tpu.memory_space<vmem>>)
    %c0_17 = arith.constant 0 : index
    %c0_18 = arith.constant 0 : index
    %52 = vector.load %arg7[%c0_17, %c0_18] : memref<128x1152xbf16, #tpu.memory_space<vmem>>, vector<128x1152xbf16>
    %c0_19 = arith.constant 0 : index
    %c0_20 = arith.constant 0 : index
    %53 = vector.load %arg5[%c0_19, %c0_20] : memref<1152x128xbf16, #tpu.memory_space<vmem>>, vector<1152x128xbf16>
    %cst = arith.constant dense<0.000000e+00> : vector<128x128xf32>
    %54 = tpu.matmul %52, %53, %cst {dimension_numbers = #tpu.dot_dimension_numbers<[1], [0], [0], [1], [0, 0, 1, 1], [], []>} : vector<128x1152xbf16>, vector<1152x128xbf16>, vector<128x128xf32> -> vector<128x128xf32>
    %cst_21 = arith.constant 0.000000e+00 : f32
    %55 = vector.broadcast %cst_21 : f32 to vector<128x128xf32>
    %56 = arith.cmpf ogt, %54, %55 : vector<128x128xf32>
    %cst_22 = arith.constant 1.000000e-01 : f32
    %57 = vector.broadcast %cst_22 : f32 to vector<128x128xf32>
    %58 = arith.mulf %57, %54 : vector<128x128xf32>
    %59 = arith.select %56, %54, %58 : vector<128x128xi1>, vector<128x128xf32>
    %cst_23 = arith.constant 0.000000e+00 : f32
    %60 = vector.broadcast %cst_23 : f32 to vector<2x1x16x128xf32>
    %c0_24 = arith.constant 0 : index
    %c0_25 = arith.constant 0 : index
    %c0_26 = arith.constant 0 : index
    %c0_27 = arith.constant 0 : index
    %61 = vector.load %arg8[%c0_24, %c0_25, %c0_26, %c0_27] : memref<2x10x16x128xf32, #tpu.memory_space<vmem>>, vector<2x1x16x128xf32>
    tpu.vector_store %arg8[%c0_24, %c0_25, %c0_26, %c0_27], %60 {strides = array<i32>} : memref<2x10x16x128xf32, #tpu.memory_space<vmem>>, vector<2x1x16x128xf32>,
    %c0_28 = arith.constant 0 : index
    %c9 = arith.constant 9 : index
    %c0_29 = arith.constant 0 : index
    %c0_30 = arith.constant 0 : index
    %62 = vector.load %arg8[%c0_28, %c9, %c0_29, %c0_30] : memref<2x10x16x128xf32, #tpu.memory_space<vmem>>, vector<2x1x16x128xf32>
    tpu.vector_store %arg8[%c0_28, %c9, %c0_29, %c0_30], %60 {strides = array<i32>} : memref<2x10x16x128xf32, #tpu.memory_space<vmem>>, vector<2x1x16x128xf32>,
    %63 = vector.shape_cast %59 : vector<128x128xf32> to vector<2x8x8x128xf32>
    %cst_31 = arith.constant 0.000000e+00 : f32
    %64 = vector.broadcast %cst_31 : f32 to vector<2x8x8x128xf32>
    %65 = tpu.concatenate %63, %64 in 2 : vector<2x8x8x128xf32>, vector<2x8x8x128xf32> -> vector<2x8x16x128xf32>
    %66 = vector.shape_cast %65 : vector<2x8x16x128xf32> to vector<256x128xf32>
    %c1_i32_32 = arith.constant 1 : i32
    %67 = tpu.dynamic_rotate %66 by %c1_i32_32 dim 0 : vector<256x128xf32>, i32 -> vector<256x128xf32>
    %68 = vector.shape_cast %67 : vector<256x128xf32> to vector<2x8x16x128xf32>
    %c0_33 = arith.constant 0 : index
    %c1 = arith.constant 1 : index
    %c0_34 = arith.constant 0 : index
    %c0_35 = arith.constant 0 : index
    %69 = vector.load %arg8[%c0_33, %c1, %c0_34, %c0_35] : memref<2x10x16x128xf32, #tpu.memory_space<vmem>>, vector<2x8x16x128xf32>
    tpu.vector_store %arg8[%c0_33, %c1, %c0_34, %c0_35], %68 {strides = array<i32>} : memref<2x10x16x128xf32, #tpu.memory_space<vmem>>, vector<2x8x16x128xf32>,
    %c0_36 = arith.constant 0 : index
    %c0_37 = arith.constant 0 : index
    %c0_38 = arith.constant 0 : index
    %c0_39 = arith.constant 0 : index
    %70 = vector.load %arg8[%c0_36, %c0_37, %c0_38, %c0_39] : memref<2x10x16x128xf32, #tpu.memory_space<vmem>>, vector<2x10x16x128xf32>
    %71 = vector.shape_cast %70 : vector<2x10x16x128xf32> to vector<320x128xf32>
    %72 = vector.shape_cast %71 : vector<320x128xf32> to vector<2x10x16x128xf32>
    %73 = vector.extract_strided_slice %72 {offsets = [0, 0, 0, 0], sizes = [2, 8, 8, 128], strides = [1, 1, 1, 1]} : vector<2x10x16x128xf32> to vector<2x8x8x128xf32>
    %74 = vector.shape_cast %73 : vector<2x8x8x128xf32> to vector<128x128xf32>
    %75 = arith.truncf %74 : vector<128x128xf32> to vector<128x128xbf16>
    %c0_40 = arith.constant 0 : index
    %c0_41 = arith.constant 0 : index
    %76 = vector.load %arg7[%c0_40, %c0_41] : memref<128x1152xbf16, #tpu.memory_space<vmem>>, vector<128x128xbf16>
    tpu.vector_store %arg7[%c0_40, %c0_41], %75 {strides = array<i32>} : memref<128x1152xbf16, #tpu.memory_space<vmem>>, vector<128x128xbf16>,
    %77 = vector.extract_strided_slice %72 {offsets = [0, 1, 0, 0], sizes = [2, 8, 8, 128], strides = [1, 1, 1, 1]} : vector<2x10x16x128xf32> to vector<2x8x8x128xf32>
    %78 = vector.shape_cast %77 : vector<2x8x8x128xf32> to vector<128x128xf32>
    %79 = arith.truncf %78 : vector<128x128xf32> to vector<128x128xbf16>
    %c0_42 = arith.constant 0 : index
    %c384_43 = arith.constant 384 : index
    %80 = vector.load %arg7[%c0_42, %c384_43] : memref<128x1152xbf16, #tpu.memory_space<vmem>>, vector<128x128xbf16>
    tpu.vector_store %arg7[%c0_42, %c384_43], %79 {strides = array<i32>} : memref<128x1152xbf16, #tpu.memory_space<vmem>>, vector<128x128xbf16>,
    %81 = vector.extract_strided_slice %72 {offsets = [0, 2, 0, 0], sizes = [2, 8, 8, 128], strides = [1, 1, 1, 1]} : vector<2x10x16x128xf32> to vector<2x8x8x128xf32>
    %82 = vector.shape_cast %81 : vector<2x8x8x128xf32> to vector<128x128xf32>
    %83 = arith.truncf %82 : vector<128x128xf32> to vector<128x128xbf16>
    %c0_44 = arith.constant 0 : index
    %c768_45 = arith.constant 768 : index
    %84 = vector.load %arg7[%c0_44, %c768_45] : memref<128x1152xbf16, #tpu.memory_space<vmem>>, vector<128x128xbf16>
    tpu.vector_store %arg7[%c0_44, %c768_45], %83 {strides = array<i32>} : memref<128x1152xbf16, #tpu.memory_space<vmem>>, vector<128x128xbf16>,
    %c319_i32_46 = arith.constant 319 : i32
    %85 = tpu.dynamic_rotate %71 by %c319_i32_46 dim 0 : vector<320x128xf32>, i32 -> vector<320x128xf32>
    %86 = vector.shape_cast %85 : vector<320x128xf32> to vector<2x10x16x128xf32>
    %87 = vector.extract_strided_slice %86 {offsets = [0, 0, 0, 0], sizes = [2, 8, 8, 128], strides = [1, 1, 1, 1]} : vector<2x10x16x128xf32> to vector<2x8x8x128xf32>
    %88 = vector.shape_cast %87 : vector<2x8x8x128xf32> to vector<128x128xf32>
    %89 = arith.truncf %88 : vector<128x128xf32> to vector<128x128xbf16>
    %c0_47 = arith.constant 0 : index
    %c128_48 = arith.constant 128 : index
    %90 = vector.load %arg7[%c0_47, %c128_48] : memref<128x1152xbf16, #tpu.memory_space<vmem>>, vector<128x128xbf16>
    tpu.vector_store %arg7[%c0_47, %c128_48], %89 {strides = array<i32>} : memref<128x1152xbf16, #tpu.memory_space<vmem>>, vector<128x128xbf16>,
    %91 = vector.extract_strided_slice %86 {offsets = [0, 1, 0, 0], sizes = [2, 8, 8, 128], strides = [1, 1, 1, 1]} : vector<2x10x16x128xf32> to vector<2x8x8x128xf32>
    %92 = vector.shape_cast %91 : vector<2x8x8x128xf32> to vector<128x128xf32>
    %93 = arith.truncf %92 : vector<128x128xf32> to vector<128x128xbf16>
    %c0_49 = arith.constant 0 : index
    %c512_50 = arith.constant 512 : index
    %94 = vector.load %arg7[%c0_49, %c512_50] : memref<128x1152xbf16, #tpu.memory_space<vmem>>, vector<128x128xbf16>
    tpu.vector_store %arg7[%c0_49, %c512_50], %93 {strides = array<i32>} : memref<128x1152xbf16, #tpu.memory_space<vmem>>, vector<128x128xbf16>,
    %95 = vector.extract_strided_slice %86 {offsets = [0, 2, 0, 0], sizes = [2, 8, 8, 128], strides = [1, 1, 1, 1]} : vector<2x10x16x128xf32> to vector<2x8x8x128xf32>
    %96 = vector.shape_cast %95 : vector<2x8x8x128xf32> to vector<128x128xf32>
    %97 = arith.truncf %96 : vector<128x128xf32> to vector<128x128xbf16>
    %c0_51 = arith.constant 0 : index
    %c896_52 = arith.constant 896 : index
    %98 = vector.load %arg7[%c0_51, %c896_52] : memref<128x1152xbf16, #tpu.memory_space<vmem>>, vector<128x128xbf16>
    tpu.vector_store %arg7[%c0_51, %c896_52], %97 {strides = array<i32>} : memref<128x1152xbf16, #tpu.memory_space<vmem>>, vector<128x128xbf16>,
    %c319_i32_53 = arith.constant 319 : i32
    %99 = tpu.dynamic_rotate %85 by %c319_i32_53 dim 0 : vector<320x128xf32>, i32 -> vector<320x128xf32>
    %100 = vector.shape_cast %99 : vector<320x128xf32> to vector<2x10x16x128xf32>
    %101 = vector.extract_strided_slice %100 {offsets = [0, 0, 0, 0], sizes = [2, 8, 8, 128], strides = [1, 1, 1, 1]} : vector<2x10x16x128xf32> to vector<2x8x8x128xf32>
    %102 = vector.shape_cast %101 : vector<2x8x8x128xf32> to vector<128x128xf32>
    %103 = arith.truncf %102 : vector<128x128xf32> to vector<128x128xbf16>
    %c0_54 = arith.constant 0 : index
    %c256_55 = arith.constant 256 : index
    %104 = vector.load %arg7[%c0_54, %c256_55] : memref<128x1152xbf16, #tpu.memory_space<vmem>>, vector<128x128xbf16>
    tpu.vector_store %arg7[%c0_54, %c256_55], %103 {strides = array<i32>} : memref<128x1152xbf16, #tpu.memory_space<vmem>>, vector<128x128xbf16>,
    %105 = vector.extract_strided_slice %100 {offsets = [0, 1, 0, 0], sizes = [2, 8, 8, 128], strides = [1, 1, 1, 1]} : vector<2x10x16x128xf32> to vector<2x8x8x128xf32>
    %106 = vector.shape_cast %105 : vector<2x8x8x128xf32> to vector<128x128xf32>
    %107 = arith.truncf %106 : vector<128x128xf32> to vector<128x128xbf16>
    %c0_56 = arith.constant 0 : index
    %c640_57 = arith.constant 640 : index
    %108 = vector.load %arg7[%c0_56, %c640_57] : memref<128x1152xbf16, #tpu.memory_space<vmem>>, vector<128x128xbf16>
    tpu.vector_store %arg7[%c0_56, %c640_57], %107 {strides = array<i32>} : memref<128x1152xbf16, #tpu.memory_space<vmem>>, vector<128x128xbf16>,
    %109 = vector.extract_strided_slice %100 {offsets = [0, 2, 0, 0], sizes = [2, 8, 8, 128], strides = [1, 1, 1, 1]} : vector<2x10x16x128xf32> to vector<2x8x8x128xf32>
    %110 = vector.shape_cast %109 : vector<2x8x8x128xf32> to vector<128x128xf32>
    %111 = arith.truncf %110 : vector<128x128xf32> to vector<128x128xbf16>
    %c0_58 = arith.constant 0 : index
    %c1024_59 = arith.constant 1024 : index
    %112 = vector.load %arg7[%c0_58, %c1024_59] : memref<128x1152xbf16, #tpu.memory_space<vmem>>, vector<128x128xbf16>
    tpu.vector_store %arg7[%c0_58, %c1024_59], %111 {strides = array<i32>} : memref<128x1152xbf16, #tpu.memory_space<vmem>>, vector<128x128xbf16>,
    %c1_i32_60 = arith.constant 1 : i32
    %113 = tpu.memref_slice %arg10[%c1_i32_60] : memref<2x!tpu.dma_semaphore, #tpu.memory_space<semaphore_mem>> -> memref<1x!tpu.dma_semaphore, #tpu.memory_space<semaphore_mem>>
    %114 = tpu.memref_squeeze %113 : memref<1x!tpu.dma_semaphore, #tpu.memory_space<semaphore_mem>> -> memref<!tpu.dma_semaphore, #tpu.memory_space<semaphore_mem>>
    tpu.wait_dma2 semaphore(%114 : memref<!tpu.dma_semaphore, #tpu.memory_space<semaphore_mem>>) src(%arg3 : memref<1152x128xbf16, #tpu.memory_space<any>>) dst(%arg6 : memref<1152x128xbf16, #tpu.memory_space<vmem>>)
    %c0_61 = arith.constant 0 : index
    %c0_62 = arith.constant 0 : index
    %115 = vector.load %arg7[%c0_61, %c0_62] : memref<128x1152xbf16, #tpu.memory_space<vmem>>, vector<128x1152xbf16>
    %c0_63 = arith.constant 0 : index
    %c0_64 = arith.constant 0 : index
    %116 = vector.load %arg6[%c0_63, %c0_64] : memref<1152x128xbf16, #tpu.memory_space<vmem>>, vector<1152x128xbf16>
    %cst_65 = arith.constant dense<0.000000e+00> : vector<128x128xf32>
    %117 = tpu.matmul %115, %116, %cst_65 {dimension_numbers = #tpu.dot_dimension_numbers<[1], [0], [0], [1], [0, 0, 1, 1], [], []>} : vector<128x1152xbf16>, vector<1152x128xbf16>, vector<128x128xf32> -> vector<128x128xf32>
    %c0_66 = arith.constant 0 : index
    %c0_67 = arith.constant 0 : index
    %118 = vector.load %arg9[%c0_66, %c0_67] : memref<128x128xf32, #tpu.memory_space<vmem>>, vector<128x128xf32>
    %119 = arith.addf %117, %118 : vector<128x128xf32>
    %120 = vector.shape_cast %119 : vector<128x128xf32> to vector<2x8x8x128xf32>
    %c0_68 = arith.constant 0 : index
    %c0_69 = arith.constant 0 : index
    %c0_70 = arith.constant 0 : index
    %c0_71 = arith.constant 0 : index
    %121 = vector.load %arg4[%c0_68, %c0_69, %c0_70, %c0_71] : memref<2x8x8x128xf32, #tpu.memory_space<vmem>>, vector<2x8x8x128xf32>
    tpu.vector_store %arg4[%c0_68, %c0_69, %c0_70, %c0_71], %120 {strides = array<i32>} : memref<2x8x8x128xf32, #tpu.memory_space<vmem>>, vector<2x8x8x128xf32>,
    return
  }
  func.func @transform_0(%arg0: i32) -> (i32, i32, i32, i32) {
    %c0_i32 = arith.constant 0 : i32
    %c0_i32_0 = arith.constant 0 : i32
    %c0_i32_1 = arith.constant 0 : i32
    %c0_i32_2 = arith.constant 0 : i32
    %c0_i32_3 = arith.constant 0 : i32
    return %c0_i32, %c0_i32_0, %c0_i32_1, %c0_i32_2 : i32, i32, i32, i32
  }
  func.func @transform_3(%arg0: i32) -> (i32, i32, i32, i32) {
    %c0_i32 = arith.constant 0 : i32
    %c0_i32_0 = arith.constant 0 : i32
    %c0_i32_1 = arith.constant 0 : i32
    %c0_i32_2 = arith.constant 0 : i32
    %c0_i32_3 = arith.constant 0 : i32
    return %c0_i32, %c0_i32_0, %c0_i32_1, %c0_i32_2 : i32, i32, i32, i32
  }
}

</mosaic_0001>

<bundles_post_ra>
// kernel: tpu_custom_call.1
= control target key start
LH: loop header
LB: loop body
LE: loop exit
PB: predicated region body
PF: predicated region fallthrough
CT: control target
= control target key end

     0   :  { %8 = vsyncpa [#allocation9], 0  ;;  %s6566_s0 = inlined_call_operand.hbm [shape: f32[2,10,16,128], index: 0, kind: input, shape index: {}]   ;;  %s6567_s1 = inlined_call_operand.hbm [shape: bf16[1152,128], index: 1, kind: input, shape index: {}]   ;;  %s6568_s2 = inlined_call_operand.hbm [shape: bf16[1152,128], index: 2, kind: input, shape index: {}]   ;;  %s6569_s3 = inlined_call_operand.hbm [shape: f32[2,8,8,128], index: 3, kind: output, shape index: {}]  }
   0x1   :  { %9 = vsyncpa [#allocation10], 0  ;;  %s14_s14 = sshll.u32 %s6566_s0, 4  ;;  %s5550_s15 = smov [#allocation8]   ;;  %s15_s14 = int_to_ptr.hbm [resolvable:$true] %s14_s14 }
   0x2   :  { %s16_s16 = sshll.u32 %s5550_s15, 4  ;;  %s5551_s17 = smov 128   ;;  %s17_s16 = int_to_ptr.vmem [resolvable:$true] %s16_s16 }
   0x3   :  { %s5552_s18 = smov 8  }
   0x4   :  { %22 = dma.hbm_to_vmem [thread:$0]  %s15_s14, 5120, %s17_s16, [#allocation9], %s5551_s17, %s5551_s17, %s5552_s18  }
   0x5   :  { %5542 = dma.done.wait [#allocation9], 5120  }
   0x6   :  { %5543 = vsyncadd [#allocation9], 4294962176  ;;  %s34_s21 = sshll.u32 %s6567_s1, 4  ;;  %s5553_s22 = smov [#allocation2]   ;;  %v5590_v0 = vld [vmem:[#allocation8] sm:$0xff]  ;;  %v5592_v1 = vld [vmem:[#allocation8 + $0x10] sm:$0xff]  ;;  %v202_v30 = vlaneseq  ;;  %s35_s21 = int_to_ptr.hbm [resolvable:$true] %s34_s21 }
   0x7   :  { %s36_s23 = sshll.u32 %s5553_s22, 4  ;;  %s48_s25 = sshll.u32 %s6568_s2, 4  ;;  %6609 = vst [vmem:[#allocation22_spill] sm:$0xff] %v5590_v0  ;;  %v94_v2 = vpack.c.bf16 %v5590_v0, %v5590_v0  ;;  %v95_v3 = vpack.c.bf16 %v5592_v1, %v5592_v1  ;;  %v5598_v4 = vld [vmem:[#allocation8 + $0x20] sm:$0xff]  ;;  %v5602_v6 = vld [vmem:[#allocation8 + $0x30] sm:$0xff]  ;;  %v5656_v34 = vld [vmem:[#allocation8 + $0x8] sm:$0xff]  ;;  %s37_s23 = int_to_ptr.vmem [resolvable:$true] %s36_s23  ;;  %s49_s25 = int_to_ptr.hbm [resolvable:$true] %s48_s25 }
   0x8   :  { %39 = dma.hbm_to_vmem [thread:$0]  %s35_s21, 9216, %s37_s23, [#allocation7]  ;;  %v96_v5 = vpack.c.bf16 %v5598_v4, %v5598_v4  ;;  %v97_v7 = vpack.c.bf16 %v5602_v6, %v5602_v6  ;;  %v5606_v8 = vld [vmem:[#allocation8 + $0x40] sm:$0xff]  ;;  %v5610_v10 = vld [vmem:[#allocation8 + $0x50] sm:$0xff]  ;;  %v5654_v33 = vshrl.u32 %v202_v30, 7  ;;  %v5660_v36 = vld [vmem:[#allocation8 + $0x18] sm:$0xff] }
   0x9   :  { %s5554_s26 = smov [#allocation3]   ;;  %110 = vst [vmem:[#allocation4] sm:$0xf] %v94_v2  ;;  %v98_v9 = vpack.c.bf16 %v5606_v8, %v5606_v8  ;;  %v99_v11 = vpack.c.bf16 %v5610_v10, %v5610_v10  ;;  %v5614_v12 = vld [vmem:[#allocation8 + $0x60] sm:$0xff]  ;;  %v5618_v14 = vld [vmem:[#allocation8 + $0x70] sm:$0xff]  ;;  %v6570_v38 = vrot.slane %v5590_v0, 1 }
   0xa   :  { %s50_s27 = sshll.u32 %s5554_s26, 4  ;;  %111 = vst [vmem:[#allocation4 + $0x24] sm:$0xf] %v95_v3  ;;  %v100_v13 = vpack.c.bf16 %v5614_v12, %v5614_v12  ;;  %v101_v15 = vpack.c.bf16 %v5618_v14, %v5618_v14  ;;  %v5622_v16 = vld [vmem:[#allocation8 + $0xa0] sm:$0xff]  ;;  %v5626_v18 = vld [vmem:[#allocation8 + $0xb0] sm:$0xff]  ;;  %v6596_v40 = vrot.slane %v5656_v34, 1  ;;  %s51_s27 = int_to_ptr.vmem [resolvable:$true] %s50_s27 }
   0xb   :  { %53 = dma.hbm_to_vmem [thread:$0]  %s49_s25, 9216, %s51_s27, [#allocation7 + $0x1]  ;;  %128 = vst [vmem:[#allocation4 + $0xc] sm:$0xf] %v95_v3  ;;  %v102_v17 = vpack.c.bf16 %v5622_v16, %v5622_v16  ;;  %v103_v19 = vpack.c.bf16 %v5626_v18, %v5626_v18  ;;  %v5630_v20 = vld [vmem:[#allocation8 + $0xc0] sm:$0xff]  ;;  %v5634_v22 = vld [vmem:[#allocation8 + $0xd0] sm:$0xff] }
   0xc   :  { %112 = vst [vmem:[#allocation4 + $0x48] sm:$0xf] %v96_v5  ;;  %v104_v21 = vpack.c.bf16 %v5630_v20, %v5630_v20  ;;  %v105_v23 = vpack.c.bf16 %v5634_v22, %v5634_v22  ;;  %v5638_v24 = vld [vmem:[#allocation8 + $0xe0] sm:$0xff]  ;;  %v5642_v26 = vld [vmem:[#allocation8 + $0xf0] sm:$0xff]  ;;  %v5668_v41 = vld [vmem:[#allocation8 + $0x28] sm:$0xff]  ;;  %v164_v42 = vrot.slane %v5592_v1, 1 }
   0xd   :  { %129 = vst [vmem:[#allocation4 + $0x30] sm:$0xf] %v96_v5  ;;  %v106_v25 = vpack.c.bf16 %v5638_v24, %v5638_v24  ;;  %v107_v27 = vpack.c.bf16 %v5642_v26, %v5642_v26  ;;  %v5646_v28 = vld [vmem:[#allocation8 + $0x100] sm:$0xff]  ;;  %v5650_v31 = vld [vmem:[#allocation8 + $0x110] sm:$0xff]  ;;  %vm204_vm0 = vcmp.lt.s32.totalorder %v5654_v33, 7  ;;  %v6592_v44 = vrot.slane %v5660_v36, 1 }
   0xe   :  { %146 = vst [vmem:[#allocation4 + $0x18] sm:$0xf] %v96_v5  ;;  %v108_v29 = vpack.c.bf16 %v5646_v28, %v5646_v28  ;;  %v109_v32 = vpack.c.bf16 %v5650_v31, %v5650_v31  ;;  %v5658_v35 = vld [vmem:[#allocation8 + $0x80] sm:$0xff]  ;;  %v5675_v45 = vld [vmem:[#allocation8 + $0x90] sm:$0xff]  ;;  %v6595_v46 = vrot.slane %v5598_v4, 1  ;;  %v6588_v49 = vrot.slane %v5668_v41, 1 }
   0xf   :  { %113 = vst [vmem:[#allocation4 + $0x6c] sm:$0xf] %v97_v7  ;;  %v126_v37 = vpack.c.bf16 %v5658_v35, %v5658_v35  ;;  %v5665_v39 = vld [vmem:[#allocation8 + $0x120] sm:$0xff]  ;;  %v144_v47 = vpack.c.bf16 %v5675_v45, %v5675_v45  ;;  %v5680_v48 = vld [vmem:[#allocation8 + $0x130] sm:$0xff]  ;;  %v5683_v50 = vld [vmem:[#allocation8 + $0x38] sm:$0xff]  ;;  %v5693_v52 = vsel %vm204_vm0, %v6570_v38, %v6596_v40  ;;  %v5703_v54 = vsel %vm204_vm0, %v164_v42, %v6592_v44 }
  0x10   :  { %130 = vst [vmem:[#allocation4 + $0x54] sm:$0xf] %v97_v7  ;;  %v127_v43 = vpack.c.bf16 %v5665_v39, %v5665_v39  ;;  %v145_v51 = vpack.c.bf16 %v5680_v48, %v5680_v48  ;;  %v261_v53 = vpack.c.bf16 %v5693_v52, %v5693_v52  ;;  %v6591_v55 = vrot.slane %v5602_v6, 1  ;;  %v5709_v58 = vld [vmem:[#allocation8 + $0x48] sm:$0xff]  ;;  %v5723_v63 = vld [vmem:[#allocation8 + $0x58] sm:$0xff] }
  0x11   :  { %147 = vst [vmem:[#allocation4 + $0x3c] sm:$0xf] %v97_v7  ;;  %v262_v56 = vpack.c.bf16 %v5703_v54, %v5703_v54  ;;  %v6584_v57 = vrot.slane %v5683_v50, 1  ;;  %v5717_v59 = vsel %vm204_vm0, %v6595_v46, %v6588_v49  ;;  %v6587_v61 = vrot.slane %v5606_v8, 1  ;;  %v5877_v44 = vld [vmem:[#allocation8 + $0x88] sm:$0xff] }
  0x12   :  { %114 = vst [vmem:[#allocation4 + $0x90] sm:$0xf] %v98_v9  ;;  %v263_v60 = vpack.c.bf16 %v5717_v59, %v5717_v59  ;;  %v6580_v62 = vrot.slane %v5709_v58, 1  ;;  %v6581_v5 = vrot.slane %v5610_v10, 1  ;;  %v6574_v7 = vrot.slane %v5723_v63, 1 }
  0x13   :  { %131 = vst [vmem:[#allocation4 + $0x78] sm:$0xf] %v98_v9  ;;  %v5731_v2 = vsel %vm204_vm0, %v6591_v55, %v6584_v57  ;;  %v5849_v57 = vld [vmem:[#allocation8 + $0x108] sm:$0xff]  ;;  %v6619_v40 = vrot.slane %v5658_v35, 1 }
  0x14   :  { %148 = vst [vmem:[#allocation4 + $0x60] sm:$0xf] %v98_v9  ;;  %v264_v3 = vpack.c.bf16 %v5731_v2, %v5731_v2  ;;  %v5737_v9 = vld [vmem:[#allocation8 + $0x68] sm:$0xff]  ;;  %v6597_v49 = vrot.slane %v5849_v57, 1 }
  0x15   :  { %115 = vst [vmem:[#allocation4 + $0xb4] sm:$0xf] %v99_v11 }
  0x16   :  { %132 = vst [vmem:[#allocation4 + $0x9c] sm:$0xf] %v99_v11 }
  0x17   :  { %149 = vst [vmem:[#allocation4 + $0x84] sm:$0xf] %v99_v11  ;;  %v5745_v11 = vsel %vm204_vm0, %v6587_v61, %v6580_v62  ;;  %v5862_v61 = vld [vmem:[#allocation8 + $0x118] sm:$0xff] }
  0x18   :  { %116 = vst [vmem:[#allocation4 + $0xd8] sm:$0xf] %v100_v13  ;;  %v6603_v55 = vrot.slane %v5862_v61, 1 }
  0x19   :  { %133 = vst [vmem:[#allocation4 + $0xc0] sm:$0xf] %v100_v13 }
  0x1a   :  { %6610 = vst [vmem:[#allocation23_spill] sm:$0xff] %v5622_v16 }
  0x1b   :  { %150 = vst [vmem:[#allocation4 + $0xa8] sm:$0xf] %v100_v13  ;;  %v265_v13 = vpack.c.bf16 %v5745_v11, %v5745_v11 }
  0x1c   :  { %117 = vst [vmem:[#allocation4 + $0xfc] sm:$0xf] %v101_v15 }
  0x1d   :  { %134 = vst [vmem:[#allocation4 + $0xe4] sm:$0xf] %v101_v15 }
  0x1e   :  { %151 = vst [vmem:[#allocation4 + $0xcc] sm:$0xf] %v101_v15  ;;  %v6575_v15 = vrot.slane %v5614_v12, 1 }
  0x1f   :  { %118 = vst [vmem:[#allocation4 + $0x120] sm:$0xf] %v102_v17  ;;  %v5750_v17 = vld [vmem:[#allocation8 + $0x78] sm:$0xff] }
  0x20   :  { %119 = vst [vmem:[#allocation4 + $0x144] sm:$0xf] %v103_v19 }
  0x21   :  { %136 = vst [vmem:[#allocation4 + $0x12c] sm:$0xf] %v103_v19  ;;  %v6571_v19 = vrot.slane %v5737_v9, 1 }
  0x22   :  { %120 = vst [vmem:[#allocation4 + $0x168] sm:$0xf] %v104_v21 }
  0x23   :  { %137 = vst [vmem:[#allocation4 + $0x150] sm:$0xf] %v104_v21  ;;  %v5773_v30 = vsel %vm204_vm0, %v6575_v15, %v6571_v19  ;;  %v5797_v19 = vld [vmem:[#allocation8 + $0xd8] sm:$0xff] }
  0x24   :  { %154 = vst [vmem:[#allocation4 + $0x138] sm:$0xf] %v104_v21  ;;  %v5759_v21 = vsel %vm204_vm0, %v6581_v5, %v6574_v7  ;;  %v6586_v7 = vrot.slane %v5634_v22, 1  ;;  %v5835_v5 = vld [vmem:[#allocation8 + $0xf8] sm:$0xff] }
  0x25   :  { %121 = vst [vmem:[#allocation4 + $0x18c] sm:$0xf] %v105_v23 }
  0x26   :  { %138 = vst [vmem:[#allocation4 + $0x174] sm:$0xf] %v105_v23 }
  0x27   :  { %155 = vst [vmem:[#allocation4 + $0x15c] sm:$0xf] %v105_v23  ;;  %v266_v23 = vpack.c.bf16 %v5759_v21, %v5759_v21 }
  0x28   :  { %122 = vst [vmem:[#allocation4 + $0x1b0] sm:$0xf] %v106_v25 }
  0x29   :  { %139 = vst [vmem:[#allocation4 + $0x198] sm:$0xf] %v106_v25 }
  0x2a   :  { %156 = vst [vmem:[#allocation4 + $0x180] sm:$0xf] %v106_v25  ;;  %v6573_v25 = vrot.slane %v5618_v14, 1 }
  0x2b   :  { %123 = vst [vmem:[#allocation4 + $0x1d4] sm:$0xf] %v107_v27 }
  0x2c   :  { %140 = vst [vmem:[#allocation4 + $0x1bc] sm:$0xf] %v107_v27 }
  0x2d   :  { %157 = vst [vmem:[#allocation4 + $0x1a4] sm:$0xf] %v107_v27  ;;  %v6572_v27 = vrot.slane %v5750_v17, 1 }
  0x2e   :  { %124 = vst [vmem:[#allocation4 + $0x1f8] sm:$0xf] %v108_v29 }
  0x2f   :  { %141 = vst [vmem:[#allocation4 + $0x1e0] sm:$0xf] %v108_v29 }
  0x30   :  { %158 = vst [vmem:[#allocation4 + $0x1c8] sm:$0xf] %v108_v29  ;;  %v5765_v29 = vld [vmem:[#allocation8 + $0xa8] sm:$0xff] }
  0x31   :  { %125 = vst [vmem:[#allocation4 + $0x21c] sm:$0xf] %v109_v32 }
  0x32   :  { %142 = vst [vmem:[#allocation4 + $0x204] sm:$0xf] %v109_v32 }
  0x33   :  { %159 = vst [vmem:[#allocation4 + $0x1ec] sm:$0xf] %v109_v32  ;;  %v5775_v32 = vld [vmem:[#allocation8 + $0xb8] sm:$0xff] }
  0x34   :  { %135 = vst [vmem:[#allocation4 + $0x108] sm:$0xf] %v126_v37 }
  0x35   :  { %152 = vst [vmem:[#allocation4 + $0xf0] sm:$0xf] %v126_v37  ;;  %v267_v37 = vpack.c.bf16 %v5773_v30, %v5773_v30 }
  0x36   :  { %143 = vst [vmem:[#allocation4 + $0x228] sm:$0xf] %v127_v43 }
  0x37   :  { %6611 = vst [vmem:[#allocation24_spill] sm:$0xff] %v5703_v54 }
  0x38   :  { %160 = vst [vmem:[#allocation4 + $0x210] sm:$0xf] %v127_v43  ;;  %v6576_v43 = vrot.slane %v5622_v16, 1 }
  0x39   :  { %153 = vst [vmem:[#allocation4 + $0x114] sm:$0xf] %v144_v47  ;;  %v6577_v47 = vrot.slane %v5765_v29, 1 }
  0x3a   :  { %6612 = vst [vmem:[#allocation25_spill] sm:$0xff] %v5717_v59 }
  0x3b   :  { %161 = vst [vmem:[#allocation4 + $0x234] sm:$0xf] %v145_v51  ;;  %v5781_v51 = vld [vmem:[#allocation8 + $0xc8] sm:$0xff] }
  0x3c   :  { %277 = vst [vmem:[#allocation4 + $0x4] sm:$0xf] %v261_v53  ;;  %v6579_v53 = vrot.slane %v5626_v18, 1  ;;  %v6582_v38 = vrot.slane %v5781_v51, 1 }
  0x3d   :  { %278 = vst [vmem:[#allocation4 + $0x28] sm:$0xf] %v262_v56 }
  0x3e   :  { %295 = vst [vmem:[#allocation4 + $0x10] sm:$0xf] %v262_v56  ;;  %v5790_v56 = vsel %vm204_vm0, %v6573_v25, %v6572_v27  ;;  %v5805_v27 = vsel %vm204_vm0, %v6576_v43, %v6577_v47  ;;  %v6585_v43 = vrot.slane %v5797_v19, 1 }
  0x3f   :  { %279 = vst [vmem:[#allocation4 + $0x4c] sm:$0xf] %v263_v60 }
  0x40   :  { %296 = vst [vmem:[#allocation4 + $0x34] sm:$0xf] %v263_v60 }
  0x41   :  { %313 = vst [vmem:[#allocation4 + $0x1c] sm:$0xf] %v263_v60  ;;  %v6578_v60 = vrot.slane %v5775_v32, 1 }
  0x42   :  { %280 = vst [vmem:[#allocation4 + $0x70] sm:$0xf] %v264_v3 }
  0x43   :  { %297 = vst [vmem:[#allocation4 + $0x58] sm:$0xf] %v264_v3  ;;  %v5815_v25 = vsel %vm204_vm0, %v6579_v53, %v6578_v60  ;;  %v6590_v53 = vrot.slane %v5638_v24, 1 }
  0x44   :  { %314 = vst [vmem:[#allocation4 + $0x40] sm:$0xf] %v264_v3  ;;  %v268_v3 = vpack.c.bf16 %v5790_v56, %v5790_v56  ;;  %v270_v15 = vpack.c.bf16 %v5815_v25, %v5815_v25 }
  0x45   :  { %281 = vst [vmem:[#allocation4 + $0x94] sm:$0xf] %v265_v13 }
  0x46   :  { %298 = vst [vmem:[#allocation4 + $0x7c] sm:$0xf] %v265_v13 }
  0x47   :  { %315 = vst [vmem:[#allocation4 + $0x64] sm:$0xf] %v265_v13  ;;  %v6583_v13 = vrot.slane %v5630_v20, 1 }
  0x48   :  { %282 = vst [vmem:[#allocation4 + $0xb8] sm:$0xf] %v266_v23 }
  0x49   :  { %299 = vst [vmem:[#allocation4 + $0xa0] sm:$0xf] %v266_v23  ;;  %v5829_v47 = vsel %vm204_vm0, %v6583_v13, %v6582_v38  ;;  %v5843_v38 = vsel %vm204_vm0, %v6586_v7, %v6585_v43  ;;  %v6594_v13 = vrot.slane %v5642_v26, 1  ;;  %v6598_v7 = vrot.slane %v5646_v28, 1 }
  0x4a   :  { %316 = vst [vmem:[#allocation4 + $0x88] sm:$0xf] %v266_v23  ;;  %v269_v23 = vpack.c.bf16 %v5805_v27, %v5805_v27  ;;  %v271_v60 = vpack.c.bf16 %v5829_v47, %v5829_v47 }
  0x4b   :  { %283 = vst [vmem:[#allocation4 + $0xdc] sm:$0xf] %v267_v37 }
  0x4c   :  { %300 = vst [vmem:[#allocation4 + $0xc4] sm:$0xf] %v267_v37 }
  0x4d   :  { %317 = vst [vmem:[#allocation4 + $0xac] sm:$0xf] %v267_v37  ;;  %v5821_v37 = vld [vmem:[#allocation8 + $0xe8] sm:$0xff] }
  0x4e   :  { %284 = vst [vmem:[#allocation4 + $0x100] sm:$0xf] %v268_v3  ;;  %v6589_v62 = vrot.slane %v5821_v37, 1 }
  0x4f   :  { %301 = vst [vmem:[#allocation4 + $0xe8] sm:$0xf] %v268_v3 }
  0x50   :  { %318 = vst [vmem:[#allocation4 + $0xd0] sm:$0xf] %v268_v3  ;;  %v272_v3 = vpack.c.bf16 %v5843_v38, %v5843_v38  ;;  %v5857_v43 = vsel %vm204_vm0, %v6590_v53, %v6589_v62  ;;  %v6604_v53 = vrot.slane %v5650_v31, 1 }
  0x51   :  { %285 = vst [vmem:[#allocation4 + $0x124] sm:$0xf] %v269_v23  ;;  %v6593_v23 = vrot.slane %v5835_v5, 1 }
  0x52   :  { %286 = vst [vmem:[#allocation4 + $0x148] sm:$0xf] %v270_v15 }
  0x53   :  { %303 = vst [vmem:[#allocation4 + $0x130] sm:$0xf] %v270_v15  ;;  %v273_v15 = vpack.c.bf16 %v5857_v43, %v5857_v43  ;;  %v5871_v62 = vsel %vm204_vm0, %v6594_v13, %v6593_v23  ;;  %v5885_v23 = vsel %vm204_vm0, %v6598_v7, %v6597_v49  ;;  %v5889_v13 = vld [vmem:[#allocation8 + $0x128] sm:$0xff]  ;;  %v5899_v49 = vsel %vm204_vm0, %v6604_v53, %v6603_v55 }
  0x54   :  { %287 = vst [vmem:[#allocation4 + $0x16c] sm:$0xf] %v271_v60  ;;  %v6615_v7 = vrot.slane %v5656_v34, 1  ;;  %v276_v0 = vpack.c.bf16 %v5899_v49, %v5899_v49  ;;  %v6616_v55 = vrot.slane %v5598_v4, 1  ;;  %v6617_v53 = vrot.slane %v5660_v36, 1 }
  0x55   :  { %304 = vst [vmem:[#allocation4 + $0x154] sm:$0xf] %v271_v60 }
  0x56   :  { %321 = vst [vmem:[#allocation4 + $0x13c] sm:$0xf] %v271_v60  ;;  %v274_v60 = vpack.c.bf16 %v5871_v62, %v5871_v62  ;;  %v242_v46 = vsel %vm204_vm0, %v6615_v7, %v164_v42  ;;  %v240_v1 = vsel %vm204_vm0, %v6617_v53, %v6616_v55  ;;  %v329_v7 = vrot.slane %v5693_v52, 1 }
  0x57   :  { %288 = vst [vmem:[#allocation4 + $0x190] sm:$0xf] %v272_v3  ;;  %v330_v16 = vrot.slane %v242_v46, 1  ;;  %v6620_v55 = vrot.slane %v5602_v6, 1  ;;  %v6621_v53 = vrot.slane %v5668_v41, 1  ;;  %v331_v42 = vrot.slane %v5703_v54, 1 }
  0x58   :  { %305 = vst [vmem:[#allocation4 + $0x178] sm:$0xf] %v272_v3  ;;  %v6623_v46 = vrot.slane %v5665_v39, 1  ;;  %v333_v41 = vrot.slane %v5717_v59, 1 }
  0x59   :  { %322 = vst [vmem:[#allocation4 + $0x160] sm:$0xf] %v272_v3  ;;  %v275_v3 = vpack.c.bf16 %v5885_v23, %v5885_v23  ;;  %v238_v52 = vsel %vm204_vm0, %v6621_v53, %v6620_v55  ;;  %v6624_v53 = vrot.slane %v5606_v8, 1  ;;  %v388_v59 = vsel %vm204_vm0, %v329_v7, %v330_v16 }
  0x5a   :  { %289 = vst [vmem:[#allocation4 + $0x1b4] sm:$0xf] %v273_v15  ;;  %v334_v55 = vrot.slane %v238_v52, 1  ;;  %v6628_v52 = vrot.slane %v5680_v48, 1 }
  0x5b   :  { %6613 = vst [vmem:[#allocation26_spill] sm:$0xff] %v5877_v44 }
  0x5c   :  { %306 = vst [vmem:[#allocation4 + $0x19c] sm:$0xf] %v273_v15 }
  0x5d   :  { %6614 = vst [vmem:[#allocation27_spill] sm:$0xff] %v5885_v23  ;;  %v5913_v23 = vld [vmem:[#allocation8 + $0x138] sm:$0xff] }
  0x5e   :  { %323 = vst [vmem:[#allocation4 + $0x184] sm:$0xf] %v273_v15  ;;  %v5901_v15 = vld [vmem:[#allocation8 + $0x98] sm:$0xff] }
  0x5f   :  { %290 = vst [vmem:[#allocation4 + $0x1d8] sm:$0xf] %v274_v60  ;;  %v6607_v36 = vrot.slane %v5901_v15, 1 }
  0x60   :  { %307 = vst [vmem:[#allocation4 + $0x1c0] sm:$0xf] %v274_v60 }
  0x61   :  { %324 = vst [vmem:[#allocation4 + $0x1a8] sm:$0xf] %v274_v60  ;;  %v6618_v60 = vrot.slane %v5877_v44, 1 }
  0x62   :  { %291 = vst [vmem:[#allocation4 + $0x1fc] sm:$0xf] %v275_v3 }
  0x63   :  { %308 = vst [vmem:[#allocation4 + $0x1e4] sm:$0xf] %v275_v3  ;;  %v5930_v4 = vsel %vm204_vm0, %v6619_v40, %v6618_v60  ;;  %v332_v40 = vrot.slane %v240_v1, 1  ;;  %v6622_v60 = vrot.slane %v5889_v13, 1  ;;  %v6625_v1 = vrot.slane %v5683_v50, 1 }
  0x64   :  { %325 = vst [vmem:[#allocation4 + $0x1cc] sm:$0xf] %v275_v3  ;;  %v293_v34 = vpack.c.bf16 %v5930_v4, %v5930_v4  ;;  %v6627_v50 = vrot.slane %v5913_v23, 1 }
  0x65   :  { %292 = vst [vmem:[#allocation4 + $0x220] sm:$0xf] %v276_v0  ;;  %v5949_v6 = vsel %vm204_vm0, %v6623_v46, %v6622_v60  ;;  %v236_v44 = vsel %vm204_vm0, %v6625_v1, %v6624_v53  ;;  %v6626_v60 = vrot.slane %v5675_v45, 1  ;;  %v387_v53 = vsel %vm204_vm0, %v331_v42, %v332_v40 }
  0x66   :  { %309 = vst [vmem:[#allocation4 + $0x208] sm:$0xf] %v276_v0  ;;  %v294_v3 = vpack.c.bf16 %v5949_v6, %v5949_v6  ;;  %v335_v1 = vrot.slane %v5731_v2, 1  ;;  %v336_v7 = vrot.slane %v236_v44, 1  ;;  %v390_v42 = vpack.c.bf16 %v387_v53, %v387_v53 }
  0x67   :  { %326 = vst [vmem:[#allocation4 + $0x1f0] sm:$0xf] %v276_v0  ;;  %v5966_v46 = vsel %vm204_vm0, %v6626_v60, %v6607_v36  ;;  %v5978_v0 = vsel %vm204_vm0, %v6628_v52, %v6627_v50  ;;  %v6629_v60 = vrot.slane %v5610_v10, 1  ;;  %v6630_v36 = vrot.slane %v5709_v58, 1 }
  0x68   :  { %302 = vst [vmem:[#allocation4 + $0x10c] sm:$0xf] %v293_v34  ;;  %v311_v8 = vpack.c.bf16 %v5966_v46, %v5966_v46  ;;  %v312_v16 = vpack.c.bf16 %v5978_v0, %v5978_v0  ;;  %v389_v50 = vpack.c.bf16 %v388_v59, %v388_v59  ;;  %v386_v52 = vsel %vm204_vm0, %v333_v41, %v334_v55 }
  0x69   :  { %319 = vst [vmem:[#allocation4 + $0xf4] sm:$0xf] %v293_v34  ;;  %v234_v54 = vsel %vm204_vm0, %v6630_v36, %v6629_v60  ;;  %v337_v34 = vrot.slane %v5745_v11, 1  ;;  %v6631_v44 = vrot.slane %v5614_v12, 1  ;;  %v6632_v10 = vrot.slane %v5723_v63, 1 }
  0x6a   :  { %310 = vst [vmem:[#allocation4 + $0x22c] sm:$0xf] %v294_v3  ;;  %v338_v40 = vrot.slane %v234_v54, 1  ;;  %v391_v36 = vpack.c.bf16 %v386_v52, %v386_v52  ;;  %v385_v59 = vsel %vm204_vm0, %v335_v1, %v336_v7  ;;  %v339_v41 = vrot.slane %v5759_v21, 1 }
  0x6b   :  { %327 = vst [vmem:[#allocation4 + $0x214] sm:$0xf] %v294_v3  ;;  %v232_v58 = vsel %vm204_vm0, %v6632_v10, %v6631_v44  ;;  %v6633_v55 = vrot.slane %v5618_v14, 1  ;;  %v6634_v54 = vrot.slane %v5737_v9, 1  ;;  %v392_v63 = vpack.c.bf16 %v385_v59, %v385_v59 }
  0x6c   :  { %320 = vst [vmem:[#allocation4 + $0x118] sm:$0xf] %v311_v8  ;;  %v340_v3 = vrot.slane %v232_v58, 1  ;;  %v384_v8 = vsel %vm204_vm0, %v337_v34, %v338_v40  ;;  %v6635_v53 = vrot.slane %v5658_v35, 1  ;;  %v6636_v1 = vrot.slane %v5750_v17, 1 }
  0x6d   :  { %328 = vst [vmem:[#allocation4 + $0x238] sm:$0xf] %v312_v16  ;;  %v230_v12 = vsel %vm204_vm0, %v6634_v54, %v6633_v55  ;;  %v341_v14 = vrot.slane %v5773_v30, 1  ;;  %v393_v7 = vpack.c.bf16 %v384_v8, %v384_v8  ;;  %v343_v52 = vrot.slane %v5790_v56, 1 }
  0x6e   :  { %405 = vst [vmem:[#allocation4 + $0x8] sm:$0xf] %v389_v50  ;;  %v228_v16 = vsel %vm204_vm0, %v6636_v1, %v6635_v53  ;;  %v342_v9 = vrot.slane %v230_v12, 1  ;;  %v383_v60 = vsel %vm204_vm0, %v339_v41, %v340_v3  ;;  %v6637_v35 = vrot.slane %v5626_v18, 1 }
  0x6f   :  { %406 = vst [vmem:[#allocation4 + $0x2c] sm:$0xf] %v390_v42  ;;  %v344_v50 = vrot.slane %v228_v16, 1  ;;  %v6638_v17 = vrot.slane %v5765_v29, 1  ;;  %v394_v34 = vpack.c.bf16 %v383_v60, %v383_v60  ;;  %v6639_v44 = vrot.slane %v5630_v20, 1 }
  0x70   :  { %423 = vst [vmem:[#allocation4 + $0x14] sm:$0xf] %v390_v42  ;;  %v382_v40 = vsel %vm204_vm0, %v341_v14, %v342_v9  ;;  %v6640_v10 = vrot.slane %v5775_v32, 1  ;;  %v349_v18 = vrot.slane %v5805_v27, 1  ;;  %v6642_v59 = vrot.slane %v5781_v51, 1 }
  0x71   :  { %407 = vst [vmem:[#allocation4 + $0x50] sm:$0xf] %v391_v36  ;;  %v222_v42 = vsel %vm204_vm0, %v6638_v17, %v6637_v35  ;;  %v351_v3 = vrot.slane %v5815_v25, 1  ;;  %v395_v20 = vpack.c.bf16 %v382_v40, %v382_v40  ;;  %v381_v32 = vsel %vm204_vm0, %v343_v52, %v344_v50 }
  0x72   :  { %424 = vst [vmem:[#allocation4 + $0x38] sm:$0xf] %v391_v36  ;;  %v220_v58 = vsel %vm204_vm0, %v6640_v10, %v6639_v44  ;;  %v350_v29 = vrot.slane %v222_v42, 1  ;;  %v353_v27 = vrot.slane %v5829_v47, 1  ;;  %v6644_v51 = vrot.slane %v5797_v19, 1 }
  0x73   :  { %441 = vst [vmem:[#allocation4 + $0x20] sm:$0xf] %v391_v36  ;;  %v6641_v36 = vrot.slane %v5634_v22, 1  ;;  %v352_v55 = vrot.slane %v220_v58, 1  ;;  %v6643_v22 = vrot.slane %v5638_v24, 1  ;;  %v355_v1 = vrot.slane %v5843_v38, 1 }
  0x74   :  { %408 = vst [vmem:[#allocation4 + $0x74] sm:$0xf] %v392_v63  ;;  %v378_v8 = vsel %vm204_vm0, %v349_v18, %v350_v29  ;;  %v6645_v24 = vrot.slane %v5642_v26, 1  ;;  %v6646_v19 = vrot.slane %v5821_v37, 1  ;;  %v357_v50 = vrot.slane %v5857_v43, 1 }
  0x75   :  { %425 = vst [vmem:[#allocation4 + $0x5c] sm:$0xf] %v392_v63  ;;  %v218_v41 = vsel %vm204_vm0, %v6642_v59, %v6641_v36  ;;  %v216_v12 = vsel %vm204_vm0, %v6644_v51, %v6643_v22  ;;  %v377_v53 = vsel %vm204_vm0, %v351_v3, %v352_v55  ;;  %v397_v9 = vpack.c.bf16 %v378_v8, %v378_v8  ;;  %v6653_v59 = vld [vmem:[#allocation27_spill] sm:$0xff] }
  0x76   :  { %442 = vst [vmem:[#allocation4 + $0x44] sm:$0xf] %v392_v63  ;;  %v354_v54 = vrot.slane %v218_v41, 1  ;;  %v396_v63 = vpack.c.bf16 %v381_v32, %v381_v32  ;;  %v356_v16 = vrot.slane %v216_v12, 1  ;;  %v214_v14 = vsel %vm204_vm0, %v6646_v19, %v6645_v24 }
  0x77   :  { %409 = vst [vmem:[#allocation4 + $0x98] sm:$0xf] %v393_v7  ;;  %v398_v60 = vpack.c.bf16 %v377_v53, %v377_v53  ;;  %v358_v52 = vrot.slane %v214_v14, 1  ;;  %v6647_v35 = vrot.slane %v5646_v28, 1  ;;  %v6648_v26 = vrot.slane %v5835_v5, 1 }
  0x78   :  { %426 = vst [vmem:[#allocation4 + $0x80] sm:$0xf] %v393_v7  ;;  %v375_v42 = vsel %vm204_vm0, %v355_v1, %v356_v16  ;;  %v6649_v44 = vrot.slane %v5650_v31, 1  ;;  %v6650_v10 = vrot.slane %v5849_v57, 1  ;;  %v6651_v18 = vrot.slane %v5665_v39, 1  ;;  %v6659_v16 = vld [vmem:[#allocation23_spill] sm:$0xff] }
  0x79   :  { %443 = vst [vmem:[#allocation4 + $0x68] sm:$0xf] %v393_v7  ;;  %v376_v7 = vsel %vm204_vm0, %v353_v27, %v354_v54  ;;  %v212_v37 = vsel %vm204_vm0, %v6648_v26, %v6647_v35  ;;  %v400_v5 = vpack.c.bf16 %v375_v42, %v375_v42  ;;  %v374_v58 = vsel %vm204_vm0, %v357_v50, %v358_v52 }
  0x7a   :  { %410 = vst [vmem:[#allocation4 + $0xbc] sm:$0xf] %v394_v34  ;;  %v399_v17 = vpack.c.bf16 %v376_v7, %v376_v7  ;;  %v360_v40 = vrot.slane %v212_v37, 1  ;;  %v210_v28 = vsel %vm204_vm0, %v6650_v10, %v6649_v44  ;;  %v6652_v29 = vrot.slane %v5862_v61, 1  ;;  %v6655_v61 = vld [vmem:[#allocation26_spill] sm:$0xff] }
  0x7b   :  { %427 = vst [vmem:[#allocation4 + $0xa4] sm:$0xf] %v394_v34  ;;  %v361_v31 = vrot.slane %v6653_v59, 1  ;;  %v362_v57 = vrot.slane %v210_v28, 1  ;;  %v401_v41 = vpack.c.bf16 %v374_v58, %v374_v58  ;;  %v363_v32 = vrot.slane %v5899_v49, 1 }
  0x7c   :  { %444 = vst [vmem:[#allocation4 + $0x8c] sm:$0xf] %v394_v34  ;;  %v359_v34 = vrot.slane %v5871_v62, 1  ;;  %v208_v36 = vsel %vm204_vm0, %v6652_v29, %v6651_v18  ;;  %v6654_v39 = vrot.slane %v5675_v45, 1  ;;  %v6656_v55 = vrot.slane %v6655_v61, 1 }
  0x7d   :  { %411 = vst [vmem:[#allocation4 + $0xe0] sm:$0xf] %v395_v20  ;;  %v372_v22 = vsel %vm204_vm0, %v361_v31, %v362_v57  ;;  %v6657_v51 = vrot.slane %v5680_v48, 1  ;;  %v6658_v12 = vrot.slane %v5889_v13, 1  ;;  %v345_v45 = vrot.slane %v5930_v4, 1 }
  0x7e   :  { %428 = vst [vmem:[#allocation4 + $0xc8] sm:$0xf] %v395_v20  ;;  %v373_v3 = vsel %vm204_vm0, %v359_v34, %v360_v40  ;;  %v226_v27 = vsel %vm204_vm0, %v6656_v55, %v6654_v39  ;;  %v403_v53 = vpack.c.bf16 %v372_v22, %v372_v22  ;;  %v6660_v24 = vrot.slane %v6659_v16, 1 }
  0x7f   :  { %445 = vst [vmem:[#allocation4 + $0xb0] sm:$0xf] %v395_v20  ;;  %v364_v20 = vrot.slane %v208_v36, 1  ;;  %v402_v54 = vpack.c.bf16 %v373_v3, %v373_v3  ;;  %v346_v8 = vrot.slane %v226_v27, 1  ;;  %v6661_v19 = vrot.slane %v5901_v15, 1 }
  0x80   :  { %412 = vst [vmem:[#allocation4 + $0x104] sm:$0xf] %v396_v63  ;;  %v365_v13 = vrot.slane %v5949_v6, 1  ;;  %v347_v52 = vrot.slane %v5966_v46, 1  ;;  %v367_v37 = vrot.slane %v5978_v0, 1 }
  0x81   :  { %429 = vst [vmem:[#allocation4 + $0xec] sm:$0xf] %v396_v63  ;;  %v371_v1 = vsel %vm204_vm0, %v363_v32, %v364_v20  ;;  %v224_v48 = vsel %vm204_vm0, %v6661_v19, %v6660_v24  ;;  %v380_v15 = vsel %vm204_vm0, %v345_v45, %v346_v8 }
  0x82   :  { %446 = vst [vmem:[#allocation4 + $0xd4] sm:$0xf] %v396_v63  ;;  %v206_v63 = vsel %vm204_vm0, %v6658_v12, %v6657_v51  ;;  %v404_v35 = vpack.c.bf16 %v371_v1, %v371_v1  ;;  %v348_v26 = vrot.slane %v224_v48, 1  ;;  %v421_v42 = vpack.c.bf16 %v380_v15, %v380_v15 }
  0x83   :  { %413 = vst [vmem:[#allocation4 + $0x128] sm:$0xf] %v397_v9  ;;  %v366_v14 = vrot.slane %v206_v63, 1  ;;  %v6662_v9 = vld [vmem:[#allocation22_spill] sm:$0xff] }
  0x84   :  { %414 = vst [vmem:[#allocation4 + $0x14c] sm:$0xf] %v398_v60  ;;  %v6663_v7 = vrot.slane %v6662_v9, 1  ;;  %v379_v46 = vsel %vm204_vm0, %v347_v52, %v348_v26 }
  0x85   :  { %431 = vst [vmem:[#allocation4 + $0x134] sm:$0xf] %v398_v60  ;;  %v6664_v60 = vrot.slane %v5913_v23, 1  ;;  %v370_v23 = vsel %vm204_vm0, %v365_v13, %v366_v14  ;;  %v439_v0 = vpack.c.bf16 %v379_v46, %v379_v46 }
  0x86   :  { %415 = vst [vmem:[#allocation4 + $0x170] sm:$0xf] %v399_v17  ;;  %v422_v34 = vpack.c.bf16 %v370_v23, %v370_v23 }
  0x87   :  { %432 = vst [vmem:[#allocation4 + $0x158] sm:$0xf] %v399_v17  ;;  %v244_v50 = vsel %vm204_vm0, %v6664_v60, %v6663_v7 }
  0x88   :  { %449 = vst [vmem:[#allocation4 + $0x140] sm:$0xf] %v399_v17  ;;  %v368_v17 = vrot.slane %v244_v50, 1 }
  0x89   :  { %416 = vst [vmem:[#allocation4 + $0x194] sm:$0xf] %v400_v5 }
  0x8a   :  { %433 = vst [vmem:[#allocation4 + $0x17c] sm:$0xf] %v400_v5  ;;  %v369_v40 = vsel %vm204_vm0, %v367_v37, %v368_v17 }
  0x8b   :  { %450 = vst [vmem:[#allocation4 + $0x164] sm:$0xf] %v400_v5  ;;  %v440_v44 = vpack.c.bf16 %v369_v40, %v369_v40 }
  0x8c   :  { %417 = vst [vmem:[#allocation4 + $0x1b8] sm:$0xf] %v401_v41 }
  0x8d   :  { %434 = vst [vmem:[#allocation4 + $0x1a0] sm:$0xf] %v401_v41 }
  0x8e   :  { %451 = vst [vmem:[#allocation4 + $0x188] sm:$0xf] %v401_v41 }
  0x8f   :  { %418 = vst [vmem:[#allocation4 + $0x1dc] sm:$0xf] %v402_v54 }
  0x90   :  { %435 = vst [vmem:[#allocation4 + $0x1c4] sm:$0xf] %v402_v54 }
  0x91   :  { %452 = vst [vmem:[#allocation4 + $0x1ac] sm:$0xf] %v402_v54 }
  0x92   :  { %419 = vst [vmem:[#allocation4 + $0x200] sm:$0xf] %v403_v53 }
  0x93   :  { %436 = vst [vmem:[#allocation4 + $0x1e8] sm:$0xf] %v403_v53 }
  0x94   :  { %453 = vst [vmem:[#allocation4 + $0x1d0] sm:$0xf] %v403_v53 }
  0x95   :  { %420 = vst [vmem:[#allocation4 + $0x224] sm:$0xf] %v404_v35 }
  0x96   :  { %437 = vst [vmem:[#allocation4 + $0x20c] sm:$0xf] %v404_v35 }
  0x97   :  { %454 = vst [vmem:[#allocation4 + $0x1f4] sm:$0xf] %v404_v35 }
  0x98   :  { %430 = vst [vmem:[#allocation4 + $0x110] sm:$0xf] %v421_v42 }
  0x99   :  { %447 = vst [vmem:[#allocation4 + $0xf8] sm:$0xf] %v421_v42 }
  0x9a   :  { %438 = vst [vmem:[#allocation4 + $0x230] sm:$0xf] %v422_v34 }
  0x9b   :  { %455 = vst [vmem:[#allocation4 + $0x218] sm:$0xf] %v422_v34 }
  0x9c   :  { %448 = vst [vmem:[#allocation4 + $0x11c] sm:$0xf] %v439_v0 }
  0x9d   :  { %456 = vst [vmem:[#allocation4 + $0x23c] sm:$0xf] %v440_v44 }
  0x9e   :  { %5544 = dma.done.wait [#allocation7], 9216 }
  0x9f   :  { %5545 = vsyncadd [#allocation7], 4294958080  ;;  %v5213_v10 = vld [vmem:[#allocation2 + $0x38] sm:$0xff]  ;;  %v5212_v5 = vld [vmem:[#allocation2 + $0x30] sm:$0xff]  ;;  %v5555_v18 = vmov 0.0   ;;  %v5556_v3 = vmov 0.0|0.0  }
  0xa0   :  { %v5221_v28 = vld [vmem:[#allocation2 + $0x78] sm:$0xff]  ;;  %5422 = vmatpush.bf16.msra.mxu2 %v5213_v10  ;;  %v5220_v58 = vld [vmem:[#allocation2 + $0x70] sm:$0xff]  ;;  %v6133_v29 = vrot.slane %v5555_v18, 1  ;;  %1485 = vmatpush.bf16.msra.mxu0 %v5213_v10  ;;  %v6139_v31 = vld [vmem:[#allocation4 + $0x120] sm:$0xf]  ;;  %vm1999_vm2 = vcmp.lt.s32.totalorder %v5654_v33, 1 }
  0xa1   :  { %5430 = vmatpush.bf16.msra.mxu3 %v5221_v28  ;;  %1534 = vmatpush.bf16.msra.mxu1 %v5221_v28  ;;  %v5211_v57 = vld [vmem:[#allocation2 + $0x28] sm:$0xff]  ;;  %2129 = vst [vmem:[#allocation4 + $0x120] sm:$0xf] %v5556_v3  ;;  %v5170_v20 = vld [vmem:[#allocation4 + $0x124] sm:$0xf]  ;;  %v5209_v27 = vld [vmem:[#allocation2 + $0x18] sm:$0xff] }
  0xa2   :  { %v6137_v36 = vpack.c.bf16 %v6133_v29, %v6133_v29  ;;  %v5219_v41 = vld [vmem:[#allocation2 + $0x68] sm:$0xff]  ;;  %v3982_v32 = vld [vmem:[#allocation4] sm:$0xf]  ;;  %v5134_v39 = vld [vmem:[#allocation4 + $0x4] sm:$0xf] }
  0xa3   :  { %2121 = vst [vmem:[#allocation4] sm:$0xf] %v5556_v3  ;;  %v5210_v61 = vld [vmem:[#allocation2 + $0x20] sm:$0xff]  ;;  %v5217_v54 = vld [vmem:[#allocation2 + $0x58] sm:$0xff]  ;;  %v5208_v22 = vld [vmem:[#allocation2 + $0x10] sm:$0xff] }
  0xa4   :  { %5423 = vmatpush.bf16.msra.mxu2 %v5212_v5  ;;  %1486 = vmatpush.bf16.msra.mxu0 %v5212_v5  ;;  %2277 = vst [vmem:[#allocation4 + $0x124] sm:$0xf] %v6137_v36  ;;  %v5218_v55 = vld [vmem:[#allocation2 + $0x60] sm:$0xff]  ;;  %v5216_v51 = vld [vmem:[#allocation2 + $0x50] sm:$0xff]  ;;  %v5207_v12 = vld [vmem:[#allocation2 + $0x8] sm:$0xff] }
  0xa5   :  { %5431 = vmatpush.bf16.msra.mxu3 %v5220_v58  ;;  %1535 = vmatpush.bf16.msra.mxu1 %v5220_v58  ;;  %2269 = vst [vmem:[#allocation4 + $0x4] sm:$0xf] %v6137_v36  ;;  %v5215_v63 = vld [vmem:[#allocation2 + $0x48] sm:$0xff]  ;;  %v5206_v45 = vld [vmem:[#allocation2] sm:$0xff]  ;;  %v5229_v19 = vld [vmem:[#allocation2 + $0xb8] sm:$0xff] }
  0xa6   :  { %v5214_v8 = vld [vmem:[#allocation2 + $0x40] sm:$0xff]  ;;  %v4128_v1 = vld [vmem:[#allocation4 + $0x144] sm:$0xf0]  ;;  %v5237_v48 = vld [vmem:[#allocation2 + $0xf8] sm:$0xff] }
  0xa7   :  { %v5174_v53 = vld [vmem:[#allocation4 + $0x140] sm:$0xf0]  ;;  %v3984_v24 = vld [vmem:[#allocation4 + $0x24] sm:$0xf0]  ;;  %v4131_v14 = vor.u32 %v5170_v20, %v4128_v1  ;;  %v5245_v60 = vld [vmem:[#allocation2 + $0x138] sm:$0xff] }
  0xa8   :  { %5424 = vmatpush.bf16.msra.mxu2 %v5211_v57  ;;  %1487 = vmatpush.bf16.msra.mxu0 %v5211_v57  ;;  %v5138_v16 = vld [vmem:[#allocation4 + $0x20] sm:$0xf0]  ;;  %v4127_v13 = vor.u32 %v5174_v53, %v6139_v31  ;;  %v3987_v7 = vor.u32 %v5134_v39, %v3984_v24  ;;  %v5228_v50 = vld [vmem:[#allocation2 + $0xb0] sm:$0xff]  ;;  %v5253_v15 = vld [vmem:[#allocation2 + $0x178] sm:$0xff] }
  0xa9   :  { %5432 = vmatpush.bf16.msra.mxu3 %v5219_v41  ;;  %1536 = vmatpush.bf16.msra.mxu1 %v5219_v41  ;;  %v3983_v9 = vor.u32 %v5138_v16, %v3982_v32  ;;  %v5236_v52 = vld [vmem:[#allocation2 + $0xf0] sm:$0xff]  ;;  %v5227_v26 = vld [vmem:[#allocation2 + $0xa8] sm:$0xff]  ;;  %v5226_v23 = vld [vmem:[#allocation2 + $0xa0] sm:$0xff] }
  0xaa   :  { %v5244_v35 = vld [vmem:[#allocation2 + $0x130] sm:$0xff]  ;;  %v5235_v37 = vld [vmem:[#allocation2 + $0xe8] sm:$0xff]  ;;  %v5234_v42 = vld [vmem:[#allocation2 + $0xe0] sm:$0xff] }
  0xab   :  { %v5243_v17 = vld [vmem:[#allocation2 + $0x128] sm:$0xff]  ;;  %v4164_v0 = vld [vmem:[#allocation4 + $0x18c] sm:$0xf0]  ;;  %v5242_v58 = vld [vmem:[#allocation2 + $0x120] sm:$0xff] }
  0xac   :  { %5425 = vmatpush.bf16.msra.mxu2 %v5210_v61  ;;  %1488 = vmatpush.bf16.msra.mxu0 %v5210_v61  ;;  %v4162_v46 = vld [vmem:[#allocation4 + $0x168] sm:$0xf]  ;;  %v5183_v34 = vld [vmem:[#allocation4 + $0x188] sm:$0xf0]  ;;  %v4020_v5 = vld [vmem:[#allocation4 + $0x6c] sm:$0xf0] }
  0xad   :  { %5433 = vmatpush.bf16.msra.mxu3 %v5218_v55  ;;  %1537 = vmatpush.bf16.msra.mxu1 %v5218_v55  ;;  %v5179_v40 = vld [vmem:[#allocation4 + $0x16c] sm:$0xf]  ;;  %v4018_v44 = vld [vmem:[#allocation4 + $0x48] sm:$0xf]  ;;  %v5225_v18 = vld [vmem:[#allocation2 + $0x98] sm:$0xff]  ;;  %v4163_v57 = vor.u32 %v5183_v34, %v4162_v46 }
  0xae   :  { %v5147_v10 = vld [vmem:[#allocation4 + $0x68] sm:$0xf0]  ;;  %v5233_v31 = vld [vmem:[#allocation2 + $0xd8] sm:$0xff]  ;;  %v4167_v41 = vor.u32 %v5179_v40, %v4164_v0  ;;  %v5224_v61 = vld [vmem:[#allocation2 + $0x90] sm:$0xff] }
  0xaf   :  { %v5143_v28 = vld [vmem:[#allocation4 + $0x4c] sm:$0xf]  ;;  %v4019_v20 = vor.u32 %v5147_v10, %v4018_v44  ;;  %v5241_v39 = vld [vmem:[#allocation2 + $0x118] sm:$0xff]  ;;  %v5232_v55 = vld [vmem:[#allocation2 + $0xd0] sm:$0xff] }
  0xb0   :  { %5426 = vmatpush.bf16.msra.mxu2 %v5209_v27  ;;  %1489 = vmatpush.bf16.msra.mxu0 %v5209_v27  ;;  %v4023_v32 = vor.u32 %v5143_v28, %v4020_v5  ;;  %v5252_v27 = vld [vmem:[#allocation2 + $0x170] sm:$0xff]  ;;  %v5222_v53 = vld [vmem:[#allocation2 + $0x80] sm:$0xff]  ;;  %v4234_v34 = vld [vmem:[#allocation4 + $0x1f8] sm:$0xf] }
  0xb1   :  { %5434 = vmatpush.bf16.msra.mxu3 %v5217_v54  ;;  %1538 = vmatpush.bf16.msra.mxu1 %v5217_v54  ;;  %v5240_v54 = vld [vmem:[#allocation2 + $0x110] sm:$0xff]  ;;  %v5230_v1 = vld [vmem:[#allocation2 + $0xc0] sm:$0xff]  ;;  %v5201_v40 = vld [vmem:[#allocation4 + $0x218] sm:$0xf0] }
  0xb2   :  { %v5192_v16 = vld [vmem:[#allocation4 + $0x1d0] sm:$0xf0]  ;;  %v5246_v46 = vld [vmem:[#allocation2 + $0x140] sm:$0xff]  ;;  %v5197_v0 = vld [vmem:[#allocation4 + $0x1fc] sm:$0xf] }
  0xb3   :  { %v5188_v24 = vld [vmem:[#allocation4 + $0x1b4] sm:$0xf]  ;;  %v4236_v44 = vld [vmem:[#allocation4 + $0x21c] sm:$0xf0]  ;;  %v4090_v10 = vld [vmem:[#allocation4 + $0xd8] sm:$0xf] }
  0xb4   :  { %5427 = vmatpush.bf16.msra.mxu2 %v5208_v22  ;;  %1490 = vmatpush.bf16.msra.mxu0 %v5208_v22  ;;  %v5251_v22 = vld [vmem:[#allocation2 + $0x168] sm:$0xff]  ;;  %v5165_v28 = vld [vmem:[#allocation4 + $0xf8] sm:$0xf0] }
  0xb5   :  { %5435 = vmatpush.bf16.msra.mxu3 %v5216_v51  ;;  %1539 = vmatpush.bf16.msra.mxu1 %v5216_v51  ;;  %v5223_v51 = vld [vmem:[#allocation2 + $0x88] sm:$0xff]  ;;  %v5161_v5 = vld [vmem:[#allocation4 + $0xdc] sm:$0xf] }
  0xb8   :  { %5428 = vmatpush.bf16.msra.mxu2 %v5207_v12  ;;  %1491 = vmatpush.bf16.msra.mxu0 %v5207_v12  ;;  %v5231_v12 = vld [vmem:[#allocation2 + $0xc8] sm:$0xff] }
  0xb9   :  { %5436 = vmatpush.bf16.msra.mxu3 %v5215_v63  ;;  %1540 = vmatpush.bf16.msra.mxu1 %v5215_v63  ;;  %v5250_v63 = vld [vmem:[#allocation2 + $0x160] sm:$0xff] }
  0xbc   :  { %5429 = vmatpush.bf16.msra.mxu2 %v5206_v45  ;;  %1492 = vmatpush.bf16.msra.mxu0 %v5206_v45  ;;  %v5239_v45 = vld [vmem:[#allocation2 + $0x108] sm:$0xff] }
  0xbd   :  { %5437 = vmatpush.bf16.msra.mxu3 %v5214_v8  ;;  %1541 = vmatpush.bf16.msra.mxu1 %v5214_v8  ;;  %v4198_v8 = vld [vmem:[#allocation4 + $0x1b0] sm:$0xf] }
  0xbf   :  { %1513 = vmatmul.bf16.vlgmr.msra.gmra.mxu2 %v4127_v13  ;;  %1493 = vmatmul.bf16.vlgmr.msra.gmra.mxu0 %v3983_v9  ;;  %v5156_v13 = vld [vmem:[#allocation4 + $0xb0] sm:$0xf0]  ;;  %v4056_v9 = vld [vmem:[#allocation4 + $0xb4] sm:$0xf0] }
  0xc0   :  { %1583 = vmatpush.bf16.msrb.mxu2 %v5229_v19  ;;  %1562 = vmatmul.bf16.vlgmr.msra.gmra.mxu3 %v4131_v14  ;;  %v4200_v19 = vld [vmem:[#allocation4 + $0x1d4] sm:$0xf0]  ;;  %v5152_v14 = vld [vmem:[#allocation4 + $0x94] sm:$0xf] }
  0xc1   :  { %1632 = vmatpush.bf16.msrb.mxu3 %v5237_v48  ;;  %1542 = vmatmul.bf16.vlgmr.msra.gmra.mxu1 %v3987_v7  ;;  %v4054_v48 = vld [vmem:[#allocation4 + $0x90] sm:$0xf]  ;;  %v5249_v7 = vld [vmem:[#allocation2 + $0x158] sm:$0xff] }
  0xc2   :  { %1681 = vmatpush.bf16.msrb.mxu0 %v5245_v60  ;;  %1730 = vmatpush.bf16.msrb.mxu1 %v5253_v15  ;;  %v5238_v60 = vld [vmem:[#allocation2 + $0x100] sm:$0xff]  ;;  %v4059_v15 = vor.u32 %v5152_v14, %v4056_v9  ;;  %v5144_v14 = vld [vmem:[#allocation4 + $0x54] sm:$0xf]  ;;  %v4028_v9 = vld [vmem:[#allocation4 + $0x74] sm:$0xf0] }
  0xc4   :  { %1584 = vmatpush.bf16.msrb.mxu2 %v5228_v50  ;;  %v4199_v50 = vor.u32 %v5192_v16, %v4198_v8  ;;  %v5259_v16 = vld [vmem:[#allocation2 + $0x1a8] sm:$0xff] }
  0xc5   :  { %1633 = vmatpush.bf16.msrb.mxu3 %v5236_v52  ;;  %v4203_v52 = vor.u32 %v5188_v24, %v4200_v19  ;;  %v5267_v24 = vld [vmem:[#allocation2 + $0x1e8] sm:$0xff] }
  0xc6   :  { %1682 = vmatpush.bf16.msrb.mxu0 %v5244_v35  ;;  %1731 = vmatpush.bf16.msrb.mxu1 %v5252_v27  ;;  %v4055_v35 = vor.u32 %v5156_v13, %v4054_v48  ;;  %v5135_v27 = vld [vmem:[#allocation4 + $0xc] sm:$0xf]  ;;  %v4026_v48 = vld [vmem:[#allocation4 + $0x50] sm:$0xf]  ;;  %v5148_v13 = vld [vmem:[#allocation4 + $0x70] sm:$0xf0] }
  0xc7   :  { %v5275_v19 = vld [vmem:[#allocation2 + $0x228] sm:$0xff] }
  0xc8   :  { %1585 = vmatpush.bf16.msrb.mxu2 %v5227_v26  ;;  %v5248_v26 = vld [vmem:[#allocation2 + $0x150] sm:$0xff] }
  0xc9   :  { %1634 = vmatpush.bf16.msrb.mxu3 %v5235_v37  ;;  %v5261_v37 = vld [vmem:[#allocation2 + $0x1b8] sm:$0xff] }
  0xca   :  { %1683 = vmatpush.bf16.msrb.mxu0 %v5243_v17  ;;  %1732 = vmatpush.bf16.msrb.mxu1 %v5251_v22  ;;  %v5269_v17 = vld [vmem:[#allocation2 + $0x1f8] sm:$0xff]  ;;  %v3998_v22 = vld [vmem:[#allocation4 + $0x10] sm:$0xf] }
  0xcc   :  { %1586 = vmatpush.bf16.msrb.mxu2 %v5226_v23  ;;  %v5247_v23 = vld [vmem:[#allocation2 + $0x148] sm:$0xff] }
  0xcd   :  { %1635 = vmatpush.bf16.msrb.mxu3 %v5234_v42  ;;  %v5277_v42 = vld [vmem:[#allocation2 + $0x238] sm:$0xff] }
  0xce   :  { %1684 = vmatpush.bf16.msrb.mxu0 %v5242_v58  ;;  %1733 = vmatpush.bf16.msrb.mxu1 %v5250_v63  ;;  %v4092_v58 = vld [vmem:[#allocation4 + $0xfc] sm:$0xf0]  ;;  %v4000_v63 = vld [vmem:[#allocation4 + $0x34] sm:$0xf0] }
  0xcf   :  { %1518 = vmatmul.bf16.gmra.mxu2 %v4163_v57  ;;  %1498 = vmatmul.bf16.gmra.mxu0 %v4019_v20  ;;  %v4091_v57 = vor.u32 %v5165_v28, %v4090_v10  ;;  %v5260_v20 = vld [vmem:[#allocation2 + $0x1b0] sm:$0xff]  ;;  %v5158_v10 = vld [vmem:[#allocation4 + $0xc0] sm:$0xf0] }
  0xd0   :  { %1587 = vmatpush.bf16.msrb.mxu2 %v5225_v18  ;;  %1567 = vmatmul.bf16.gmra.mxu3 %v4167_v41  ;;  %v4235_v18 = vor.u32 %v5201_v40, %v4234_v34  ;;  %v4095_v41 = vor.u32 %v5161_v5, %v4092_v58  ;;  %v5157_v34 = vld [vmem:[#allocation4 + $0xb8] sm:$0xf0]  ;;  %v5154_v28 = vld [vmem:[#allocation4 + $0xa4] sm:$0xf]  ;;  %v4072_v5 = vld [vmem:[#allocation4 + $0xc4] sm:$0xf0] }
  0xd1   :  { %1636 = vmatpush.bf16.msrb.mxu3 %v5233_v31  ;;  %1547 = vmatmul.bf16.gmra.mxu1 %v4023_v32  ;;  %v4239_v31 = vor.u32 %v5197_v0, %v4236_v44  ;;  %v5268_v32 = vld [vmem:[#allocation2 + $0x1f0] sm:$0xff]  ;;  %v5153_v40 = vld [vmem:[#allocation4 + $0x9c] sm:$0xf]  ;;  %v4064_v0 = vld [vmem:[#allocation4 + $0xbc] sm:$0xf0] }
  0xd2   :  { %1685 = vmatpush.bf16.msrb.mxu0 %v5241_v39  ;;  %1734 = vmatpush.bf16.msrb.mxu1 %v5249_v7  ;;  %v5276_v39 = vld [vmem:[#allocation2 + $0x230] sm:$0xff]  ;;  %v4034_v7 = vld [vmem:[#allocation4 + $0x58] sm:$0xf]  ;;  %v4070_v44 = vld [vmem:[#allocation4 + $0xa0] sm:$0xf] }
  0xd4   :  { %1588 = vmatpush.bf16.msrb.mxu2 %v5224_v61  ;;  %v3990_v61 = vld [vmem:[#allocation4 + $0x8] sm:$0xf] }
  0xd5   :  { %1637 = vmatpush.bf16.msrb.mxu3 %v5232_v55  ;;  %v5139_v55 = vld [vmem:[#allocation4 + $0x28] sm:$0xf0] }
  0xd6   :  { %1686 = vmatpush.bf16.msrb.mxu0 %v5240_v54  ;;  %1735 = vmatpush.bf16.msrb.mxu1 %v5248_v26  ;;  %v3992_v54 = vld [vmem:[#allocation4 + $0x2c] sm:$0xf0] }
  0xd7   :  { %v3995_v8 = vor.u32 %v5135_v27, %v3992_v54  ;;  %v4100_v27 = vld [vmem:[#allocation4 + $0x104] sm:$0xf0] }
  0xd8   :  { %1589 = vmatpush.bf16.msrb.mxu2 %v5223_v51  ;;  %v5140_v51 = vld [vmem:[#allocation4 + $0x30] sm:$0xf0]  ;;  %v4106_v54 = vld [vmem:[#allocation4 + $0xe8] sm:$0xf] }
  0xd9   :  { %1638 = vmatpush.bf16.msrb.mxu3 %v5231_v12  ;;  %v5136_v12 = vld [vmem:[#allocation4 + $0x14] sm:$0xf] }
  0xda   :  { %1687 = vmatpush.bf16.msrb.mxu0 %v5239_v45  ;;  %1736 = vmatpush.bf16.msrb.mxu1 %v5247_v23  ;;  %v3991_v45 = vor.u32 %v5139_v55, %v3990_v61  ;;  %v5266_v23 = vld [vmem:[#allocation2 + $0x1e0] sm:$0xff] }
  0xdb   :  { %v5166_v61 = vld [vmem:[#allocation4 + $0x100] sm:$0xf0] }
  0xdc   :  { %1590 = vmatpush.bf16.msrb.mxu2 %v5222_v53  ;;  %v3999_v53 = vor.u32 %v5140_v51, %v3998_v22  ;;  %v5162_v55 = vld [vmem:[#allocation4 + $0xe4] sm:$0xf]  ;;  %v5167_v22 = vld [vmem:[#allocation4 + $0x108] sm:$0xf0] }
  0xdd   :  { %1639 = vmatpush.bf16.msrb.mxu3 %v5230_v1  ;;  %v4003_v1 = vor.u32 %v5136_v12, %v4000_v63  ;;  %v5163_v51 = vld [vmem:[#allocation4 + $0xec] sm:$0xf]  ;;  %v4108_v12 = vld [vmem:[#allocation4 + $0x10c] sm:$0xf0] }
  0xde   :  { %1688 = vmatpush.bf16.msrb.mxu0 %v5238_v60  ;;  %1737 = vmatpush.bf16.msrb.mxu1 %v5246_v46  ;;  %v5149_v60 = vld [vmem:[#allocation4 + $0x78] sm:$0xf0]  ;;  %v4062_v46 = vld [vmem:[#allocation4 + $0x98] sm:$0xf] }
  0xdf   :  { %1523 = vmatmul.bf16.gmra.mxu2 %v4199_v50  ;;  %1503 = vmatmul.bf16.gmra.mxu0 %v4055_v35  ;;  %v5145_v50 = vld [vmem:[#allocation4 + $0x5c] sm:$0xf]  ;;  %v4027_v35 = vor.u32 %v5148_v13, %v4026_v48  ;;  %v4035_v26 = vor.u32 %v5149_v60, %v4034_v7  ;;  %v4063_v58 = vor.u32 %v5157_v34, %v4062_v46  ;;  %v5175_v48 = vld [vmem:[#allocation4 + $0x148] sm:$0xf0]  ;;  %v5176_v7 = vld [vmem:[#allocation4 + $0x150] sm:$0xf0] }
  0xe0   :  { %1572 = vmatmul.bf16.gmra.mxu3 %v4203_v52  ;;  %1779 = vmatpush.bf16.msra.mxu2 %v5261_v37  ;;  %v4036_v52 = vld [vmem:[#allocation4 + $0x7c] sm:$0xf0]  ;;  %v5171_v13 = vld [vmem:[#allocation4 + $0x12c] sm:$0xf]  ;;  %v5172_v60 = vld [vmem:[#allocation4 + $0x134] sm:$0xf] }
  0xe1   :  { %1552 = vmatmul.bf16.gmra.mxu1 %v4059_v15  ;;  %1828 = vmatpush.bf16.msra.mxu3 %v5269_v17  ;;  %v4031_v15 = vor.u32 %v5144_v14, %v4028_v9  ;;  %v4039_v37 = vor.u32 %v5145_v50, %v4036_v52  ;;  %v5258_v17 = vld [vmem:[#allocation2 + $0x1a0] sm:$0xff]  ;;  %v4136_v14 = vld [vmem:[#allocation4 + $0x14c] sm:$0xf0]  ;;  %v4144_v50 = vld [vmem:[#allocation4 + $0x154] sm:$0xf0] }
  0xe2   :  { %1877 = vmatpush.bf16.msra.mxu0 %v5277_v42  ;;  %v5274_v42 = vld [vmem:[#allocation2 + $0x220] sm:$0xff]  ;;  %v4142_v9 = vld [vmem:[#allocation4 + $0x130] sm:$0xf] }
  0xe4   :  { %1780 = vmatpush.bf16.msra.mxu2 %v5260_v20  ;;  %v5265_v20 = vld [vmem:[#allocation2 + $0x1d8] sm:$0xff] }
  0xe5   :  { %1829 = vmatpush.bf16.msra.mxu3 %v5268_v32  ;;  %v5273_v32 = vld [vmem:[#allocation2 + $0x218] sm:$0xff] }
  0xe6   :  { %1878 = vmatpush.bf16.msra.mxu0 %v5276_v39  ;;  %v4098_v39 = vld [vmem:[#allocation4 + $0xe0] sm:$0xf] }
  0xe7   :  { %v4099_v63 = vor.u32 %v5166_v61, %v4098_v39 }
  0xe8   :  { %1781 = vmatpush.bf16.msra.mxu2 %v5259_v16  ;;  %v5264_v16 = vld [vmem:[#allocation2 + $0x1d0] sm:$0xff] }
  0xe9   :  { %1830 = vmatpush.bf16.msra.mxu3 %v5267_v24  ;;  %v5272_v24 = vld [vmem:[#allocation2 + $0x210] sm:$0xff] }
  0xea   :  { %1879 = vmatpush.bf16.msra.mxu0 %v5275_v19  ;;  %v4134_v19 = vld [vmem:[#allocation4 + $0x128] sm:$0xf] }
  0xeb   :  { %v4135_v52 = vor.u32 %v5175_v48, %v4134_v19  ;;  %v4208_v19 = vld [vmem:[#allocation4 + $0x1dc] sm:$0xf0] }
  0xec   :  { %1782 = vmatpush.bf16.msra.mxu2 %v5258_v17  ;;  %v5255_v17 = vld [vmem:[#allocation2 + $0x188] sm:$0xff]  ;;  %v4214_v48 = vld [vmem:[#allocation4 + $0x1c0] sm:$0xf] }
  0xed   :  { %1831 = vmatpush.bf16.msra.mxu3 %v5266_v23  ;;  %v5263_v23 = vld [vmem:[#allocation2 + $0x1c8] sm:$0xff] }
  0xee   :  { %1880 = vmatpush.bf16.msra.mxu0 %v5274_v42 }
  0xef   :  { %1528 = vmatmul.bf16.gmra.mxu2 %v4235_v18  ;;  %1508 = vmatmul.bf16.gmra.mxu0 %v4091_v57  ;;  %v4067_v18 = vor.u32 %v5153_v40, %v4064_v0  ;;  %v4075_v57 = vor.u32 %v5154_v28, %v4072_v5  ;;  %v5271_v0 = vld [vmem:[#allocation2 + $0x208] sm:$0xff]  ;;  %v5180_v28 = vld [vmem:[#allocation4 + $0x174] sm:$0xf]  ;;  %v4172_v5 = vld [vmem:[#allocation4 + $0x194] sm:$0xf0] }
  0xf0   :  { %1577 = vmatmul.bf16.gmra.mxu3 %v4239_v31  ;;  %v4071_v31 = vor.u32 %v5158_v10, %v4070_v44  ;;  %v4170_v44 = vld [vmem:[#allocation4 + $0x170] sm:$0xf]  ;;  %v5184_v10 = vld [vmem:[#allocation4 + $0x190] sm:$0xf0]  ;;  %v4175_v61 = vor.u32 %v5180_v28, %v4172_v5  ;;  %v5198_v28 = vld [vmem:[#allocation4 + $0x204] sm:$0xf] }
  0xf1   :  { %1557 = vmatmul.bf16.gmra.mxu1 %v4095_v41  ;;  %v5257_v41 = vld [vmem:[#allocation2 + $0x198] sm:$0xff]  ;;  %1832 = vmatpush.bf16.msra.mxu3 %v5265_v20  ;;  %v4171_v39 = vor.u32 %v5184_v10, %v4170_v44  ;;  %v4242_v44 = vld [vmem:[#allocation4 + $0x200] sm:$0xf]  ;;  %v5202_v10 = vld [vmem:[#allocation4 + $0x220] sm:$0xf0] }
  0xf2   :  { %1783 = vmatpush.bf16.msra.mxu2 %v5257_v41  ;;  %1881 = vmatpush.bf16.msra.mxu0 %v5273_v32  ;;  %v4244_v5 = vld [vmem:[#allocation4 + $0x224] sm:$0xf0] }
  0xf5   :  { %1833 = vmatpush.bf16.msra.mxu3 %v5264_v16  ;;  %v5193_v16 = vld [vmem:[#allocation4 + $0x1d8] sm:$0xf0] }
  0xf6   :  { %1882 = vmatpush.bf16.msra.mxu0 %v5272_v24  ;;  %v5189_v24 = vld [vmem:[#allocation4 + $0x1bc] sm:$0xf] }
  0xf9   :  { %1834 = vmatpush.bf16.msra.mxu3 %v5263_v23 }
  0xfa   :  { %1883 = vmatpush.bf16.msra.mxu0 %v5271_v0 }
  0xff   :  { %1591 = vmatmul.bf16.vlgmr.msrb.gmra.mxu2 %v3991_v45  ;;  %1689 = vmatmul.bf16.vlgmr.msrb.gmra.mxu0 %v3999_v53  ;;  %v4103_v45 = vor.u32 %v5162_v55, %v4100_v27  ;;  %v4111_v53 = vor.u32 %v5163_v51, %v4108_v12  ;;  %v5262_v51 = vld [vmem:[#allocation2 + $0x1c0] sm:$0xff] }
 0x100   :  { %1640 = vmatmul.bf16.vlgmr.msrb.gmra.mxu3 %v3995_v8  ;;  %v4107_v8 = vor.u32 %v5167_v22, %v4106_v54  ;;  %v5254_v22 = vld [vmem:[#allocation2 + $0x180] sm:$0xff] }
 0x101   :  { %1738 = vmatmul.bf16.vlgmr.msrb.gmra.mxu1 %v4003_v1  ;;  %v5256_v1 = vld [vmem:[#allocation2 + $0x190] sm:$0xff]  ;;  %1835 = vmatpush.bf16.msra.mxu3 %v5262_v51 }
 0x102   :  { %1784 = vmatpush.bf16.msra.mxu2 %v5256_v1  ;;  %v4206_v1 = vld [vmem:[#allocation4 + $0x1b8] sm:$0xf] }
 0x106   :  { %1785 = vmatpush.bf16.msra.mxu2 %v5255_v17 }
 0x10a   :  { %1786 = vmatpush.bf16.msra.mxu2 %v5254_v22 }
 0x10f   :  { %1596 = vmatmul.bf16.gmra.mxu2 %v4027_v35  ;;  %1694 = vmatmul.bf16.gmra.mxu0 %v4035_v26  ;;  %v4139_v35 = vor.u32 %v5171_v13, %v4136_v14  ;;  %v4147_v26 = vor.u32 %v5172_v60, %v4144_v50  ;;  %v5194_v13 = vld [vmem:[#allocation4 + $0x1e0] sm:$0xf0] }
 0x110   :  { %1645 = vmatmul.bf16.gmra.mxu3 %v4031_v15  ;;  %v4143_v15 = vor.u32 %v5176_v7, %v4142_v9  ;;  %v5190_v14 = vld [vmem:[#allocation4 + $0x1c4] sm:$0xf]  ;;  %v4216_v9 = vld [vmem:[#allocation4 + $0x1e4] sm:$0xf0] }
 0x111   :  { %1743 = vmatmul.bf16.gmra.mxu1 %v4039_v37 }
 0x11f   :  { %1601 = vmatmul.bf16.gmra.mxu2 %v4063_v58  ;;  %1699 = vmatmul.bf16.gmra.mxu0 %v4071_v31  ;;  %v4178_v58 = vld [vmem:[#allocation4 + $0x178] sm:$0xf]  ;;  %v5181_v31 = vld [vmem:[#allocation4 + $0x17c] sm:$0xf] }
 0x120   :  { %1650 = vmatmul.bf16.gmra.mxu3 %v4067_v18  ;;  %v5185_v18 = vld [vmem:[#allocation4 + $0x198] sm:$0xf0] }
 0x121   :  { %1748 = vmatmul.bf16.gmra.mxu1 %v4075_v57  ;;  %v4180_v57 = vld [vmem:[#allocation4 + $0x19c] sm:$0xf0]  ;;  %v4179_v55 = vor.u32 %v5185_v18, %v4178_v58  ;;  %v4250_v58 = vld [vmem:[#allocation4 + $0x208] sm:$0xf]  ;;  %v5203_v18 = vld [vmem:[#allocation4 + $0x228] sm:$0xf0] }
 0x122   :  { %v4183_v27 = vor.u32 %v5181_v31, %v4180_v57  ;;  %v5199_v31 = vld [vmem:[#allocation4 + $0x20c] sm:$0xf]  ;;  %v4252_v57 = vld [vmem:[#allocation4 + $0x22c] sm:$0xf0] }
 0x123   :  { %v4255_v22 = vor.u32 %v5199_v31, %v4252_v57 }
 0x12f   :  { %1606 = vmatmul.bf16.gmra.mxu2 %v4099_v63  ;;  %1704 = vmatmul.bf16.gmra.mxu0 %v4107_v8 }
 0x130   :  { %1655 = vmatmul.bf16.gmra.mxu3 %v4103_v45 }
 0x131   :  { %1753 = vmatmul.bf16.gmra.mxu1 %v4111_v53  ;;  %v5270_v53 = vld [vmem:[#allocation2 + $0x200] sm:$0xff] }
 0x132   :  { %1884 = vmatpush.bf16.msra.mxu0 %v5270_v53 }
 0x13c   :  { %v6146_v37 = vpop.f32.mrf.mxu0 }
 0x13f   :  { %1611 = vmatmul.bf16.gmra.mxu2 %v4135_v52  ;;  %1709 = vmatmul.bf16.gmra.mxu0 %v4143_v15  ;;  %v4207_v52 = vor.u32 %v5193_v16, %v4206_v1  ;;  %v4215_v15 = vor.u32 %v5194_v13, %v4214_v48  ;;  %v5137_v48 = vld [vmem:[#allocation4 + $0x1c] sm:$0xf]  ;;  %v4008_v13 = vld [vmem:[#allocation4 + $0x3c] sm:$0xf0] }
 0x140   :  { %1660 = vmatmul.bf16.gmra.mxu3 %v4139_v35  ;;  %v4211_v35 = vor.u32 %v5189_v24, %v4208_v19  ;;  %v4006_v24 = vld [vmem:[#allocation4 + $0x18] sm:$0xf]  ;;  %v5141_v19 = vld [vmem:[#allocation4 + $0x38] sm:$0xf0] }
 0x141   :  { %1758 = vmatmul.bf16.gmra.mxu1 %v4147_v26  ;;  %v4219_v26 = vor.u32 %v5190_v14, %v4216_v9  ;;  %v4014_v9 = vld [vmem:[#allocation4 + $0x20] sm:$0xf] }
 0x142   :  { %v1514_v42 = vpop.f32.mrf.mxu2 }
 0x143   :  { %v1563_v46 = vpop.f32.mrf.mxu3 }
 0x144   :  { %v6148_v34 = vadd.f32 %v1563_v46, %v1514_v42  ;;  %v6150_v40 = vpop.f32.mrf.mxu0 }
 0x14a   :  { %v1516_v41 = vpop.f32.mrf.mxu2 }
 0x14b   :  { %v1565_v20 = vpop.f32.mrf.mxu3 }
 0x14c   :  { %v6152_v32 = vadd.f32 %v1565_v20, %v1516_v41  ;;  %v6154_v54 = vpop.f32.mrf.mxu0 }
 0x14f   :  { %1616 = vmatmul.bf16.gmra.mxu2 %v4171_v39  ;;  %1714 = vmatmul.bf16.gmra.mxu0 %v4179_v55  ;;  %v4247_v55 = vor.u32 %v5198_v28, %v4244_v5 }
 0x150   :  { %1665 = vmatmul.bf16.gmra.mxu3 %v4175_v61  ;;  %v4243_v61 = vor.u32 %v5202_v10, %v4242_v44 }
 0x151   :  { %1763 = vmatmul.bf16.gmra.mxu1 %v4183_v27  ;;  %v4251_v27 = vor.u32 %v5203_v18, %v4250_v58 }
 0x152   :  { %v1519_v12 = vpop.f32.mrf.mxu2 }
 0x153   :  { %v1568_v63 = vpop.f32.mrf.mxu3 }
 0x154   :  { %v6156_v45 = vadd.f32 %v1568_v63, %v1519_v12  ;;  %v6158_v8 = vpop.f32.mrf.mxu0  ;;  %v1543_v12 = vpop.f32.mrf.mxu1 }
 0x155   :  { %v1544_v44 = vadd.f32 %v1543_v12, %v6146_v37 }
 0x15a   :  { %v1521_v7 = vpop.f32.mrf.mxu2 }
 0x15b   :  { %v1570_v60 = vpop.f32.mrf.mxu3 }
 0x15c   :  { %v6160_v50 = vadd.f32 %v1570_v60, %v1521_v7  ;;  %v6162_v17 = vpop.f32.mrf.mxu0  ;;  %v1545_v14 = vpop.f32.mrf.mxu1  ;;  %v5142_v7 = vld [vmem:[#allocation4 + $0x40] sm:$0xf0] }
 0x15f   :  { %1621 = vmatmul.bf16.gmra.mxu2 %v4207_v52  ;;  %1719 = vmatmul.bf16.gmra.mxu0 %v4215_v15  ;;  %v4007_v15 = vor.u32 %v5141_v19, %v4006_v24 }
 0x160   :  { %1670 = vmatmul.bf16.gmra.mxu3 %v4211_v35 }
 0x161   :  { %1768 = vmatmul.bf16.gmra.mxu1 %v4219_v26  ;;  %v4011_v26 = vor.u32 %v5137_v48, %v4008_v13  ;;  %v6182_v13 = vld [vmem:[#allocation4 + $0x110] sm:$0xf0] }
 0x162   :  { %v1524_v23 = vpop.f32.mrf.mxu2  ;;  %2164 = vst [vmem:[#allocation4 + $0x114] sm:$0xf] %v5556_v3 }
 0x163   :  { %v1573_v42 = vpop.f32.mrf.mxu3 }
 0x164   :  { %v6164_v46 = vadd.f32 %v1573_v42, %v1524_v23  ;;  %v6166_v0 = vpop.f32.mrf.mxu0  ;;  %v4015_v23 = vor.u32 %v5142_v7, %v4014_v9  ;;  %v1548_v5 = vpop.f32.mrf.mxu1 }
 0x16a   :  { %v1526_v41 = vpop.f32.mrf.mxu2 }
 0x16b   :  { %v1575_v20 = vpop.f32.mrf.mxu3 }
 0x16c   :  { %v6168_v39 = vadd.f32 %v1575_v20, %v1526_v41  ;;  %v6170_v51 = vpop.f32.mrf.mxu0  ;;  %v4042_v41 = vld [vmem:[#allocation4 + $0x60] sm:$0xf]  ;;  %v5150_v20 = vld [vmem:[#allocation4 + $0x80] sm:$0xf0]  ;;  %v1550_v9 = vpop.f32.mrf.mxu1 }
 0x16d   :  { %v4043_v37 = vor.u32 %v5150_v20, %v4042_v41  ;;  %v4078_v41 = vld [vmem:[#allocation4 + $0xa8] sm:$0xf]  ;;  %v4080_v20 = vld [vmem:[#allocation4 + $0xcc] sm:$0xf0] }
 0x16f   :  { %1626 = vmatmul.bf16.gmra.mxu2 %v4243_v61  ;;  %1724 = vmatmul.bf16.gmra.mxu0 %v4251_v27  ;;  %v5146_v61 = vld [vmem:[#allocation4 + $0x64] sm:$0xf]  ;;  %v1546_v27 = vadd.f32 %v1545_v14, %v6150_v40  ;;  %v1549_v14 = vadd.f32 %v1548_v5, %v6154_v54  ;;  %v5159_v54 = vld [vmem:[#allocation4 + $0xc8] sm:$0xf0] }
 0x170   :  { %1675 = vmatmul.bf16.gmra.mxu3 %v4247_v55  ;;  %v4044_v55 = vld [vmem:[#allocation4 + $0x84] sm:$0xf0]  ;;  %v5155_v5 = vld [vmem:[#allocation4 + $0xac] sm:$0xf] }
 0x171   :  { %1773 = vmatmul.bf16.gmra.mxu1 %v4255_v22  ;;  %v4050_v22 = vld [vmem:[#allocation4 + $0x68] sm:$0xf]  ;;  %v4047_v12 = vor.u32 %v5146_v61, %v4044_v55  ;;  %v1551_v61 = vadd.f32 %v1550_v9, %v6158_v8  ;;  %v4086_v55 = vld [vmem:[#allocation4 + $0xb0] sm:$0xf] }
 0x172   :  { %v1529_v63 = vpop.f32.mrf.mxu2 }
 0x173   :  { %v1578_v53 = vpop.f32.mrf.mxu3 }
 0x174   :  { %v6172_v1 = vadd.f32 %v1578_v53, %v1529_v63  ;;  %v6174_v16 = vpop.f32.mrf.mxu0  ;;  %v5151_v63 = vld [vmem:[#allocation4 + $0x88] sm:$0xf0] }
 0x175   :  { %v4051_v48 = vor.u32 %v5151_v63, %v4050_v22 }
 0x17a   :  { %v1531_v60 = vpop.f32.mrf.mxu2 }
 0x17b   :  { %v1580_v52 = vpop.f32.mrf.mxu3 }
 0x17c   :  { %v6176_v35 = vadd.f32 %v1580_v52, %v1531_v60  ;;  %v1690_v42 = vpop.f32.mrf.mxu0  ;;  %v4116_v52 = vld [vmem:[#allocation4 + $0x114] sm:$0xf0] }
 0x17d   :  { %2312 = vst [vmem:[#allocation4 + $0x118] sm:$0xf] %v6137_v36 }
 0x17f   :  { %1787 = vmatmul.bf16.vlgmr.msra.gmra.mxu2 %v4007_v15  ;;  %1885 = vmatmul.bf16.vlgmr.msra.gmra.mxu0 %v4015_v23  ;;  %v6190_v15 = vrot.slane %v6133_v29, 1 }
 0x180   :  { %1836 = vmatmul.bf16.vlgmr.msra.gmra.mxu3 %v4011_v26 }
 0x182   :  { %v1592_v10 = vpop.f32.mrf.mxu2 }
 0x183   :  { %v1641_v28 = vpop.f32.mrf.mxu3  ;;  %v1593_v58 = vadd.f32 %v1592_v10, %v1544_v44  ;;  %v6194_v44 = vpack.c.bf16 %v6190_v15, %v6190_v15  ;;  %v5169_v10 = vld [vmem:[#allocation4 + $0x118] sm:$0xf0] }
 0x184   :  { %v1692_v31 = vpop.f32.mrf.mxu0 }
 0x185   :  { %v1642_v18 = vadd.f32 %v1641_v28, %v1593_v58  ;;  %2440 = vst [vmem:[#allocation4 + $0x11c] sm:$0xf] %v6194_v44 }
 0x187   :  { %v6179_v57 = vadd.f32 %v1690_v42, %v1642_v18  ;;  %v1553_v18 = vpop.f32.mrf.mxu1 }
 0x18a   :  { %v1594_v53 = vpop.f32.mrf.mxu2 }
 0x18b   :  { %v1643_v24 = vpop.f32.mrf.mxu3  ;;  %v1595_v19 = vadd.f32 %v1594_v53, %v1546_v27  ;;  %v5160_v27 = vld [vmem:[#allocation4 + $0xd0] sm:$0xf0] }
 0x18c   :  { %v1695_v60 = vpop.f32.mrf.mxu0 }
 0x18d   :  { %v1644_v7 = vadd.f32 %v1643_v24, %v1595_v19  ;;  %v4079_v24 = vor.u32 %v5159_v54, %v4078_v41  ;;  %v4083_v19 = vor.u32 %v5155_v5, %v4080_v20  ;;  %v4114_v41 = vld [vmem:[#allocation4 + $0xf0] sm:$0xf]  ;;  %v5164_v54 = vld [vmem:[#allocation4 + $0xf4] sm:$0xf]  ;;  %v4122_v20 = vld [vmem:[#allocation4 + $0xf8] sm:$0xf] }
 0x18f   :  { %1792 = vmatmul.bf16.gmra.mxu2 %v4043_v37  ;;  %v6186_v40 = vadd.f32 %v1692_v31, %v1644_v7  ;;  %1890 = vmatmul.bf16.gmra.mxu0 %v4051_v48  ;;  %v4087_v37 = vor.u32 %v5160_v27, %v4086_v55  ;;  %v4115_v27 = vor.u32 %v6182_v13, %v4114_v41  ;;  %v4150_v13 = vld [vmem:[#allocation4 + $0x138] sm:$0xf] }
 0x190   :  { %1841 = vmatmul.bf16.gmra.mxu3 %v4047_v12 }
 0x192   :  { %v1597_v26 = vpop.f32.mrf.mxu2 }
 0x193   :  { %v1646_v23 = vpop.f32.mrf.mxu3  ;;  %v1598_v42 = vadd.f32 %v1597_v26, %v1549_v14  ;;  %v1555_v14 = vpop.f32.mrf.mxu1 }
 0x194   :  { %v1697_v58 = vpop.f32.mrf.mxu0  ;;  %v1556_v5 = vadd.f32 %v1555_v14, %v6166_v0 }
 0x195   :  { %v1647_v28 = vadd.f32 %v1646_v23, %v1598_v42 }
 0x197   :  { %v6197_v31 = vadd.f32 %v1695_v60, %v1647_v28  ;;  %v1554_v60 = vadd.f32 %v1553_v18, %v6162_v17  ;;  %v4123_v18 = vor.u32 %v5169_v10, %v4122_v20  ;;  %v5173_v10 = vld [vmem:[#allocation4 + $0x13c] sm:$0xf] }
 0x19a   :  { %v1599_v22 = vpop.f32.mrf.mxu2 }
 0x19b   :  { %v1648_v63 = vpop.f32.mrf.mxu3  ;;  %v1600_v53 = vadd.f32 %v1599_v22, %v1551_v61  ;;  %v4119_v22 = vor.u32 %v5164_v54, %v4116_v52  ;;  %v1558_v17 = vpop.f32.mrf.mxu1  ;;  %v5177_v52 = vld [vmem:[#allocation4 + $0x158] sm:$0xf0] }
 0x19c   :  { %v1700_v48 = vpop.f32.mrf.mxu0 }
 0x19d   :  { %v1649_v12 = vadd.f32 %v1648_v63, %v1600_v53 }
 0x19f   :  { %1797 = vmatmul.bf16.gmra.mxu2 %v4079_v24  ;;  %v6200_v7 = vadd.f32 %v1697_v58, %v1649_v12  ;;  %1895 = vmatmul.bf16.gmra.mxu0 %v4087_v37 }
 0x1a0   :  { %1846 = vmatmul.bf16.gmra.mxu3 %v4083_v19  ;;  %v1559_v19 = vadd.f32 %v1558_v17, %v6170_v51  ;;  %v4151_v51 = vor.u32 %v5177_v52, %v4150_v13 }
 0x1a2   :  { %v1602_v26 = vpop.f32.mrf.mxu2 }
 0x1a3   :  { %v1651_v8 = vpop.f32.mrf.mxu3  ;;  %v1603_v9 = vadd.f32 %v1602_v26, %v1554_v60  ;;  %v1560_v14 = vpop.f32.mrf.mxu1 }
 0x1a4   :  { %v1702_v42 = vpop.f32.mrf.mxu0 }
 0x1a5   :  { %v1652_v23 = vadd.f32 %v1651_v8, %v1603_v9  ;;  %v4152_v8 = vld [vmem:[#allocation4 + $0x15c] sm:$0xf0]  ;;  %v1561_v9 = vadd.f32 %v1560_v14, %v6174_v16  ;;  %v5187_v14 = vld [vmem:[#allocation4 + $0x1a8] sm:$0xf0] }
 0x1a6   :  { %v4155_v20 = vor.u32 %v5173_v10, %v4152_v8 }
 0x1a7   :  { %v6203_v28 = vadd.f32 %v1700_v48, %v1652_v23  ;;  %v4158_v23 = vld [vmem:[#allocation4 + $0x140] sm:$0xf] }
 0x1aa   :  { %v1604_v61 = vpop.f32.mrf.mxu2 }
 0x1ab   :  { %v1653_v55 = vpop.f32.mrf.mxu3  ;;  %v1605_v58 = vadd.f32 %v1604_v61, %v1556_v5 }
 0x1ac   :  { %v1705_v53 = vpop.f32.mrf.mxu0 }
 0x1ad   :  { %v1654_v63 = vadd.f32 %v1653_v55, %v1605_v58 }
 0x1af   :  { %1802 = vmatmul.bf16.gmra.mxu2 %v4115_v27  ;;  %v6207_v24 = vadd.f32 %v1702_v42, %v1654_v63  ;;  %1900 = vmatmul.bf16.gmra.mxu0 %v4123_v18  ;;  %v5178_v42 = vld [vmem:[#allocation4 + $0x160] sm:$0xf0] }
 0x1b0   :  { %1851 = vmatmul.bf16.gmra.mxu3 %v4119_v22  ;;  %v4159_v61 = vor.u32 %v5178_v42, %v4158_v23  ;;  %v5204_v23 = vld [vmem:[#allocation4 + $0x230] sm:$0xf0] }
 0x1b1   :  { %2172 = vst [vmem:[#allocation4 + $0x234] sm:$0xf] %v5556_v3  ;;  %v4222_v3 = vld [vmem:[#allocation4 + $0x1c8] sm:$0xf] }
 0x1b2   :  { %v1607_v37 = vpop.f32.mrf.mxu2 }
 0x1b3   :  { %v1656_v0 = vpop.f32.mrf.mxu3  ;;  %v1608_v12 = vadd.f32 %v1607_v37, %v1559_v19  ;;  %v4186_v19 = vld [vmem:[#allocation4 + $0x180] sm:$0xf]  ;;  %v5186_v37 = vld [vmem:[#allocation4 + $0x1a0] sm:$0xf0] }
 0x1b4   :  { %v1707_v60 = vpop.f32.mrf.mxu0  ;;  %v4187_v10 = vor.u32 %v5186_v37, %v4186_v19 }
 0x1b5   :  { %v1657_v48 = vadd.f32 %v1656_v0, %v1608_v12  ;;  %v5182_v0 = vld [vmem:[#allocation4 + $0x184] sm:$0xf]  ;;  %v4188_v12 = vld [vmem:[#allocation4 + $0x1a4] sm:$0xf0] }
 0x1b6   :  { %v4191_v8 = vor.u32 %v5182_v0, %v4188_v12 }
 0x1b7   :  { %v6210_v26 = vadd.f32 %v1705_v53, %v1657_v48  ;;  %v4194_v48 = vld [vmem:[#allocation4 + $0x188] sm:$0xf] }
 0x1ba   :  { %v1609_v41 = vpop.f32.mrf.mxu2 }
 0x1bb   :  { %v1658_v54 = vpop.f32.mrf.mxu3  ;;  %v1610_v5 = vadd.f32 %v1609_v41, %v1561_v9  ;;  %v4195_v9 = vor.u32 %v5187_v14, %v4194_v48  ;;  %v4260_v41 = vld [vmem:[#allocation4 + $0x234] sm:$0xf0] }
 0x1bc   :  { %v1710_v58 = vpop.f32.mrf.mxu0  ;;  %2320 = vst [vmem:[#allocation4 + $0x238] sm:$0xf] %v6137_v36  ;;  %v4224_v36 = vld [vmem:[#allocation4 + $0x1ec] sm:$0xf0] }
 0x1bd   :  { %v1659_v55 = vadd.f32 %v1658_v54, %v1610_v5  ;;  %v5205_v54 = vld [vmem:[#allocation4 + $0x238] sm:$0xf0] }
 0x1be   :  { %2448 = vst [vmem:[#allocation4 + $0x23c] sm:$0xf] %v6194_v44 }
 0x1bf   :  { %1807 = vmatmul.bf16.gmra.mxu2 %v4151_v51  ;;  %v6213_v27 = vadd.f32 %v1707_v60, %v1659_v55  ;;  %1905 = vmatmul.bf16.gmra.mxu0 %v4159_v61 }
 0x1c0   :  { %1856 = vmatmul.bf16.gmra.mxu3 %v4155_v20 }
 0x1c2   :  { %v1612_v22 = vpop.f32.mrf.mxu2 }
 0x1c3   :  { %v1661_v17 = vpop.f32.mrf.mxu3  ;;  %v1613_v18 = vadd.f32 %v1612_v22, %v6148_v34  ;;  %v5195_v22 = vld [vmem:[#allocation4 + $0x1e8] sm:$0xf0] }
 0x1c4   :  { %v1712_v63 = vpop.f32.mrf.mxu0  ;;  %v4223_v44 = vor.u32 %v5195_v22, %v4222_v3 }
 0x1c5   :  { %v1662_v16 = vadd.f32 %v1661_v17, %v1613_v18  ;;  %v5191_v17 = vld [vmem:[#allocation4 + $0x1cc] sm:$0xf]  ;;  %v4230_v18 = vld [vmem:[#allocation4 + $0x1d0] sm:$0xf] }
 0x1c6   :  { %v4227_v0 = vor.u32 %v5191_v17, %v4224_v36 }
 0x1c7   :  { %v6216_v53 = vadd.f32 %v1710_v58, %v1662_v16  ;;  %v5196_v16 = vld [vmem:[#allocation4 + $0x1f0] sm:$0xf0] }
 0x1c8   :  { %v4231_v12 = vor.u32 %v5196_v16, %v4230_v18 }
 0x1ca   :  { %v1614_v13 = vpop.f32.mrf.mxu2 }
 0x1cb   :  { %v1663_v52 = vpop.f32.mrf.mxu3  ;;  %v1615_v60 = vadd.f32 %v1614_v13, %v6152_v32 }
 0x1cc   :  { %v1715_v34 = vpop.f32.mrf.mxu0 }
 0x1cd   :  { %v1664_v42 = vadd.f32 %v1663_v52, %v1615_v60 }
 0x1cf   :  { %1812 = vmatmul.bf16.gmra.mxu2 %v4187_v10  ;;  %v6221_v5 = vadd.f32 %v1712_v63, %v1664_v42  ;;  %1910 = vmatmul.bf16.gmra.mxu0 %v4195_v9 }
 0x1d0   :  { %1861 = vmatmul.bf16.gmra.mxu3 %v4191_v8 }
 0x1d2   :  { %v1617_v32 = vpop.f32.mrf.mxu2 }
 0x1d3   :  { %v1666_v51 = vpop.f32.mrf.mxu3  ;;  %v1618_v20 = vadd.f32 %v1617_v32, %v6156_v45  ;;  %v1739_v45 = vpop.f32.mrf.mxu1 }
 0x1d4   :  { %v1717_v55 = vpop.f32.mrf.mxu0 }
 0x1d5   :  { %v1667_v61 = vadd.f32 %v1666_v51, %v1618_v20  ;;  %v4266_v51 = vld [vmem:[#allocation4 + $0x218] sm:$0xf] }
 0x1d6   :  { %v4267_v17 = vor.u32 %v5205_v54, %v4266_v51 }
 0x1d7   :  { %v6225_v58 = vadd.f32 %v1715_v34, %v1667_v61  ;;  %v5200_v34 = vld [vmem:[#allocation4 + $0x214] sm:$0xf] }
 0x1da   :  { %v1619_v19 = vpop.f32.mrf.mxu2 }
 0x1db   :  { %v1668_v63 = vpop.f32.mrf.mxu3  ;;  %v1620_v37 = vadd.f32 %v1619_v19, %v6160_v50  ;;  %v4258_v50 = vld [vmem:[#allocation4 + $0x210] sm:$0xf]  ;;  %v1741_v32 = vpop.f32.mrf.mxu1 }
 0x1dc   :  { %v1720_v14 = vpop.f32.mrf.mxu0  ;;  %v4259_v22 = vor.u32 %v5204_v23, %v4258_v50 }
 0x1dd   :  { %v1669_v48 = vadd.f32 %v1668_v63, %v1620_v37 }
 0x1df   :  { %1817 = vmatmul.bf16.gmra.mxu2 %v4223_v44  ;;  %v6228_v13 = vadd.f32 %v1717_v55, %v1669_v48  ;;  %1915 = vmatmul.bf16.gmra.mxu0 %v4231_v12  ;;  %v4263_v55 = vor.u32 %v5200_v34, %v4260_v41 }
 0x1e0   :  { %1866 = vmatmul.bf16.gmra.mxu3 %v4227_v0 }
 0x1e2   :  { %v1622_v52 = vpop.f32.mrf.mxu2 }
 0x1e3   :  { %v1671_v60 = vpop.f32.mrf.mxu3  ;;  %v1623_v10 = vadd.f32 %v1622_v52, %v6164_v46  ;;  %v1744_v63 = vpop.f32.mrf.mxu1 }
 0x1e4   :  { %v1722_v9 = vpop.f32.mrf.mxu0 }
 0x1e5   :  { %v1672_v8 = vadd.f32 %v1671_v60, %v1623_v10  ;;  %v1740_v60 = vadd.f32 %v1739_v45, %v6179_v57 }
 0x1e7   :  { %v6231_v42 = vadd.f32 %v1720_v14, %v1672_v8 }
 0x1ea   :  { %v1624_v20 = vpop.f32.mrf.mxu2 }
 0x1eb   :  { %v1673_v61 = vpop.f32.mrf.mxu3  ;;  %v1625_v3 = vadd.f32 %v1624_v20, %v6168_v39  ;;  %v1746_v54 = vpop.f32.mrf.mxu1  ;;  %v1742_v20 = vadd.f32 %v1741_v32, %v6186_v40 }
 0x1ec   :  { %v1725_v18 = vpop.f32.mrf.mxu0 }
 0x1ed   :  { %v1674_v36 = vadd.f32 %v1673_v61, %v1625_v3 }
 0x1ef   :  { %1822 = vmatmul.bf16.gmra.mxu2 %v4259_v22  ;;  %v6234_v46 = vadd.f32 %v1722_v9, %v1674_v36  ;;  %1920 = vmatmul.bf16.gmra.mxu0 %v4267_v17 }
 0x1f0   :  { %1871 = vmatmul.bf16.gmra.mxu3 %v4263_v55 }
 0x1f2   :  { %v1627_v16 = vpop.f32.mrf.mxu2 }
 0x1f3   :  { %v1676_v19 = vpop.f32.mrf.mxu3  ;;  %v1628_v37 = vadd.f32 %v1627_v16, %v6172_v1  ;;  %v6243_v34 = vpop.f32.mrf.mxu1 }
 0x1f4   :  { %v1727_v0 = vpop.f32.mrf.mxu0 }
 0x1f5   :  { %v1677_v44 = vadd.f32 %v1676_v19, %v1628_v37  ;;  %v1745_v37 = vadd.f32 %v1744_v63, %v6197_v31 }
 0x1f7   :  { %v6237_v12 = vadd.f32 %v1725_v18, %v1677_v44 }
 0x1fa   :  { %v1629_v39 = vpop.f32.mrf.mxu2 }
 0x1fb   :  { %v1678_v23 = vpop.f32.mrf.mxu3  ;;  %v1630_v41 = vadd.f32 %v1629_v39, %v6176_v35  ;;  %v6252_v44 = vpop.f32.mrf.mxu1 }
 0x1fc   :  { %v1886_v14 = vpop.f32.mrf.mxu0 }
 0x1fd   :  { %v1679_v48 = vadd.f32 %v1678_v23, %v1630_v41 }
 0x1ff   :  { %v6240_v52 = vadd.f32 %v1727_v0, %v1679_v48 }
 0x202   :  { %v1788_v10 = vpop.f32.mrf.mxu2 }
 0x203   :  { %v1837_v8 = vpop.f32.mrf.mxu3  ;;  %v1789_v9 = vadd.f32 %v1788_v10, %v1740_v60 }
 0x204   :  { %v1888_v1 = vpop.f32.mrf.mxu0 }
 0x205   :  { %v1838_v50 = vadd.f32 %v1837_v8, %v1789_v9 }
 0x207   :  { %v1887_v51 = vadd.f32 %v1886_v14, %v1838_v50 }
 0x209   :  { %vm1926_vm1 = vcmp.gt.f32.partialorder %v1887_v51, 0.0  ;;  %v1942_v61 = vmul.f32 0.1, %v1887_v51 }
 0x20a   :  { %v1790_v35 = vpop.f32.mrf.mxu2 }
 0x20b   :  { %v1839_v3 = vpop.f32.mrf.mxu3  ;;  %v1958_v22 = vsel %vm1926_vm1, %v1887_v51, %v1942_v61  ;;  %v1791_v55 = vadd.f32 %v1790_v35, %v1742_v20 }
 0x20c   :  { %v1983_v17 = vrot.slane %v1958_v22, 7  ;;  %v1891_v45 = vpop.f32.mrf.mxu0 }
 0x20d   :  { %v1840_v57 = vadd.f32 %v1839_v3, %v1791_v55  ;;  %v1747_v55 = vadd.f32 %v1746_v54, %v6200_v7 }
 0x20e   :  { %v2030_v36 = vsel %vm1999_vm2, %v1983_v17, 0.0  ;;  %v2031_v18 = vsel %vm1999_vm2, 0.0, %v1983_v17 }
 0x20f   :  { %v2106_v16 = vpack.c.bf16 %v2031_v18, %v2031_v18  ;;  %v2175_v19 = vrot.slane %v2031_v18, 1  ;;  %v2176_v40 = vrot.slane %v2030_v36, 1  ;;  %v1889_v32 = vadd.f32 %v1888_v1, %v1840_v57 }
 0x211   :  { %2122 = vst [vmem:[#allocation4 + $0x24] sm:$0xf] %v2106_v16  ;;  %v2249_v0 = vsel %vm204_vm0, %v2175_v19, %v2176_v40  ;;  %v2250_v39 = vsel %vm204_vm0, %v6133_v29, %v2175_v19  ;;  %vm1927_vm3 = vcmp.gt.f32.partialorder %v1889_v32, 0.0  ;;  %v1943_v23 = vmul.f32 0.1, %v1889_v32 }
 0x212   :  { %2139 = vst [vmem:[#allocation4 + $0xc] sm:$0xf] %v2106_v16  ;;  %v2254_v41 = vpack.c.bf16 %v2249_v0, %v2249_v0  ;;  %v2322_v48 = vrot.slane %v2250_v39, 1  ;;  %v1793_v14 = vpop.f32.mrf.mxu2  ;;  %v2323_v18 = vrot.slane %v2249_v0, 1  ;;  %v6271_v39 = vpop.f32.mrf.mxu1 }
 0x213   :  { %v1842_v60 = vpop.f32.mrf.mxu3  ;;  %v1959_v10 = vsel %vm1927_vm3, %v1889_v32, %v1943_v23  ;;  %v1794_v8 = vadd.f32 %v1793_v14, %v1745_v37 }
 0x214   :  { %2270 = vst [vmem:[#allocation4 + $0x28] sm:$0xf] %v2254_v41  ;;  %v2380_v31 = vsel %vm204_vm0, %v6190_v15, %v2322_v48  ;;  %v1984_v63 = vrot.slane %v1959_v10, 7  ;;  %v1893_v1 = vpop.f32.mrf.mxu0 }
 0x215   :  { %2287 = vst [vmem:[#allocation4 + $0x10] sm:$0xf] %v2254_v41  ;;  %v2381_v9 = vpack.c.bf16 %v2380_v31, %v2380_v31  ;;  %v1843_v50 = vadd.f32 %v1842_v60, %v1794_v8 }
 0x216   :  { %v2028_v51 = vsel %vm1999_vm2, %v1984_v63, 0.0  ;;  %v2029_v20 = vsel %vm1999_vm2, 0.0, %v1984_v63  ;;  %v1750_v63 = vadd.f32 %v6243_v34, %v6203_v28 }
 0x217   :  { %2397 = vst [vmem:[#allocation4 + $0x8] sm:$0xf] %v2381_v9  ;;  %v2107_v61 = vpack.c.bf16 %v2029_v20, %v2029_v20  ;;  %v2177_v35 = vrot.slane %v2029_v20, 1  ;;  %v2178_v3 = vrot.slane %v2028_v51, 1  ;;  %v1892_v22 = vadd.f32 %v1891_v45, %v1843_v50 }
 0x219   :  { %2123 = vst [vmem:[#allocation4 + $0x48] sm:$0xf] %v2107_v61  ;;  %v2247_v17 = vsel %vm204_vm0, %v2177_v35, %v2178_v3  ;;  %v2248_v57 = vsel %vm204_vm0, %v2176_v40, %v2177_v35  ;;  %vm1928_vm4 = vcmp.gt.f32.partialorder %v1892_v22, 0.0  ;;  %v1944_v36 = vmul.f32 0.1, %v1892_v22 }
 0x21a   :  { %2140 = vst [vmem:[#allocation4 + $0x30] sm:$0xf] %v2107_v61  ;;  %v2255_v16 = vpack.c.bf16 %v2247_v17, %v2247_v17  ;;  %v2324_v19 = vrot.slane %v2248_v57, 1  ;;  %v1795_v32 = vpop.f32.mrf.mxu2  ;;  %v2325_v20 = vrot.slane %v2247_v17, 1 }
 0x21b   :  { %v1844_v37 = vpop.f32.mrf.mxu3  ;;  %2157 = vst [vmem:[#allocation4 + $0x18] sm:$0xf] %v2107_v61  ;;  %v1960_v45 = vsel %vm1928_vm4, %v1892_v22, %v1944_v36  ;;  %v1796_v7 = vadd.f32 %v1795_v32, %v1747_v55  ;;  %v6287_v36 = vpop.f32.mrf.mxu1 }
 0x21c   :  { %2271 = vst [vmem:[#allocation4 + $0x4c] sm:$0xf] %v2255_v16  ;;  %v2379_v54 = vsel %vm204_vm0, %v2323_v18, %v2324_v19  ;;  %v1985_v23 = vrot.slane %v1960_v45, 7  ;;  %v1896_v48 = vpop.f32.mrf.mxu0 }
 0x21d   :  { %2288 = vst [vmem:[#allocation4 + $0x34] sm:$0xf] %v2255_v16  ;;  %v2382_v40 = vpack.c.bf16 %v2379_v54, %v2379_v54  ;;  %v1845_v41 = vadd.f32 %v1844_v37, %v1796_v7  ;;  %v1752_v54 = vadd.f32 %v6252_v44, %v6207_v24 }
 0x21e   :  { %2305 = vst [vmem:[#allocation4 + $0x1c] sm:$0xf] %v2255_v16  ;;  %v2026_v0 = vsel %vm1999_vm2, %v1985_v23, 0.0  ;;  %v2027_v14 = vsel %vm1999_vm2, 0.0, %v1985_v23 }
 0x21f   :  { %2398 = vst [vmem:[#allocation4 + $0x2c] sm:$0xf] %v2382_v40  ;;  %v2108_v60 = vpack.c.bf16 %v2027_v14, %v2027_v14  ;;  %v2179_v10 = vrot.slane %v2027_v14, 1  ;;  %v2180_v8 = vrot.slane %v2026_v0, 1  ;;  %v1894_v31 = vadd.f32 %v1893_v1, %v1845_v41 }
 0x220   :  { %2415 = vst [vmem:[#allocation4 + $0x14] sm:$0xf] %v2382_v40 }
 0x221   :  { %2124 = vst [vmem:[#allocation4 + $0x6c] sm:$0xf] %v2108_v60  ;;  %v2245_v9 = vsel %vm204_vm0, %v2179_v10, %v2180_v8  ;;  %v2246_v50 = vsel %vm204_vm0, %v2178_v3, %v2179_v10  ;;  %vm1929_vm5 = vcmp.gt.f32.partialorder %v1894_v31, 0.0  ;;  %v1945_v51 = vmul.f32 0.1, %v1894_v31 }
 0x222   :  { %2141 = vst [vmem:[#allocation4 + $0x54] sm:$0xf] %v2108_v60  ;;  %v2256_v61 = vpack.c.bf16 %v2245_v9, %v2245_v9  ;;  %v2326_v35 = vrot.slane %v2246_v50, 1  ;;  %v1798_v22 = vpop.f32.mrf.mxu2  ;;  %v2327_v0 = vrot.slane %v2245_v9, 1 }
 0x223   :  { %v1847_v55 = vpop.f32.mrf.mxu3  ;;  %2158 = vst [vmem:[#allocation4 + $0x3c] sm:$0xf] %v2108_v60  ;;  %v1961_v1 = vsel %vm1929_vm5, %v1894_v31, %v1945_v51  ;;  %v1799_v57 = vadd.f32 %v1798_v22, %v1750_v63 }
 0x224   :  { %2272 = vst [vmem:[#allocation4 + $0x70] sm:$0xf] %v2256_v61  ;;  %v2378_v28 = vsel %vm204_vm0, %v2325_v20, %v2326_v35  ;;  %v1986_v34 = vrot.slane %v1961_v1, 7  ;;  %v1898_v16 = vpop.f32.mrf.mxu0 }
 0x225   :  { %2289 = vst [vmem:[#allocation4 + $0x58] sm:$0xf] %v2256_v61  ;;  %v2383_v3 = vpack.c.bf16 %v2378_v28, %v2378_v28  ;;  %v1848_v18 = vadd.f32 %v1847_v55, %v1799_v57  ;;  %v1755_v57 = vadd.f32 %v6271_v39, %v6210_v26 }
 0x226   :  { %2306 = vst [vmem:[#allocation4 + $0x40] sm:$0xf] %v2256_v61  ;;  %v2024_v17 = vsel %vm1999_vm2, %v1986_v34, 0.0  ;;  %v2025_v19 = vsel %vm1999_vm2, 0.0, %v1986_v34  ;;  %v6305_v61 = vpop.f32.mrf.mxu1 }
 0x227   :  { %2399 = vst [vmem:[#allocation4 + $0x50] sm:$0xf] %v2383_v3  ;;  %v2109_v32 = vpack.c.bf16 %v2025_v19, %v2025_v19  ;;  %v2181_v37 = vrot.slane %v2025_v19, 1  ;;  %v2182_v45 = vrot.slane %v2024_v17, 1  ;;  %v1897_v7 = vadd.f32 %v1896_v48, %v1848_v18 }
 0x228   :  { %2416 = vst [vmem:[#allocation4 + $0x38] sm:$0xf] %v2383_v3 }
 0x229   :  { %2433 = vst [vmem:[#allocation4 + $0x20] sm:$0xf] %v2383_v3  ;;  %v2243_v23 = vsel %vm204_vm0, %v2181_v37, %v2182_v45  ;;  %v2244_v40 = vsel %vm204_vm0, %v2180_v8, %v2181_v37  ;;  %vm1930_vm6 = vcmp.gt.f32.partialorder %v1897_v7, 0.0  ;;  %v1946_v41 = vmul.f32 0.1, %v1897_v7 }
 0x22a   :  { %2125 = vst [vmem:[#allocation4 + $0x90] sm:$0xf] %v2109_v32  ;;  %v2257_v14 = vpack.c.bf16 %v2243_v23, %v2243_v23  ;;  %v2328_v60 = vrot.slane %v2244_v40, 1  ;;  %v1800_v10 = vpop.f32.mrf.mxu2  ;;  %v2329_v18 = vrot.slane %v2243_v23, 1 }
 0x22b   :  { %v1849_v31 = vpop.f32.mrf.mxu3  ;;  %2142 = vst [vmem:[#allocation4 + $0x78] sm:$0xf] %v2109_v32  ;;  %v1962_v48 = vsel %vm1930_vm6, %v1897_v7, %v1946_v41  ;;  %v1801_v63 = vadd.f32 %v1800_v10, %v1752_v54  ;;  %v1757_v10 = vadd.f32 %v6287_v36, %v6213_v27 }
 0x22c   :  { %2159 = vst [vmem:[#allocation4 + $0x60] sm:$0xf] %v2109_v32  ;;  %v2377_v24 = vsel %vm204_vm0, %v2327_v0, %v2328_v60  ;;  %v1987_v44 = vrot.slane %v1962_v48, 7  ;;  %v1901_v8 = vpop.f32.mrf.mxu0 }
 0x22d   :  { %2273 = vst [vmem:[#allocation4 + $0x94] sm:$0xf] %v2257_v14  ;;  %v2384_v50 = vpack.c.bf16 %v2377_v24, %v2377_v24  ;;  %v1850_v51 = vadd.f32 %v1849_v31, %v1801_v63 }
 0x22e   :  { %2290 = vst [vmem:[#allocation4 + $0x7c] sm:$0xf] %v2257_v14  ;;  %v2022_v9 = vsel %vm1999_vm2, %v1987_v44, 0.0  ;;  %v2023_v20 = vsel %vm1999_vm2, 0.0, %v1987_v44  ;;  %v1761_v48 = vpop.f32.mrf.mxu1 }
 0x22f   :  { %2307 = vst [vmem:[#allocation4 + $0x64] sm:$0xf] %v2257_v14  ;;  %v2110_v35 = vpack.c.bf16 %v2023_v20, %v2023_v20  ;;  %v2183_v22 = vrot.slane %v2023_v20, 1  ;;  %v2184_v55 = vrot.slane %v2022_v9, 1  ;;  %v1899_v1 = vadd.f32 %v1898_v16, %v1850_v51 }
 0x230   :  { %2400 = vst [vmem:[#allocation4 + $0x74] sm:$0xf] %v2384_v50 }
 0x231   :  { %2417 = vst [vmem:[#allocation4 + $0x5c] sm:$0xf] %v2384_v50  ;;  %v2241_v28 = vsel %vm204_vm0, %v2183_v22, %v2184_v55  ;;  %v2242_v34 = vsel %vm204_vm0, %v2182_v45, %v2183_v22  ;;  %vm1931_vm7 = vcmp.gt.f32.partialorder %v1899_v1, 0.0  ;;  %v1947_v3 = vmul.f32 0.1, %v1899_v1 }
 0x232   :  { %2434 = vst [vmem:[#allocation4 + $0x44] sm:$0xf] %v2384_v50  ;;  %v2258_v17 = vpack.c.bf16 %v2241_v28, %v2241_v28  ;;  %v2330_v19 = vrot.slane %v2242_v34, 1  ;;  %v1803_v32 = vpop.f32.mrf.mxu2  ;;  %v2331_v50 = vrot.slane %v2241_v28, 1 }
 0x233   :  { %v1852_v37 = vpop.f32.mrf.mxu3  ;;  %2126 = vst [vmem:[#allocation4 + $0xb4] sm:$0xf] %v2110_v35  ;;  %v1963_v16 = vsel %vm1931_vm7, %v1899_v1, %v1947_v3  ;;  %v1804_v7 = vadd.f32 %v1803_v32, %v1755_v57 }
 0x234   :  { %2143 = vst [vmem:[#allocation4 + $0x9c] sm:$0xf] %v2110_v35  ;;  %v2376_v26 = vsel %vm204_vm0, %v2329_v18, %v2330_v19  ;;  %v1988_v39 = vrot.slane %v1963_v16, 7  ;;  %v1903_v45 = vpop.f32.mrf.mxu0  ;;  %v1760_v19 = vadd.f32 %v6305_v61, %v6216_v53 }
 0x235   :  { %2160 = vst [vmem:[#allocation4 + $0x84] sm:$0xf] %v2110_v35  ;;  %v2385_v54 = vpack.c.bf16 %v2376_v26, %v2376_v26  ;;  %v1853_v40 = vadd.f32 %v1852_v37, %v1804_v7 }
 0x236   :  { %2274 = vst [vmem:[#allocation4 + $0xb8] sm:$0xf] %v2258_v17  ;;  %v2020_v23 = vsel %vm1999_vm2, %v1988_v39, 0.0  ;;  %v2021_v41 = vsel %vm1999_vm2, 0.0, %v1988_v39 }
 0x237   :  { %2291 = vst [vmem:[#allocation4 + $0xa0] sm:$0xf] %v2258_v17  ;;  %v2185_v0 = vrot.slane %v2021_v41, 1  ;;  %v2186_v14 = vrot.slane %v2020_v23, 1  ;;  %v1902_v60 = vadd.f32 %v1901_v8, %v1853_v40  ;;  %v2111_v31 = vpack.c.bf16 %v2021_v41, %v2021_v41 }
 0x238   :  { %2308 = vst [vmem:[#allocation4 + $0x88] sm:$0xf] %v2258_v17 }
 0x239   :  { %2401 = vst [vmem:[#allocation4 + $0x98] sm:$0xf] %v2385_v54  ;;  %v2239_v63 = vsel %vm204_vm0, %v2185_v0, %v2186_v14  ;;  %v2240_v24 = vsel %vm204_vm0, %v2184_v55, %v2185_v0  ;;  %vm1932_vm8 = vcmp.gt.f32.partialorder %v1902_v60, 0.0  ;;  %v1948_v44 = vmul.f32 0.1, %v1902_v60 }
 0x23a   :  { %2418 = vst [vmem:[#allocation4 + $0x80] sm:$0xf] %v2385_v54  ;;  %v2332_v51 = vrot.slane %v2240_v24, 1  ;;  %v1805_v9 = vpop.f32.mrf.mxu2  ;;  %v2259_v20 = vpack.c.bf16 %v2239_v63, %v2239_v63  ;;  %v2333_v26 = vrot.slane %v2239_v63, 1 }
 0x23b   :  { %v1854_v8 = vpop.f32.mrf.mxu3  ;;  %2435 = vst [vmem:[#allocation4 + $0x68] sm:$0xf] %v2385_v54  ;;  %v1964_v27 = vsel %vm1932_vm8, %v1902_v60, %v1948_v44  ;;  %v1806_v36 = vadd.f32 %v1805_v9, %v1757_v10 }
 0x23c   :  { %2127 = vst [vmem:[#allocation4 + $0xd8] sm:$0xf] %v2111_v31  ;;  %v2375_v35 = vsel %vm204_vm0, %v2331_v50, %v2332_v51  ;;  %v1989_v22 = vrot.slane %v1964_v27, 7  ;;  %v1906_v57 = vpop.f32.mrf.mxu0  ;;  %v1762_v51 = vadd.f32 %v1761_v48, %v6221_v5 }
 0x23d   :  { %2144 = vst [vmem:[#allocation4 + $0xc0] sm:$0xf] %v2111_v31  ;;  %v1855_v1 = vadd.f32 %v1854_v8, %v1806_v36  ;;  %v2386_v55 = vpack.c.bf16 %v2375_v35, %v2375_v35 }
 0x23e   :  { %2161 = vst [vmem:[#allocation4 + $0xa8] sm:$0xf] %v2111_v31  ;;  %v2018_v28 = vsel %vm1999_vm2, %v1989_v22, 0.0  ;;  %v2019_v34 = vsel %vm1999_vm2, 0.0, %v1989_v22 }
 0x23f   :  { %2275 = vst [vmem:[#allocation4 + $0xdc] sm:$0xf] %v2259_v20  ;;  %v2187_v3 = vrot.slane %v2019_v34, 1  ;;  %v2188_v18 = vrot.slane %v2018_v28, 1  ;;  %v1904_v17 = vadd.f32 %v1903_v45, %v1855_v1  ;;  %v2112_v32 = vpack.c.bf16 %v2019_v34, %v2019_v34  ;;  %v1764_v45 = vpop.f32.mrf.mxu1 }
 0x240   :  { %2292 = vst [vmem:[#allocation4 + $0xc4] sm:$0xf] %v2259_v20 }
 0x241   :  { %2309 = vst [vmem:[#allocation4 + $0xac] sm:$0xf] %v2259_v20  ;;  %v2237_v37 = vsel %vm204_vm0, %v2187_v3, %v2188_v18  ;;  %v2238_v16 = vsel %vm204_vm0, %v2186_v14, %v2187_v3  ;;  %vm1933_vm9 = vcmp.gt.f32.partialorder %v1904_v17, 0.0  ;;  %v1949_v7 = vmul.f32 0.1, %v1904_v17 }
 0x242   :  { %2402 = vst [vmem:[#allocation4 + $0xbc] sm:$0xf] %v2386_v55  ;;  %v2334_v39 = vrot.slane %v2238_v16, 1  ;;  %v1808_v54 = vpop.f32.mrf.mxu2  ;;  %v2260_v61 = vpack.c.bf16 %v2237_v37, %v2237_v37  ;;  %v2335_v9 = vrot.slane %v2237_v37, 1 }
 0x243   :  { %v1857_v40 = vpop.f32.mrf.mxu3  ;;  %2419 = vst [vmem:[#allocation4 + $0xa4] sm:$0xf] %v2386_v55  ;;  %v1965_v23 = vsel %vm1933_vm9, %v1904_v17, %v1949_v7  ;;  %v1809_v53 = vadd.f32 %v1808_v54, %v1760_v19 }
 0x244   :  { %2436 = vst [vmem:[#allocation4 + $0x8c] sm:$0xf] %v2386_v55  ;;  %v2374_v41 = vsel %vm204_vm0, %v2333_v26, %v2334_v39  ;;  %v1990_v0 = vrot.slane %v1965_v23, 7  ;;  %v1908_v14 = vpop.f32.mrf.mxu0 }
 0x245   :  { %2128 = vst [vmem:[#allocation4 + $0xfc] sm:$0xf] %v2112_v32  ;;  %v1858_v60 = vadd.f32 %v1857_v40, %v1809_v53  ;;  %v2387_v63 = vpack.c.bf16 %v2374_v41, %v2374_v41  ;;  %v1765_v40 = vadd.f32 %v1764_v45, %v6225_v58 }
 0x246   :  { %2145 = vst [vmem:[#allocation4 + $0xe4] sm:$0xf] %v2112_v32  ;;  %v2016_v10 = vsel %vm1999_vm2, %v1990_v0, 0.0  ;;  %v2017_v31 = vsel %vm1999_vm2, 0.0, %v1990_v0 }
 0x247   :  { %2162 = vst [vmem:[#allocation4 + $0xcc] sm:$0xf] %v2112_v32  ;;  %v2189_v24 = vrot.slane %v2017_v31, 1  ;;  %v2190_v44 = vrot.slane %v2016_v10, 1  ;;  %v1907_v50 = vadd.f32 %v1906_v57, %v1858_v60  ;;  %v2137_v8 = vpack.c.bf16 %v2017_v31, %v2017_v31  ;;  %v1766_v3 = vpop.f32.mrf.mxu1 }
 0x248   :  { %2276 = vst [vmem:[#allocation4 + $0x100] sm:$0xf] %v2260_v61 }
 0x249   :  { %2293 = vst [vmem:[#allocation4 + $0xe8] sm:$0xf] %v2260_v61  ;;  %v2234_v20 = vsel %vm204_vm0, %v2190_v44, %v6133_v29  ;;  %v2235_v27 = vsel %vm204_vm0, %v2189_v24, %v2190_v44  ;;  %v2236_v36 = vsel %vm204_vm0, %v2188_v18, %v2189_v24  ;;  %vm1934_vm10 = vcmp.gt.f32.partialorder %v1907_v50, 0.0 }
 0x24a   :  { %2310 = vst [vmem:[#allocation4 + $0xd0] sm:$0xf] %v2260_v61  ;;  %v2336_v35 = vrot.slane %v2236_v36, 1  ;;  %v2337_v22 = vrot.slane %v2235_v27, 1  ;;  %v2338_v1 = vrot.slane %v2234_v20, 1  ;;  %v1810_v5 = vpop.f32.mrf.mxu2  ;;  %v2285_v28 = vpack.c.bf16 %v2235_v27, %v2235_v27 }
 0x24b   :  { %v1859_v48 = vpop.f32.mrf.mxu3  ;;  %2403 = vst [vmem:[#allocation4 + $0xe0] sm:$0xf] %v2387_v63  ;;  %v1950_v57 = vmul.f32 0.1, %v1907_v50  ;;  %v1811_v55 = vadd.f32 %v1810_v5, %v1762_v51 }
 0x24c   :  { %2420 = vst [vmem:[#allocation4 + $0xc8] sm:$0xf] %v2387_v63  ;;  %v2373_v34 = vsel %vm204_vm0, %v2335_v9, %v2336_v35  ;;  %v2372_v18 = vsel %vm204_vm0, %v2337_v22, %v2338_v1  ;;  %v1911_v32 = vpop.f32.mrf.mxu0 }
 0x24d   :  { %2437 = vst [vmem:[#allocation4 + $0xb0] sm:$0xf] %v2387_v63  ;;  %v1966_v17 = vsel %vm1934_vm10, %v1907_v50, %v1950_v57  ;;  %v1860_v19 = vadd.f32 %v1859_v48, %v1811_v55  ;;  %v2388_v37 = vpack.c.bf16 %v2373_v34, %v2373_v34  ;;  %v2413_v26 = vpack.c.bf16 %v2372_v18, %v2372_v18 }
 0x24e   :  { %2146 = vst [vmem:[#allocation4 + $0x108] sm:$0xf] %v2137_v8  ;;  %v1991_v16 = vrot.slane %v1966_v17, 7  ;;  %v1767_v48 = vadd.f32 %v1766_v3, %v6228_v13 }
 0x24f   :  { %2163 = vst [vmem:[#allocation4 + $0xf0] sm:$0xf] %v2137_v8  ;;  %v1909_v7 = vadd.f32 %v1908_v14, %v1860_v19  ;;  %v1769_v9 = vpop.f32.mrf.mxu1 }
 0x250   :  { %2294 = vst [vmem:[#allocation4 + $0x10c] sm:$0xf] %v2285_v28  ;;  %v2014_v39 = vsel %vm1999_vm2, %v1991_v16, 0.0  ;;  %v2015_v54 = vsel %vm1999_vm2, 0.0, %v1991_v16 }
 0x251   :  { %2311 = vst [vmem:[#allocation4 + $0xf4] sm:$0xf] %v2285_v28  ;;  %v2195_v23 = vrot.slane %v2015_v54, 1  ;;  %v2196_v53 = vrot.slane %v2014_v39, 1  ;;  %vm1935_vm11 = vcmp.gt.f32.partialorder %v1909_v7, 0.0  ;;  %v2114_v60 = vpack.c.bf16 %v2015_v54, %v2015_v54 }
 0x252   :  { %2404 = vst [vmem:[#allocation4 + $0x104] sm:$0xf] %v2388_v37  ;;  %v1951_v61 = vmul.f32 0.1, %v1909_v7  ;;  %v1813_v41 = vpop.f32.mrf.mxu2 }
 0x253   :  { %v1862_v0 = vpop.f32.mrf.mxu3  ;;  %2421 = vst [vmem:[#allocation4 + $0xec] sm:$0xf] %v2388_v37  ;;  %v2229_v14 = vsel %vm204_vm0, %v2195_v23, %v2196_v53  ;;  %v2230_v10 = vsel %vm204_vm0, %v6133_v29, %v2195_v23  ;;  %v1814_v31 = vadd.f32 %v1813_v41, %v1765_v40 }
 0x254   :  { %2422 = vst [vmem:[#allocation4 + $0x110] sm:$0xf] %v2413_v26  ;;  %v2342_v58 = vrot.slane %v2230_v10, 1  ;;  %v1967_v45 = vsel %vm1935_vm11, %v1909_v7, %v1951_v61  ;;  %v2262_v63 = vpack.c.bf16 %v2229_v14, %v2229_v14  ;;  %v1913_v50 = vpop.f32.mrf.mxu0  ;;  %v2343_v34 = vrot.slane %v2229_v14, 1 }
 0x255   :  { %2438 = vst [vmem:[#allocation4 + $0xd4] sm:$0xf] %v2388_v37  ;;  %v1992_v24 = vrot.slane %v1967_v45, 7  ;;  %v1863_v44 = vadd.f32 %v1862_v0, %v1814_v31  ;;  %v1770_v61 = vadd.f32 %v1769_v9, %v6231_v42 }
 0x256   :  { %2439 = vst [vmem:[#allocation4 + $0xf8] sm:$0xf] %v2413_v26  ;;  %v2370_v51 = vsel %vm204_vm0, %v6190_v15, %v2342_v58 }
 0x257   :  { %2130 = vst [vmem:[#allocation4 + $0x144] sm:$0xf] %v2114_v60  ;;  %v2389_v8 = vpack.c.bf16 %v2370_v51, %v2370_v51  ;;  %v2012_v20 = vsel %vm1999_vm2, %v1992_v24, 0.0  ;;  %v2013_v27 = vsel %vm1999_vm2, 0.0, %v1992_v24  ;;  %v1912_v36 = vadd.f32 %v1911_v32, %v1863_v44  ;;  %v1771_v41 = vpop.f32.mrf.mxu1 }
 0x258   :  { %2147 = vst [vmem:[#allocation4 + $0x12c] sm:$0xf] %v2114_v60  ;;  %v2115_v35 = vpack.c.bf16 %v2013_v27, %v2013_v27  ;;  %v2197_v22 = vrot.slane %v2013_v27, 1  ;;  %v2198_v1 = vrot.slane %v2012_v20, 1  ;;  %v1772_v20 = vadd.f32 %v1771_v41, %v6234_v46 }
 0x259   :  { %2278 = vst [vmem:[#allocation4 + $0x148] sm:$0xf] %v2262_v63  ;;  %vm1936_vm12 = vcmp.gt.f32.partialorder %v1912_v36, 0.0  ;;  %v1952_v5 = vmul.f32 0.1, %v1912_v36 }
 0x25a   :  { %2295 = vst [vmem:[#allocation4 + $0x130] sm:$0xf] %v2262_v63  ;;  %v2227_v15 = vsel %vm204_vm0, %v2197_v22, %v2198_v1  ;;  %v2228_v57 = vsel %vm204_vm0, %v2196_v53, %v2197_v22  ;;  %v1815_v55 = vpop.f32.mrf.mxu2 }
 0x25b   :  { %v1864_v28 = vpop.f32.mrf.mxu3  ;;  %2405 = vst [vmem:[#allocation4 + $0x128] sm:$0xf] %v2389_v8  ;;  %v2263_v18 = vpack.c.bf16 %v2227_v15, %v2227_v15  ;;  %v2344_v17 = vrot.slane %v2228_v57, 1  ;;  %v1968_v19 = vsel %vm1936_vm12, %v1912_v36, %v1952_v5  ;;  %v1816_v37 = vadd.f32 %v1815_v55, %v1767_v48 }
 0x25c   :  { %2131 = vst [vmem:[#allocation4 + $0x168] sm:$0xf] %v2115_v35  ;;  %v1993_v32 = vrot.slane %v1968_v19, 7  ;;  %v1916_v40 = vpop.f32.mrf.mxu0  ;;  %v2345_v14 = vrot.slane %v2227_v15, 1 }
 0x25d   :  { %2148 = vst [vmem:[#allocation4 + $0x150] sm:$0xf] %v2115_v35  ;;  %v2369_v13 = vsel %vm204_vm0, %v2343_v34, %v2344_v17  ;;  %v1865_v26 = vadd.f32 %v1864_v28, %v1816_v37 }
 0x25e   :  { %2165 = vst [vmem:[#allocation4 + $0x138] sm:$0xf] %v2115_v35  ;;  %v2390_v3 = vpack.c.bf16 %v2369_v13, %v2369_v13  ;;  %v2010_v16 = vsel %vm1999_vm2, %v1993_v32, 0.0  ;;  %v2011_v7 = vsel %vm1999_vm2, 0.0, %v1993_v32 }
 0x25f   :  { %2279 = vst [vmem:[#allocation4 + $0x16c] sm:$0xf] %v2263_v18  ;;  %v2199_v39 = vrot.slane %v2011_v7, 1  ;;  %v2200_v54 = vrot.slane %v2010_v16, 1  ;;  %v2116_v23 = vpack.c.bf16 %v2011_v7, %v2011_v7  ;;  %v1914_v53 = vadd.f32 %v1913_v50, %v1865_v26  ;;  %v1774_v34 = vpop.f32.mrf.mxu1 }
 0x260   :  { %2296 = vst [vmem:[#allocation4 + $0x154] sm:$0xf] %v2263_v18 }
 0x261   :  { %2313 = vst [vmem:[#allocation4 + $0x13c] sm:$0xf] %v2263_v18  ;;  %v2225_v0 = vsel %vm204_vm0, %v2199_v39, %v2200_v54  ;;  %v2226_v60 = vsel %vm204_vm0, %v2198_v1, %v2199_v39  ;;  %vm1937_vm13 = vcmp.gt.f32.partialorder %v1914_v53, 0.0  ;;  %v1953_v63 = vmul.f32 0.1, %v1914_v53 }
 0x262   :  { %2406 = vst [vmem:[#allocation4 + $0x14c] sm:$0xf] %v2390_v3  ;;  %v2346_v10 = vrot.slane %v2226_v60, 1  ;;  %v1818_v31 = vpop.f32.mrf.mxu2  ;;  %v2264_v45 = vpack.c.bf16 %v2225_v0, %v2225_v0  ;;  %v2347_v18 = vrot.slane %v2225_v0, 1 }
 0x263   :  { %v1867_v58 = vpop.f32.mrf.mxu3  ;;  %2423 = vst [vmem:[#allocation4 + $0x134] sm:$0xf] %v2390_v3  ;;  %v1819_v24 = vadd.f32 %v1818_v31, %v1770_v61  ;;  %v1969_v44 = vsel %vm1937_vm13, %v1914_v53, %v1953_v63  ;;  %v1775_v53 = vadd.f32 %v1774_v34, %v6237_v12 }
 0x264   :  { %2132 = vst [vmem:[#allocation4 + $0x18c] sm:$0xf] %v2116_v23  ;;  %v2368_v42 = vsel %vm204_vm0, %v2345_v14, %v2346_v10  ;;  %v1994_v9 = vrot.slane %v1969_v44, 7  ;;  %v1918_v5 = vpop.f32.mrf.mxu0 }
 0x265   :  { %2149 = vst [vmem:[#allocation4 + $0x174] sm:$0xf] %v2116_v23  ;;  %v1868_v50 = vadd.f32 %v1867_v58, %v1819_v24  ;;  %v2391_v51 = vpack.c.bf16 %v2368_v42, %v2368_v42 }
 0x266   :  { %2166 = vst [vmem:[#allocation4 + $0x15c] sm:$0xf] %v2116_v23  ;;  %v2008_v27 = vsel %vm1999_vm2, %v1994_v9, 0.0  ;;  %v2009_v36 = vsel %vm1999_vm2, 0.0, %v1994_v9 }
 0x267   :  { %2280 = vst [vmem:[#allocation4 + $0x190] sm:$0xf] %v2264_v45  ;;  %v1917_v8 = vadd.f32 %v1916_v40, %v1868_v50  ;;  %v2117_v35 = vpack.c.bf16 %v2009_v36, %v2009_v36  ;;  %v2201_v22 = vrot.slane %v2009_v36, 1  ;;  %v2202_v1 = vrot.slane %v2008_v27, 1  ;;  %v1776_v44 = vpop.f32.mrf.mxu1 }
 0x268   :  { %2297 = vst [vmem:[#allocation4 + $0x178] sm:$0xf] %v2264_v45 }
 0x269   :  { %2314 = vst [vmem:[#allocation4 + $0x160] sm:$0xf] %v2264_v45  ;;  %vm1938_vm14 = vcmp.gt.f32.partialorder %v1917_v8, 0.0  ;;  %v1954_v48 = vmul.f32 0.1, %v1917_v8  ;;  %v2223_v46 = vsel %vm204_vm0, %v2201_v22, %v2202_v1  ;;  %v2224_v55 = vsel %vm204_vm0, %v2200_v54, %v2201_v22 }
 0x26a   :  { %2407 = vst [vmem:[#allocation4 + $0x170] sm:$0xf] %v2391_v51  ;;  %v1820_v15 = vpop.f32.mrf.mxu2  ;;  %v2265_v17 = vpack.c.bf16 %v2223_v46, %v2223_v46  ;;  %v2348_v19 = vrot.slane %v2224_v55, 1  ;;  %v2349_v10 = vrot.slane %v2223_v46, 1 }
 0x26b   :  { %v1869_v57 = vpop.f32.mrf.mxu3  ;;  %2424 = vst [vmem:[#allocation4 + $0x158] sm:$0xf] %v2391_v51  ;;  %v1821_v28 = vadd.f32 %v1820_v15, %v1772_v20  ;;  %v1970_v32 = vsel %vm1938_vm14, %v1917_v8, %v1954_v48 }
 0x26c   :  { %2441 = vst [vmem:[#allocation4 + $0x140] sm:$0xf] %v2391_v51  ;;  %v1995_v37 = vrot.slane %v1970_v32, 7  ;;  %v2367_v3 = vsel %vm204_vm0, %v2347_v18, %v2348_v19  ;;  %v1921_v63 = vpop.f32.mrf.mxu0 }
 0x26d   :  { %2133 = vst [vmem:[#allocation4 + $0x1b0] sm:$0xf] %v2117_v35  ;;  %v1870_v13 = vadd.f32 %v1869_v57, %v1821_v28  ;;  %v2392_v16 = vpack.c.bf16 %v2367_v3, %v2367_v3 }
 0x26e   :  { %2150 = vst [vmem:[#allocation4 + $0x198] sm:$0xf] %v2117_v35  ;;  %v2006_v7 = vsel %vm1999_vm2, %v1995_v37, 0.0  ;;  %v2007_v26 = vsel %vm1999_vm2, 0.0, %v1995_v37 }
 0x26f   :  { %2167 = vst [vmem:[#allocation4 + $0x180] sm:$0xf] %v2117_v35  ;;  %v1919_v39 = vadd.f32 %v1918_v5, %v1870_v13  ;;  %v2203_v54 = vrot.slane %v2007_v26, 1  ;;  %v2204_v40 = vrot.slane %v2006_v7, 1  ;;  %v2118_v61 = vpack.c.bf16 %v2007_v26, %v2007_v26 }
 0x270   :  { %2281 = vst [vmem:[#allocation4 + $0x1b4] sm:$0xf] %v2265_v17  ;;  %v1777_v35 = vadd.f32 %v1776_v44, %v6240_v52 }
 0x271   :  { %2298 = vst [vmem:[#allocation4 + $0x19c] sm:$0xf] %v2265_v17  ;;  %vm1939_vm15 = vcmp.gt.f32.partialorder %v1919_v39, 0.0  ;;  %v1955_v23 = vmul.f32 0.1, %v1919_v39  ;;  %v2221_v41 = vsel %vm204_vm0, %v2203_v54, %v2204_v40  ;;  %v2222_v0 = vsel %vm204_vm0, %v2202_v1, %v2203_v54 }
 0x272   :  { %2315 = vst [vmem:[#allocation4 + $0x184] sm:$0xf] %v2265_v17  ;;  %v1823_v60 = vpop.f32.mrf.mxu2  ;;  %v2350_v31 = vrot.slane %v2222_v0, 1  ;;  %v2266_v12 = vpack.c.bf16 %v2221_v41, %v2221_v41  ;;  %v2351_v1 = vrot.slane %v2221_v41, 1 }
 0x273   :  { %v1872_v14 = vpop.f32.mrf.mxu3  ;;  %2408 = vst [vmem:[#allocation4 + $0x194] sm:$0xf] %v2392_v16  ;;  %v1971_v58 = vsel %vm1939_vm15, %v1919_v39, %v1955_v23  ;;  %v1824_v24 = vadd.f32 %v1823_v60, %v1775_v53 }
 0x274   :  { %2425 = vst [vmem:[#allocation4 + $0x17c] sm:$0xf] %v2392_v16  ;;  %v1996_v45 = vrot.slane %v1971_v58, 7  ;;  %v2366_v42 = vsel %vm204_vm0, %v2349_v10, %v2350_v31  ;;  %v1923_v32 = vpop.f32.mrf.mxu0 }
 0x275   :  { %2442 = vst [vmem:[#allocation4 + $0x164] sm:$0xf] %v2392_v16  ;;  %v1873_v9 = vadd.f32 %v1872_v14, %v1824_v24  ;;  %v2393_v27 = vpack.c.bf16 %v2366_v42, %v2366_v42 }
 0x276   :  { %2134 = vst [vmem:[#allocation4 + $0x1d4] sm:$0xf] %v2118_v61  ;;  %v2004_v50 = vsel %vm1999_vm2, %v1996_v45, 0.0  ;;  %v2005_v51 = vsel %vm1999_vm2, 0.0, %v1996_v45 }
 0x277   :  { %2151 = vst [vmem:[#allocation4 + $0x1bc] sm:$0xf] %v2118_v61  ;;  %v2205_v8 = vrot.slane %v2005_v51, 1  ;;  %v2206_v20 = vrot.slane %v2004_v50, 1  ;;  %v1922_v36 = vadd.f32 %v1921_v63, %v1873_v9  ;;  %v2119_v15 = vpack.c.bf16 %v2005_v51, %v2005_v51 }
 0x278   :  { %2168 = vst [vmem:[#allocation4 + $0x1a4] sm:$0xf] %v2118_v61 }
 0x279   :  { %2282 = vst [vmem:[#allocation4 + $0x1d8] sm:$0xf] %v2266_v12  ;;  %v2220_v22 = vsel %vm204_vm0, %v2204_v40, %v2205_v8  ;;  %vm1940_vm1 = vcmp.gt.f32.partialorder %v1922_v36, 0.0  ;;  %v2219_v57 = vsel %vm204_vm0, %v2205_v8, %v2206_v20  ;;  %v1956_v46 = vmul.f32 0.1, %v1922_v36 }
 0x27a   :  { %2299 = vst [vmem:[#allocation4 + $0x1c0] sm:$0xf] %v2266_v12  ;;  %v2352_v5 = vrot.slane %v2220_v22, 1  ;;  %v1825_v48 = vpop.f32.mrf.mxu2  ;;  %v2267_v17 = vpack.c.bf16 %v2219_v57, %v2219_v57  ;;  %v2353_v54 = vrot.slane %v2219_v57, 1 }
 0x27b   :  { %2316 = vst [vmem:[#allocation4 + $0x1a8] sm:$0xf] %v2266_v12  ;;  %v1826_v55 = vadd.f32 %v1825_v48, %v1777_v35  ;;  %v1874_v28 = vpop.f32.mrf.mxu3  ;;  %v1972_v34 = vsel %vm1940_vm1, %v1922_v36, %v1956_v46 }
 0x27c   :  { %2409 = vst [vmem:[#allocation4 + $0x1b8] sm:$0xf] %v2393_v27  ;;  %v2365_v52 = vsel %vm204_vm0, %v2351_v1, %v2352_v5  ;;  %v1997_v19 = vrot.slane %v1972_v34, 7 }
 0x27d   :  { %2426 = vst [vmem:[#allocation4 + $0x1a0] sm:$0xf] %v2393_v27  ;;  %v1875_v18 = vadd.f32 %v1874_v28, %v1826_v55  ;;  %v2394_v16 = vpack.c.bf16 %v2365_v52, %v2365_v52 }
 0x27e   :  { %2443 = vst [vmem:[#allocation4 + $0x188] sm:$0xf] %v2393_v27  ;;  %v2002_v13 = vsel %vm1999_vm2, %v1997_v19, 0.0  ;;  %v2003_v3 = vsel %vm1999_vm2, 0.0, %v1997_v19 }
 0x27f   :  { %2135 = vst [vmem:[#allocation4 + $0x1f8] sm:$0xf] %v2119_v15  ;;  %v1924_v37 = vadd.f32 %v1923_v32, %v1875_v18  ;;  %v2207_v7 = vrot.slane %v2003_v3, 1  ;;  %v2208_v26 = vrot.slane %v2002_v13, 1  ;;  %v2120_v23 = vpack.c.bf16 %v2003_v3, %v2003_v3 }
 0x280   :  { %2152 = vst [vmem:[#allocation4 + $0x1e0] sm:$0xf] %v2119_v15 }
 0x281   :  { %2169 = vst [vmem:[#allocation4 + $0x1c8] sm:$0xf] %v2119_v15  ;;  %vm1941_vm3 = vcmp.gt.f32.partialorder %v1924_v37, 0.0  ;;  %v1957_v39 = vmul.f32 0.1, %v1924_v37  ;;  %v2218_v40 = vsel %vm204_vm0, %v2206_v20, %v2207_v7  ;;  %v2217_v53 = vsel %vm204_vm0, %v2207_v7, %v2208_v26 }
 0x282   :  { %2283 = vst [vmem:[#allocation4 + $0x1fc] sm:$0xf] %v2267_v17  ;;  %v2354_v61 = vrot.slane %v2218_v40, 1  ;;  %v2268_v14 = vpack.c.bf16 %v2217_v53, %v2217_v53  ;;  %v2355_v44 = vrot.slane %v2217_v53, 1 }
 0x283   :  { %2300 = vst [vmem:[#allocation4 + $0x1e4] sm:$0xf] %v2267_v17  ;;  %v1973_v41 = vsel %vm1941_vm3, %v1924_v37, %v1957_v39 }
 0x284   :  { %2317 = vst [vmem:[#allocation4 + $0x1cc] sm:$0xf] %v2267_v17  ;;  %v1998_v0 = vrot.slane %v1973_v41, 7  ;;  %v2364_v60 = vsel %vm204_vm0, %v2353_v54, %v2354_v61 }
 0x285   :  { %2410 = vst [vmem:[#allocation4 + $0x1dc] sm:$0xf] %v2394_v16  ;;  %v2395_v63 = vpack.c.bf16 %v2364_v60, %v2364_v60 }
 0x286   :  { %2427 = vst [vmem:[#allocation4 + $0x1c4] sm:$0xf] %v2394_v16  ;;  %v2000_v10 = vsel %vm1999_vm2, %v1998_v0, 0.0  ;;  %v2001_v31 = vsel %vm1999_vm2, 0.0, %v1998_v0 }
 0x287   :  { %2444 = vst [vmem:[#allocation4 + $0x1ac] sm:$0xf] %v2394_v16  ;;  %v2209_v58 = vrot.slane %v2001_v31, 1  ;;  %v2210_v45 = vrot.slane %v2000_v10, 1  ;;  %v2138_v8 = vpack.c.bf16 %v2001_v31, %v2001_v31 }
 0x288   :  { %2136 = vst [vmem:[#allocation4 + $0x21c] sm:$0xf] %v2120_v23 }
 0x289   :  { %2153 = vst [vmem:[#allocation4 + $0x204] sm:$0xf] %v2120_v23  ;;  %v2214_v24 = vsel %vm204_vm0, %v2210_v45, %v6133_v29  ;;  %v2215_v12 = vsel %vm204_vm0, %v2209_v58, %v2210_v45  ;;  %v2216_v42 = vsel %vm204_vm0, %v2208_v26, %v2209_v58 }
 0x28a   :  { %2170 = vst [vmem:[#allocation4 + $0x1ec] sm:$0xf] %v2120_v23  ;;  %v2356_v50 = vrot.slane %v2216_v42, 1  ;;  %v2357_v51 = vrot.slane %v2215_v12, 1  ;;  %v2358_v9 = vrot.slane %v2214_v24, 1  ;;  %v2286_v29 = vpack.c.bf16 %v2215_v12, %v2215_v12 }
 0x28b   :  { %2284 = vst [vmem:[#allocation4 + $0x220] sm:$0xf] %v2268_v14 }
 0x28c   :  { %2301 = vst [vmem:[#allocation4 + $0x208] sm:$0xf] %v2268_v14  ;;  %v2363_v20 = vsel %vm204_vm0, %v2355_v44, %v2356_v50  ;;  %v2362_v27 = vsel %vm204_vm0, %v2357_v51, %v2358_v9 }
 0x28d   :  { %2318 = vst [vmem:[#allocation4 + $0x1f0] sm:$0xf] %v2268_v14  ;;  %v2396_v36 = vpack.c.bf16 %v2363_v20, %v2363_v20  ;;  %v2414_v35 = vpack.c.bf16 %v2362_v27, %v2362_v27 }
 0x28e   :  { %2411 = vst [vmem:[#allocation4 + $0x200] sm:$0xf] %v2395_v63 }
 0x28f   :  { %2428 = vst [vmem:[#allocation4 + $0x1e8] sm:$0xf] %v2395_v63 }
 0x290   :  { %2445 = vst [vmem:[#allocation4 + $0x1d0] sm:$0xf] %v2395_v63 }
 0x291   :  { %2154 = vst [vmem:[#allocation4 + $0x228] sm:$0xf] %v2138_v8 }
 0x292   :  { %2171 = vst [vmem:[#allocation4 + $0x210] sm:$0xf] %v2138_v8 }
 0x293   :  { %2302 = vst [vmem:[#allocation4 + $0x22c] sm:$0xf] %v2286_v29 }
 0x294   :  { %2319 = vst [vmem:[#allocation4 + $0x214] sm:$0xf] %v2286_v29 }
 0x295   :  { %2412 = vst [vmem:[#allocation4 + $0x224] sm:$0xf] %v2396_v36 }
 0x296   :  { %2429 = vst [vmem:[#allocation4 + $0x20c] sm:$0xf] %v2396_v36 }
 0x297   :  { %2430 = vst [vmem:[#allocation4 + $0x230] sm:$0xf] %v2414_v35 }
 0x298   :  { %2446 = vst [vmem:[#allocation4 + $0x1f4] sm:$0xf] %v2396_v36 }
 0x299   :  { %2447 = vst [vmem:[#allocation4 + $0x218] sm:$0xf] %v2414_v35 }
 0x29a   :  { %5546 = dma.done.wait [#allocation7 + $0x1], 9216 }
 0x29b   :  { %5547 = vsyncadd [#allocation7 + $0x1], 4294958080  ;;  %v5357_v22 = vld [vmem:[#allocation3 + $0x38] sm:$0xff]  ;;  %v5356_v33 = vld [vmem:[#allocation3 + $0x30] sm:$0xff]  ;;  %s5557_s1 = smov [#allocation11]   ;;  %s3954_s30 = sshll.u32 %s6569_s3, 4  ;;  %s3955_s30 = int_to_ptr.hbm [resolvable:$true] %s3954_s30 }
 0x29c   :  { %v5365_v1 = vld [vmem:[#allocation3 + $0x78] sm:$0xff]  ;;  %3491 = vmatpush.bf16.msra.mxu1 %v5357_v22  ;;  %v5364_v48 = vld [vmem:[#allocation3 + $0x70] sm:$0xff]  ;;  %v5355_v55 = vld [vmem:[#allocation3 + $0x28] sm:$0xff]  ;;  %s3952_s2 = sshll.u32 %s5557_s1, 4  ;;  %s3953_s2 = int_to_ptr.vmem [resolvable:$true] %s3952_s2 }
 0x29d   :  { %v5373_v5 = vld [vmem:[#allocation3 + $0xb8] sm:$0xff]  ;;  %3540 = vmatpush.bf16.msrb.mxu2 %v5365_v1  ;;  %v5372_v15 = vld [vmem:[#allocation3 + $0xb0] sm:$0xff]  ;;  %v5363_v52 = vld [vmem:[#allocation3 + $0x68] sm:$0xff] }
 0x29e   :  { %3589 = vmatpush.bf16.msrb.mxu3 %v5373_v5  ;;  %v5381_v57 = vld [vmem:[#allocation3 + $0xf8] sm:$0xff]  ;;  %v5380_v46 = vld [vmem:[#allocation3 + $0xf0] sm:$0xff]  ;;  %v5371_v28 = vld [vmem:[#allocation3 + $0xa8] sm:$0xff] }
 0x29f   :  { %3638 = vmatpush.bf16.msrb.mxu0 %v5381_v57  ;;  %v5379_v34 = vld [vmem:[#allocation3 + $0xe8] sm:$0xff]  ;;  %v5354_v18 = vld [vmem:[#allocation3 + $0x20] sm:$0xff]  ;;  %v5353_v37 = vld [vmem:[#allocation3 + $0x18] sm:$0xff] }
 0x2a0   :  { %3492 = vmatpush.bf16.msra.mxu1 %v5356_v33  ;;  %v5362_v17 = vld [vmem:[#allocation3 + $0x60] sm:$0xff]  ;;  %v5361_v13 = vld [vmem:[#allocation3 + $0x58] sm:$0xff]  ;;  %v5352_v7 = vld [vmem:[#allocation3 + $0x10] sm:$0xff] }
 0x2a1   :  { %3541 = vmatpush.bf16.msrb.mxu2 %v5364_v48  ;;  %v5370_v19 = vld [vmem:[#allocation3 + $0xa0] sm:$0xff]  ;;  %v5369_v3 = vld [vmem:[#allocation3 + $0x98] sm:$0xff]  ;;  %v5360_v26 = vld [vmem:[#allocation3 + $0x50] sm:$0xff] }
 0x2a2   :  { %3590 = vmatpush.bf16.msrb.mxu3 %v5372_v15  ;;  %v5378_v32 = vld [vmem:[#allocation3 + $0xe0] sm:$0xff]  ;;  %v5377_v16 = vld [vmem:[#allocation3 + $0xd8] sm:$0xff]  ;;  %v5368_v39 = vld [vmem:[#allocation3 + $0x90] sm:$0xff] }
 0x2a3   :  { %3639 = vmatpush.bf16.msrb.mxu0 %v5380_v46  ;;  %v5376_v54 = vld [vmem:[#allocation3 + $0xd0] sm:$0xff]  ;;  %v5351_v40 = vld [vmem:[#allocation3 + $0x8] sm:$0xff]  ;;  %v5350_v61 = vld [vmem:[#allocation3] sm:$0xff] }
 0x2a4   :  { %3493 = vmatpush.bf16.msra.mxu1 %v5355_v55  ;;  %v5359_v23 = vld [vmem:[#allocation3 + $0x48] sm:$0xff]  ;;  %v5358_v41 = vld [vmem:[#allocation3 + $0x40] sm:$0xff]  ;;  %v5389_v45 = vld [vmem:[#allocation3 + $0x138] sm:$0xff] }
 0x2a5   :  { %3542 = vmatpush.bf16.msrb.mxu2 %v5363_v52  ;;  %v5367_v53 = vld [vmem:[#allocation3 + $0x88] sm:$0xff]  ;;  %v5366_v0 = vld [vmem:[#allocation3 + $0x80] sm:$0xff]  ;;  %v4568_v9 = vld [vmem:[#allocation4 + $0x2c] sm:$0xf0] }
 0x2a6   :  { %3591 = vmatpush.bf16.msrb.mxu3 %v5371_v28  ;;  %v4558_v60 = vld [vmem:[#allocation4] sm:$0xf]  ;;  %v5375_v14 = vld [vmem:[#allocation3 + $0xc8] sm:$0xff]  ;;  %v5282_v10 = vld [vmem:[#allocation4 + $0x20] sm:$0xf0] }
 0x2a7   :  { %3640 = vmatpush.bf16.msrb.mxu0 %v5379_v34  ;;  %v5278_v31 = vld [vmem:[#allocation4 + $0x4] sm:$0xf]  ;;  %v4560_v58 = vld [vmem:[#allocation4 + $0x24] sm:$0xf0]  ;;  %v5283_v24 = vld [vmem:[#allocation4 + $0x28] sm:$0xf0]  ;;  %v4559_v12 = vor.u32 %v5282_v10, %v4558_v60 }
 0x2a8   :  { %3494 = vmatpush.bf16.msra.mxu1 %v5354_v18  ;;  %v4566_v63 = vld [vmem:[#allocation4 + $0x8] sm:$0xf]  ;;  %v4563_v42 = vor.u32 %v5278_v31, %v4560_v58  ;;  %v5374_v50 = vld [vmem:[#allocation3 + $0xc0] sm:$0xff]  ;;  %v5279_v51 = vld [vmem:[#allocation4 + $0xc] sm:$0xf] }
 0x2a9   :  { %3543 = vmatpush.bf16.msrb.mxu2 %v5362_v17  ;;  %v4567_v44 = vor.u32 %v5283_v24, %v4566_v63  ;;  %v5388_v8 = vld [vmem:[#allocation3 + $0x130] sm:$0xff]  ;;  %v4571_v20 = vor.u32 %v5279_v51, %v4568_v9  ;;  %v5387_v29 = vld [vmem:[#allocation3 + $0x128] sm:$0xff]  ;;  %v4604_v46 = vld [vmem:[#allocation4 + $0x74] sm:$0xf0] }
 0x2aa   :  { %3592 = vmatpush.bf16.msrb.mxu3 %v5370_v19  ;;  %v4594_v27 = vld [vmem:[#allocation4 + $0x48] sm:$0xf]  ;;  %v5291_v36 = vld [vmem:[#allocation4 + $0x68] sm:$0xf0]  ;;  %v4596_v22 = vld [vmem:[#allocation4 + $0x6c] sm:$0xf0] }
 0x2ab   :  { %3641 = vmatpush.bf16.msrb.mxu0 %v5378_v32  ;;  %v5287_v35 = vld [vmem:[#allocation4 + $0x4c] sm:$0xf]  ;;  %v4602_v1 = vld [vmem:[#allocation4 + $0x50] sm:$0xf]  ;;  %v5292_v5 = vld [vmem:[#allocation4 + $0x70] sm:$0xf0]  ;;  %v4595_v33 = vor.u32 %v5291_v36, %v4594_v27 }
 0x2ac   :  { %3495 = vmatpush.bf16.msra.mxu1 %v5353_v37  ;;  %v4599_v48 = vor.u32 %v5287_v35, %v4596_v22  ;;  %v4603_v15 = vor.u32 %v5292_v5, %v4602_v1  ;;  %v5288_v57 = vld [vmem:[#allocation4 + $0x54] sm:$0xf]  ;;  %v5386_v52 = vld [vmem:[#allocation3 + $0x120] sm:$0xff]  ;;  %v4630_v28 = vld [vmem:[#allocation4 + $0x90] sm:$0xf] }
 0x2ad   :  { %3544 = vmatpush.bf16.msrb.mxu2 %v5361_v13  ;;  %v4607_v55 = vor.u32 %v5288_v57, %v4604_v46  ;;  %v5300_v34 = vld [vmem:[#allocation4 + $0xb0] sm:$0xf0]  ;;  %v4632_v17 = vld [vmem:[#allocation4 + $0xb4] sm:$0xf0]  ;;  %v5301_v32 = vld [vmem:[#allocation4 + $0xb8] sm:$0xf0] }
 0x2ae   :  { %3593 = vmatpush.bf16.msrb.mxu3 %v5369_v3  ;;  %v5296_v18 = vld [vmem:[#allocation4 + $0x94] sm:$0xf]  ;;  %v4638_v19 = vld [vmem:[#allocation4 + $0x98] sm:$0xf]  ;;  %v4631_v37 = vor.u32 %v5300_v34, %v4630_v28  ;;  %v5306_v10 = vld [vmem:[#allocation4 + $0xe4] sm:$0xf] }
 0x2af   :  { %3642 = vmatpush.bf16.msrb.mxu0 %v5377_v16  ;;  %v4635_v13 = vor.u32 %v5296_v18, %v4632_v17  ;;  %v4639_v3 = vor.u32 %v5301_v32, %v4638_v19  ;;  %v5297_v16 = vld [vmem:[#allocation4 + $0x9c] sm:$0xf]  ;;  %v4676_v31 = vld [vmem:[#allocation4 + $0x104] sm:$0xf0]  ;;  %v4702_v63 = vld [vmem:[#allocation4 + $0x120] sm:$0xf] }
 0x2b0   :  { %3496 = vmatpush.bf16.msra.mxu1 %v5352_v7  ;;  %v4640_v7 = vld [vmem:[#allocation4 + $0xbc] sm:$0xf0]  ;;  %v4679_v58 = vor.u32 %v5306_v10, %v4676_v31  ;;  %v5318_v24 = vld [vmem:[#allocation4 + $0x140] sm:$0xf0]  ;;  %v5397_v27 = vld [vmem:[#allocation3 + $0x178] sm:$0xff] }
 0x2b1   :  { %3545 = vmatpush.bf16.msrb.mxu2 %v5360_v26  ;;  %v4643_v26 = vor.u32 %v5297_v16, %v4640_v7  ;;  %v4703_v51 = vor.u32 %v5318_v24, %v4702_v63  ;;  %v5383_v35 = vld [vmem:[#allocation3 + $0x108] sm:$0xff]  ;;  %v5405_v22 = vld [vmem:[#allocation3 + $0x1b8] sm:$0xff]  ;;  %v5396_v1 = vld [vmem:[#allocation3 + $0x170] sm:$0xff] }
 0x2b2   :  { %3594 = vmatpush.bf16.msrb.mxu3 %v5368_v39  ;;  %v5385_v39 = vld [vmem:[#allocation3 + $0x118] sm:$0xff]  ;;  %v5404_v5 = vld [vmem:[#allocation3 + $0x1b0] sm:$0xff]  ;;  %v5403_v57 = vld [vmem:[#allocation3 + $0x1a8] sm:$0xff] }
 0x2b3   :  { %3643 = vmatpush.bf16.msrb.mxu0 %v5376_v54  ;;  %v4666_v54 = vld [vmem:[#allocation4 + $0xd8] sm:$0xf]  ;;  %v4738_v46 = vld [vmem:[#allocation4 + $0x168] sm:$0xf]  ;;  %v4740_v28 = vld [vmem:[#allocation4 + $0x18c] sm:$0xf0] }
 0x2b4   :  { %3497 = vmatpush.bf16.msra.mxu1 %v5351_v40  ;;  %v5309_v40 = vld [vmem:[#allocation4 + $0xf8] sm:$0xf0]  ;;  %v5394_v34 = vld [vmem:[#allocation3 + $0x160] sm:$0xff]  ;;  %v4746_v18 = vld [vmem:[#allocation4 + $0x170] sm:$0xf] }
 0x2b5   :  { %3546 = vmatpush.bf16.msrb.mxu2 %v5359_v23  ;;  %v5305_v23 = vld [vmem:[#allocation4 + $0xdc] sm:$0xf]  ;;  %v5328_v17 = vld [vmem:[#allocation4 + $0x190] sm:$0xf0]  ;;  %v5402_v19 = vld [vmem:[#allocation3 + $0x1a0] sm:$0xff] }
 0x2b6   :  { %3595 = vmatpush.bf16.msrb.mxu3 %v5367_v53  ;;  %v4668_v53 = vld [vmem:[#allocation4 + $0xfc] sm:$0xf0]  ;;  %v4748_v16 = vld [vmem:[#allocation4 + $0x194] sm:$0xf0]  ;;  %v5336_v10 = vld [vmem:[#allocation4 + $0x1d0] sm:$0xf0] }
 0x2b7   :  { %3644 = vmatpush.bf16.msrb.mxu0 %v5375_v14  ;;  %v4671_v60 = vor.u32 %v5305_v23, %v4668_v53  ;;  %v5393_v7 = vld [vmem:[#allocation3 + $0x158] sm:$0xff]  ;;  %v5392_v23 = vld [vmem:[#allocation3 + $0x150] sm:$0xff]  ;;  %v5390_v24 = vld [vmem:[#allocation3 + $0x140] sm:$0xff] }
 0x2b8   :  { %3498 = vmatpush.bf16.msra.mxu1 %v5350_v61  ;;  %v4674_v61 = vld [vmem:[#allocation4 + $0xe0] sm:$0xf]  ;;  %v5400_v53 = vld [vmem:[#allocation3 + $0x190] sm:$0xff]  ;;  %v5337_v63 = vld [vmem:[#allocation4 + $0x1d8] sm:$0xf0] }
 0x2b9   :  { %3547 = vmatpush.bf16.msrb.mxu2 %v5358_v41  ;;  %v5310_v41 = vld [vmem:[#allocation4 + $0x100] sm:$0xf0]  ;;  %v5332_v31 = vld [vmem:[#allocation4 + $0x1b4] sm:$0xf] }
 0x2ba   :  { %3596 = vmatpush.bf16.msrb.mxu3 %v5366_v0  ;;  %v4667_v0 = vor.u32 %v5309_v40, %v4666_v54  ;;  %v4675_v14 = vor.u32 %v5310_v41, %v4674_v61  ;;  %v5401_v54 = vld [vmem:[#allocation3 + $0x198] sm:$0xff]  ;;  %v5411_v40 = vld [vmem:[#allocation3 + $0x1e8] sm:$0xff]  ;;  %v5410_v61 = vld [vmem:[#allocation3 + $0x1e0] sm:$0xff] }
 0x2bb   :  { %3499 = vmatmul.bf16.vlgmr.msra.gmra.mxu1 %v4559_v12  ;;  %3645 = vmatpush.bf16.msrb.mxu0 %v5374_v50  ;;  %v5314_v12 = vld [vmem:[#allocation4 + $0x124] sm:$0xf]  ;;  %v5319_v50 = vld [vmem:[#allocation4 + $0x148] sm:$0xf0] }
 0x2bc   :  { %3687 = vmatpush.bf16.msrb.mxu1 %v5389_v45  ;;  %3548 = vmatmul.bf16.vlgmr.msrb.gmra.mxu2 %v4563_v42  ;;  %v5384_v45 = vld [vmem:[#allocation3 + $0x110] sm:$0xff]  ;;  %v4704_v42 = vld [vmem:[#allocation4 + $0x144] sm:$0xf0] }
 0x2bd   :  { %3597 = vmatmul.bf16.vlgmr.msrb.gmra.mxu3 %v4567_v44  ;;  %v4710_v44 = vld [vmem:[#allocation4 + $0x128] sm:$0xf]  ;;  %v4707_v9 = vor.u32 %v5314_v12, %v4704_v42  ;;  %3736 = vmatpush.bf16.msra.mxu2 %v5397_v27 }
 0x2be   :  { %3646 = vmatmul.bf16.vlgmr.msrb.gmra.mxu0 %v4571_v20  ;;  %v5315_v20 = vld [vmem:[#allocation4 + $0x12c] sm:$0xf]  ;;  %3785 = vmatpush.bf16.msra.mxu3 %v5405_v22  ;;  %v5345_v22 = vld [vmem:[#allocation4 + $0x218] sm:$0xf0] }
 0x2bf   :  { %v5391_v41 = vld [vmem:[#allocation3 + $0x148] sm:$0xff] }
 0x2c0   :  { %3688 = vmatpush.bf16.msrb.mxu1 %v5388_v8  ;;  %v4711_v8 = vor.u32 %v5319_v50, %v4710_v44  ;;  %v5333_v44 = vld [vmem:[#allocation4 + $0x1bc] sm:$0xf]  ;;  %v5407_v27 = vld [vmem:[#allocation3 + $0x1c8] sm:$0xff] }
 0x2c1   :  { %3737 = vmatpush.bf16.msra.mxu2 %v5396_v1  ;;  %v5341_v1 = vld [vmem:[#allocation4 + $0x1fc] sm:$0xf] }
 0x2c2   :  { %3786 = vmatpush.bf16.msra.mxu3 %v5404_v5  ;;  %v4812_v5 = vld [vmem:[#allocation4 + $0x21c] sm:$0xf0] }
 0x2c4   :  { %3689 = vmatpush.bf16.msrb.mxu1 %v5387_v29  ;;  %v4712_v29 = vld [vmem:[#allocation4 + $0x14c] sm:$0xf0] }
 0x2c5   :  { %v4715_v36 = vor.u32 %v5315_v20, %v4712_v29  ;;  %v5421_v29 = vld [vmem:[#allocation3 + $0x238] sm:$0xff] }
 0x2c6   :  { %3787 = vmatpush.bf16.msra.mxu3 %v5403_v57  ;;  %v4815_v57 = vor.u32 %v5341_v1, %v4812_v5  ;;  %v5290_v1 = vld [vmem:[#allocation4 + $0x64] sm:$0xf]  ;;  %v4620_v5 = vld [vmem:[#allocation4 + $0x84] sm:$0xf0] }
 0x2c8   :  { %3690 = vmatpush.bf16.msrb.mxu1 %v5386_v52  ;;  %v5323_v52 = vld [vmem:[#allocation4 + $0x16c] sm:$0xf] }
 0x2ca   :  { %3788 = vmatpush.bf16.msra.mxu3 %v5402_v19  ;;  %v5280_v19 = vld [vmem:[#allocation4 + $0x14] sm:$0xf] }
 0x2cb   :  { %3504 = vmatmul.bf16.gmra.mxu1 %v4595_v33  ;;  %v5413_v33 = vld [vmem:[#allocation3 + $0x1f8] sm:$0xff] }
 0x2cc   :  { %3553 = vmatmul.bf16.gmra.mxu2 %v4599_v48  ;;  %3691 = vmatpush.bf16.msrb.mxu1 %v5385_v39  ;;  %v5395_v48 = vld [vmem:[#allocation3 + $0x168] sm:$0xff]  ;;  %v5382_v39 = vld [vmem:[#allocation3 + $0x100] sm:$0xff] }
 0x2cd   :  { %3602 = vmatmul.bf16.gmra.mxu3 %v4603_v15  ;;  %3834 = vmatpush.bf16.msra.mxu0 %v5413_v33  ;;  %v5412_v15 = vld [vmem:[#allocation3 + $0x1f0] sm:$0xff]  ;;  %v4818_v33 = vld [vmem:[#allocation4 + $0x200] sm:$0xf] }
 0x2ce   :  { %3651 = vmatmul.bf16.gmra.mxu0 %v4607_v55  ;;  %v5327_v55 = vld [vmem:[#allocation4 + $0x188] sm:$0xf0]  ;;  %3738 = vmatpush.bf16.msra.mxu2 %v5395_v48  ;;  %v5346_v48 = vld [vmem:[#allocation4 + $0x220] sm:$0xf0] }
 0x2cf   :  { %v4739_v32 = vor.u32 %v5327_v55, %v4738_v46  ;;  %3789 = vmatpush.bf16.msra.mxu3 %v5401_v54  ;;  %v4819_v46 = vor.u32 %v5346_v48, %v4818_v33  ;;  %v5342_v55 = vld [vmem:[#allocation4 + $0x204] sm:$0xf]  ;;  %v4584_v54 = vld [vmem:[#allocation4 + $0x3c] sm:$0xf0] }
 0x2d0   :  { %3692 = vmatpush.bf16.msrb.mxu1 %v5384_v45  ;;  %v4782_v45 = vld [vmem:[#allocation4 + $0x1b8] sm:$0xf] }
 0x2d1   :  { %3835 = vmatpush.bf16.msra.mxu0 %v5412_v15  ;;  %v4783_v50 = vor.u32 %v5337_v63, %v4782_v45  ;;  %v4610_v45 = vld [vmem:[#allocation4 + $0x58] sm:$0xf] }
 0x2d2   :  { %3739 = vmatpush.bf16.msra.mxu2 %v5394_v34  ;;  %v5420_v34 = vld [vmem:[#allocation3 + $0x230] sm:$0xff] }
 0x2d3   :  { %3790 = vmatpush.bf16.msra.mxu3 %v5400_v53 }
 0x2d4   :  { %3693 = vmatpush.bf16.msrb.mxu1 %v5383_v35  ;;  %v4810_v35 = vld [vmem:[#allocation4 + $0x1f8] sm:$0xf] }
 0x2d5   :  { %3836 = vmatpush.bf16.msra.mxu0 %v5411_v40  ;;  %v4811_v15 = vor.u32 %v5345_v22, %v4810_v35 }
 0x2d6   :  { %3740 = vmatpush.bf16.msra.mxu2 %v5393_v7 }
 0x2d8   :  { %3694 = vmatpush.bf16.msrb.mxu1 %v5382_v39  ;;  %v5281_v39 = vld [vmem:[#allocation4 + $0x1c] sm:$0xf] }
 0x2d9   :  { %3837 = vmatpush.bf16.msra.mxu0 %v5410_v61  ;;  %v4587_v40 = vor.u32 %v5281_v39, %v4584_v54  ;;  %v6665_v61 = vld [vmem:[#allocation24_spill] sm:$0xff]  ;;  %v5303_v39 = vld [vmem:[#allocation4 + $0xc8] sm:$0xf0] }
 0x2da   :  { %3741 = vmatpush.bf16.msra.mxu2 %v5392_v23  ;;  %v5419_v23 = vld [vmem:[#allocation3 + $0x228] sm:$0xff] }
 0x2db   :  { %3509 = vmatmul.bf16.gmra.mxu1 %v4631_v37  ;;  %v4743_v37 = vor.u32 %v5323_v52, %v4740_v28  ;;  %v4820_v52 = vld [vmem:[#allocation4 + $0x224] sm:$0xf0] }
 0x2dc   :  { %3558 = vmatmul.bf16.gmra.mxu2 %v4635_v13  ;;  %v4747_v13 = vor.u32 %v5328_v17, %v4746_v18  ;;  %3883 = vmatpush.bf16.msra.mxu1 %v5421_v29  ;;  %v4823_v28 = vor.u32 %v5342_v55, %v4820_v52  ;;  %v4574_v18 = vld [vmem:[#allocation4 + $0x10] sm:$0xf]  ;;  %v5284_v17 = vld [vmem:[#allocation4 + $0x30] sm:$0xf0] }
 0x2dd   :  { %3607 = vmatmul.bf16.gmra.mxu3 %v4639_v3  ;;  %v5324_v3 = vld [vmem:[#allocation4 + $0x174] sm:$0xf] }
 0x2de   :  { %3656 = vmatmul.bf16.gmra.mxu0 %v4643_v26  ;;  %v4751_v26 = vor.u32 %v5324_v3, %v4748_v16  ;;  %3742 = vmatpush.bf16.msra.mxu2 %v5391_v41  ;;  %v4575_v3 = vor.u32 %v5284_v17, %v4574_v18 }
 0x2e0   :  { %3884 = vmatpush.bf16.msra.mxu1 %v5420_v34 }
 0x2e2   :  { %3743 = vmatpush.bf16.msra.mxu2 %v5390_v24  ;;  %v5293_v24 = vld [vmem:[#allocation4 + $0x78] sm:$0xf0] }
 0x2e4   :  { %3885 = vmatpush.bf16.msra.mxu1 %v5419_v23 }
 0x2eb   :  { %3514 = vmatmul.bf16.gmra.mxu1 %v4667_v0  ;;  %v5399_v0 = vld [vmem:[#allocation3 + $0x188] sm:$0xff] }
 0x2ec   :  { %3563 = vmatmul.bf16.gmra.mxu2 %v4671_v60  ;;  %v5409_v60 = vld [vmem:[#allocation3 + $0x1d8] sm:$0xff]  ;;  %3791 = vmatpush.bf16.msra.mxu3 %v5399_v0 }
 0x2ed   :  { %3612 = vmatmul.bf16.gmra.mxu3 %v4675_v14  ;;  %v4774_v14 = vld [vmem:[#allocation4 + $0x1b0] sm:$0xf]  ;;  %3838 = vmatpush.bf16.msra.mxu0 %v5409_v60 }
 0x2ee   :  { %3661 = vmatmul.bf16.gmra.mxu0 %v4679_v58  ;;  %v4776_v58 = vld [vmem:[#allocation4 + $0x1d4] sm:$0xf0]  ;;  %v4775_v12 = vor.u32 %v5336_v10, %v4774_v14 }
 0x2ef   :  { %v4779_v42 = vor.u32 %v5332_v31, %v4776_v58 }
 0x2fb   :  { %3519 = vmatmul.bf16.gmra.mxu1 %v4703_v51  ;;  %v4784_v51 = vld [vmem:[#allocation4 + $0x1dc] sm:$0xf0] }
 0x2fc   :  { %3568 = vmatmul.bf16.gmra.mxu2 %v4707_v9  ;;  %v5398_v9 = vld [vmem:[#allocation3 + $0x180] sm:$0xff]  ;;  %v4787_v20 = vor.u32 %v5333_v44, %v4784_v51  ;;  %v6666_v44 = vld [vmem:[#allocation25_spill] sm:$0xff] }
 0x2fd   :  { %3617 = vmatmul.bf16.gmra.mxu3 %v4711_v8  ;;  %v5408_v8 = vld [vmem:[#allocation3 + $0x1d0] sm:$0xff]  ;;  %v4618_v51 = vld [vmem:[#allocation4 + $0x60] sm:$0xf] }
 0x2fe   :  { %3666 = vmatmul.bf16.gmra.mxu0 %v4715_v36  ;;  %3792 = vmatpush.bf16.msra.mxu3 %v5398_v9  ;;  %v5406_v36 = vld [vmem:[#allocation3 + $0x1c0] sm:$0xff] }
 0x2ff   :  { %3839 = vmatpush.bf16.msra.mxu0 %v5408_v8  ;;  %v5294_v9 = vld [vmem:[#allocation4 + $0x80] sm:$0xf0] }
 0x300   :  { %v4619_v22 = vor.u32 %v5294_v9, %v4618_v51  ;;  %v4682_v9 = vld [vmem:[#allocation4 + $0xe8] sm:$0xf] }
 0x303   :  { %3840 = vmatpush.bf16.msra.mxu0 %v5407_v27  ;;  %v4611_v27 = vor.u32 %v5293_v24, %v4610_v45  ;;  %v5417_v45 = vld [vmem:[#allocation3 + $0x218] sm:$0xff] }
 0x307   :  { %3841 = vmatpush.bf16.msra.mxu0 %v5406_v36 }
 0x30b   :  { %3524 = vmatmul.bf16.gmra.mxu1 %v4739_v32  ;;  %v4576_v32 = vld [vmem:[#allocation4 + $0x34] sm:$0xf0] }
 0x30c   :  { %3573 = vmatmul.bf16.gmra.mxu2 %v4743_v37  ;;  %v4582_v37 = vld [vmem:[#allocation4 + $0x18] sm:$0xf]  ;;  %v4579_v16 = vor.u32 %v5280_v19, %v4576_v32  ;;  %v4646_v32 = vld [vmem:[#allocation4 + $0xa0] sm:$0xf] }
 0x30d   :  { %3622 = vmatmul.bf16.gmra.mxu3 %v4747_v13  ;;  %v5285_v13 = vld [vmem:[#allocation4 + $0x38] sm:$0xf0] }
 0x30e   :  { %3671 = vmatmul.bf16.gmra.mxu0 %v4751_v26  ;;  %v4583_v26 = vor.u32 %v5285_v13, %v4582_v37  ;;  %v5302_v13 = vld [vmem:[#allocation4 + $0xc0] sm:$0xf0] }
 0x30f   :  { %v4647_v23 = vor.u32 %v5302_v13, %v4646_v32 }
 0x31b   :  { %3529 = vmatmul.bf16.gmra.mxu1 %v4775_v12  ;;  %v5289_v12 = vld [vmem:[#allocation4 + $0x5c] sm:$0xf] }
 0x31c   :  { %3578 = vmatmul.bf16.gmra.mxu2 %v4779_v42  ;;  %v4612_v42 = vld [vmem:[#allocation4 + $0x7c] sm:$0xf0] }
 0x31d   :  { %3627 = vmatmul.bf16.gmra.mxu3 %v4783_v50  ;;  %v4615_v36 = vor.u32 %v5289_v12, %v4612_v42 }
 0x31e   :  { %3676 = vmatmul.bf16.gmra.mxu0 %v4787_v20 }
 0x32b   :  { %3534 = vmatmul.bf16.gmra.mxu1 %v4811_v15  ;;  %v4623_v15 = vor.u32 %v5290_v1, %v4620_v5 }
 0x32c   :  { %3583 = vmatmul.bf16.gmra.mxu2 %v4815_v57  ;;  %v5418_v57 = vld [vmem:[#allocation3 + $0x220] sm:$0xff] }
 0x32d   :  { %3632 = vmatmul.bf16.gmra.mxu3 %v4819_v46  ;;  %3886 = vmatpush.bf16.msra.mxu1 %v5418_v57 }
 0x32e   :  { %3681 = vmatmul.bf16.gmra.mxu0 %v4823_v28 }
 0x331   :  { %3887 = vmatpush.bf16.msra.mxu1 %v5417_v45 }
 0x338   :  { %v3500_v7 = vpop.f32.mrf.mxu1 }
 0x339   :  { %v3501_v41 = vadd.f32 %v3500_v7, %v6665_v61 }
 0x33b   :  { %3695 = vmatmul.bf16.vlgmr.msrb.gmra.mxu1 %v4575_v3  ;;  %v3647_v53 = vpop.f32.mrf.mxu0  ;;  %v5298_v3 = vld [vmem:[#allocation4 + $0xa4] sm:$0xf] }
 0x33c   :  { %3744 = vmatmul.bf16.vlgmr.msra.gmra.mxu2 %v4579_v16  ;;  %v4648_v16 = vld [vmem:[#allocation4 + $0xc4] sm:$0xf0] }
 0x33d   :  { %3793 = vmatmul.bf16.vlgmr.msra.gmra.mxu3 %v4583_v26  ;;  %v4654_v26 = vld [vmem:[#allocation4 + $0xa8] sm:$0xf] }
 0x33e   :  { %3842 = vmatmul.bf16.vlgmr.msra.gmra.mxu0 %v4587_v40 }
 0x33f   :  { %v3549_v0 = vpop.f32.mrf.mxu2 }
 0x340   :  { %v3550_v60 = vadd.f32 %v3549_v0, %v3501_v41  ;;  %v3598_v14 = vpop.f32.mrf.mxu3  ;;  %v3502_v10 = vpop.f32.mrf.mxu1  ;;  %v4655_v41 = vor.u32 %v5303_v39, %v4654_v26  ;;  %v5299_v0 = vld [vmem:[#allocation4 + $0xac] sm:$0xf]  ;;  %v4718_v39 = vld [vmem:[#allocation4 + $0x130] sm:$0xf] }
 0x341   :  { %v3503_v50 = vadd.f32 %v3502_v10, %v6666_v44 }
 0x342   :  { %v3599_v31 = vadd.f32 %v3598_v14, %v3550_v60  ;;  %v4656_v60 = vld [vmem:[#allocation4 + $0xcc] sm:$0xf0] }
 0x343   :  { %v3649_v63 = vpop.f32.mrf.mxu0 }
 0x344   :  { %v6449_v58 = vadd.f32 %v3647_v53, %v3599_v31  ;;  %v4651_v53 = vor.u32 %v5298_v3, %v4648_v16  ;;  %v4659_v31 = vor.u32 %v5299_v0, %v4656_v60 }
 0x347   :  { %v3551_v8 = vpop.f32.mrf.mxu2 }
 0x348   :  { %v3552_v20 = vadd.f32 %v3551_v8, %v3503_v50  ;;  %v3600_v29 = vpop.f32.mrf.mxu3  ;;  %v3505_v35 = vpop.f32.mrf.mxu1 }
 0x349   :  { %v3506_v55 = vadd.f32 %v3505_v35, %v5731_v2  ;;  %v4690_v35 = vld [vmem:[#allocation4 + $0xf0] sm:$0xf] }
 0x34a   :  { %v3601_v33 = vadd.f32 %v3600_v29, %v3552_v20  ;;  %v5311_v20 = vld [vmem:[#allocation4 + $0x108] sm:$0xf0] }
 0x34b   :  { %3700 = vmatmul.bf16.gmra.mxu1 %v4611_v27  ;;  %v3652_v46 = vpop.f32.mrf.mxu0  ;;  %v5307_v29 = vld [vmem:[#allocation4 + $0xec] sm:$0xf]  ;;  %v4684_v27 = vld [vmem:[#allocation4 + $0x10c] sm:$0xf0] }
 0x34c   :  { %v6452_v48 = vadd.f32 %v3649_v63, %v3601_v33  ;;  %3749 = vmatmul.bf16.gmra.mxu2 %v4615_v36  ;;  %v4683_v33 = vor.u32 %v5311_v20, %v4682_v9 }
 0x34d   :  { %3798 = vmatmul.bf16.gmra.mxu3 %v4619_v22  ;;  %v5312_v22 = vld [vmem:[#allocation4 + $0x110] sm:$0xf0] }
 0x34e   :  { %3847 = vmatmul.bf16.gmra.mxu0 %v4623_v15  ;;  %v4687_v15 = vor.u32 %v5307_v29, %v4684_v27 }
 0x34f   :  { %v3554_v52 = vpop.f32.mrf.mxu2 }
 0x350   :  { %v3555_v28 = vadd.f32 %v3554_v52, %v3506_v55  ;;  %v3603_v34 = vpop.f32.mrf.mxu3  ;;  %v3507_v18 = vpop.f32.mrf.mxu1  ;;  %v5308_v55 = vld [vmem:[#allocation4 + $0xf4] sm:$0xf]  ;;  %v4692_v52 = vld [vmem:[#allocation4 + $0x114] sm:$0xf0] }
 0x351   :  { %v3508_v7 = vadd.f32 %v3507_v18, %v5745_v11  ;;  %v4695_v18 = vor.u32 %v5308_v55, %v4692_v52 }
 0x352   :  { %v3604_v17 = vadd.f32 %v3603_v34, %v3555_v28 }
 0x353   :  { %v3654_v37 = vpop.f32.mrf.mxu0 }
 0x354   :  { %v6455_v19 = vadd.f32 %v3652_v46, %v3604_v17  ;;  %v4691_v46 = vor.u32 %v5312_v22, %v4690_v35  ;;  %v5416_v17 = vld [vmem:[#allocation3 + $0x210] sm:$0xff]  ;;  %v4754_v22 = vld [vmem:[#allocation4 + $0x178] sm:$0xf] }
 0x355   :  { %3888 = vmatpush.bf16.msra.mxu1 %v5416_v17 }
 0x357   :  { %v3556_v54 = vpop.f32.mrf.mxu2 }
 0x358   :  { %v3557_v2 = vadd.f32 %v3556_v54, %v3508_v7  ;;  %v3605_v40 = vpop.f32.mrf.mxu3  ;;  %v3510_v61 = vpop.f32.mrf.mxu1 }
 0x359   :  { %v3511_v63 = vadd.f32 %v3510_v61, %v5759_v21  ;;  %v4726_v61 = vld [vmem:[#allocation4 + $0x138] sm:$0xf] }
 0x35a   :  { %v3606_v14 = vadd.f32 %v3605_v40, %v3557_v2  ;;  %v5320_v2 = vld [vmem:[#allocation4 + $0x150] sm:$0xf0] }
 0x35b   :  { %3705 = vmatmul.bf16.gmra.mxu1 %v4647_v23  ;;  %v3657_v11 = vpop.f32.mrf.mxu0  ;;  %v5316_v40 = vld [vmem:[#allocation4 + $0x134] sm:$0xf]  ;;  %v4720_v23 = vld [vmem:[#allocation4 + $0x154] sm:$0xf0] }
 0x35c   :  { %v6458_v10 = vadd.f32 %v3654_v37, %v3606_v14  ;;  %3754 = vmatmul.bf16.gmra.mxu2 %v4651_v53  ;;  %v4719_v14 = vor.u32 %v5320_v2, %v4718_v39 }
 0x35d   :  { %3803 = vmatmul.bf16.gmra.mxu3 %v4655_v41  ;;  %v5321_v41 = vld [vmem:[#allocation4 + $0x158] sm:$0xf0] }
 0x35e   :  { %3852 = vmatmul.bf16.gmra.mxu0 %v4659_v31  ;;  %v4723_v31 = vor.u32 %v5316_v40, %v4720_v23 }
 0x35f   :  { %v3559_v24 = vpop.f32.mrf.mxu2 }
 0x360   :  { %v3560_v12 = vadd.f32 %v3559_v24, %v3511_v63  ;;  %v3608_v42 = vpop.f32.mrf.mxu3  ;;  %v3512_v44 = vpop.f32.mrf.mxu1  ;;  %v5317_v63 = vld [vmem:[#allocation4 + $0x13c] sm:$0xf]  ;;  %v4728_v24 = vld [vmem:[#allocation4 + $0x15c] sm:$0xf0] }
 0x361   :  { %v3513_v36 = vadd.f32 %v3512_v44, %v5773_v30  ;;  %v4731_v44 = vor.u32 %v5317_v63, %v4728_v24 }
 0x362   :  { %v3609_v50 = vadd.f32 %v3608_v42, %v3560_v12 }
 0x363   :  { %v3659_v8 = vpop.f32.mrf.mxu0 }
 0x364   :  { %v6461_v51 = vadd.f32 %v3657_v11, %v3609_v50  ;;  %v4727_v11 = vor.u32 %v5321_v41, %v4726_v61  ;;  %v5415_v50 = vld [vmem:[#allocation3 + $0x208] sm:$0xff]  ;;  %v4790_v41 = vld [vmem:[#allocation4 + $0x1c0] sm:$0xf] }
 0x365   :  { %3889 = vmatpush.bf16.msra.mxu1 %v5415_v50 }
 0x367   :  { %v3561_v1 = vpop.f32.mrf.mxu2 }
 0x368   :  { %v3562_v21 = vadd.f32 %v3561_v1, %v3513_v36  ;;  %v3610_v5 = vpop.f32.mrf.mxu3  ;;  %v3515_v57 = vpop.f32.mrf.mxu1 }
 0x369   :  { %v3516_v32 = vadd.f32 %v3515_v57, %v5790_v56  ;;  %v4762_v57 = vld [vmem:[#allocation4 + $0x180] sm:$0xf] }
 0x36a   :  { %v3611_v28 = vadd.f32 %v3610_v5, %v3562_v21  ;;  %v5329_v21 = vld [vmem:[#allocation4 + $0x198] sm:$0xf0] }
 0x36b   :  { %3710 = vmatmul.bf16.gmra.mxu1 %v4683_v33  ;;  %v3662_v30 = vpop.f32.mrf.mxu0  ;;  %v5325_v5 = vld [vmem:[#allocation4 + $0x17c] sm:$0xf]  ;;  %v4756_v33 = vld [vmem:[#allocation4 + $0x19c] sm:$0xf0] }
 0x36c   :  { %v6464_v34 = vadd.f32 %v3659_v8, %v3611_v28  ;;  %3759 = vmatmul.bf16.gmra.mxu2 %v4687_v15  ;;  %v4755_v28 = vor.u32 %v5329_v21, %v4754_v22 }
 0x36d   :  { %3808 = vmatmul.bf16.gmra.mxu3 %v4691_v46  ;;  %v5330_v46 = vld [vmem:[#allocation4 + $0x1a0] sm:$0xf0] }
 0x36e   :  { %3857 = vmatmul.bf16.gmra.mxu0 %v4695_v18  ;;  %v4759_v18 = vor.u32 %v5325_v5, %v4756_v33 }
 0x36f   :  { %v3564_v37 = vpop.f32.mrf.mxu2 }
 0x370   :  { %v3565_v13 = vadd.f32 %v3564_v37, %v3516_v32  ;;  %v3613_v3 = vpop.f32.mrf.mxu3  ;;  %v3517_v16 = vpop.f32.mrf.mxu1  ;;  %v5326_v32 = vld [vmem:[#allocation4 + $0x184] sm:$0xf]  ;;  %v4764_v37 = vld [vmem:[#allocation4 + $0x1a4] sm:$0xf0] }
 0x371   :  { %v3518_v53 = vadd.f32 %v3517_v16, %v5930_v4  ;;  %v4767_v16 = vor.u32 %v5326_v32, %v4764_v37 }
 0x372   :  { %v3614_v7 = vadd.f32 %v3613_v3, %v3565_v13 }
 0x373   :  { %v3664_v54 = vpop.f32.mrf.mxu0 }
 0x374   :  { %v6467_v26 = vadd.f32 %v3662_v30, %v3614_v7  ;;  %v4763_v30 = vor.u32 %v5330_v46, %v4762_v57  ;;  %v5414_v7 = vld [vmem:[#allocation3 + $0x200] sm:$0xff]  ;;  %v4826_v57 = vld [vmem:[#allocation4 + $0x208] sm:$0xf] }
 0x375   :  { %3890 = vmatpush.bf16.msra.mxu1 %v5414_v7 }
 0x377   :  { %v3566_v0 = vpop.f32.mrf.mxu2 }
 0x378   :  { %v3567_v56 = vadd.f32 %v3566_v0, %v3518_v53  ;;  %v3615_v60 = vpop.f32.mrf.mxu3  ;;  %v3520_v45 = vpop.f32.mrf.mxu1 }
 0x379   :  { %v3521_v9 = vadd.f32 %v3520_v45, %v5815_v25  ;;  %v4798_v45 = vld [vmem:[#allocation4 + $0x1c8] sm:$0xf] }
 0x37a   :  { %v3616_v12 = vadd.f32 %v3615_v60, %v3567_v56  ;;  %v5338_v56 = vld [vmem:[#allocation4 + $0x1e0] sm:$0xf0] }
 0x37b   :  { %3715 = vmatmul.bf16.gmra.mxu1 %v4719_v14  ;;  %v3667_v4 = vpop.f32.mrf.mxu0  ;;  %v5334_v60 = vld [vmem:[#allocation4 + $0x1c4] sm:$0xf]  ;;  %v4792_v14 = vld [vmem:[#allocation4 + $0x1e4] sm:$0xf0] }
 0x37c   :  { %v6470_v42 = vadd.f32 %v3664_v54, %v3616_v12  ;;  %3764 = vmatmul.bf16.gmra.mxu2 %v4723_v31  ;;  %v4791_v12 = vor.u32 %v5338_v56, %v4790_v41 }
 0x37d   :  { %3813 = vmatmul.bf16.gmra.mxu3 %v4727_v11  ;;  %v5339_v11 = vld [vmem:[#allocation4 + $0x1e8] sm:$0xf0] }
 0x37e   :  { %3862 = vmatmul.bf16.gmra.mxu0 %v4731_v44  ;;  %v4795_v44 = vor.u32 %v5334_v60, %v4792_v14 }
 0x37f   :  { %v3569_v8 = vpop.f32.mrf.mxu2 }
 0x380   :  { %v3570_v20 = vadd.f32 %v3569_v8, %v3521_v9  ;;  %v3618_v29 = vpop.f32.mrf.mxu3  ;;  %v3522_v27 = vpop.f32.mrf.mxu1  ;;  %v5335_v9 = vld [vmem:[#allocation4 + $0x1cc] sm:$0xf]  ;;  %v4800_v8 = vld [vmem:[#allocation4 + $0x1ec] sm:$0xf0] }
 0x381   :  { %v3523_v15 = vadd.f32 %v3522_v27, %v5829_v47  ;;  %v4803_v27 = vor.u32 %v5335_v9, %v4800_v8 }
 0x382   :  { %v3619_v36 = vadd.f32 %v3618_v29, %v3570_v20 }
 0x383   :  { %v3669_v1 = vpop.f32.mrf.mxu0 }
 0x384   :  { %v6473_v35 = vadd.f32 %v3667_v4, %v3619_v36  ;;  %v4799_v4 = vor.u32 %v5339_v11, %v4798_v45  ;;  %v5286_v45 = vld [vmem:[#allocation4 + $0x40] sm:$0xf0] }
 0x387   :  { %v3571_v55 = vpop.f32.mrf.mxu2 }
 0x388   :  { %v3572_v25 = vadd.f32 %v3571_v55, %v3523_v15  ;;  %v3620_v52 = vpop.f32.mrf.mxu3  ;;  %v3525_v17 = vpop.f32.mrf.mxu1  ;;  %v5347_v55 = vld [vmem:[#allocation4 + $0x228] sm:$0xf0] }
 0x389   :  { %v3526_v39 = vadd.f32 %v3525_v17, %v5843_v38  ;;  %v5348_v17 = vld [vmem:[#allocation4 + $0x230] sm:$0xf0]  ;;  %v4827_v37 = vor.u32 %v5347_v55, %v4826_v57 }
 0x38a   :  { %v3621_v13 = vadd.f32 %v3620_v52, %v3572_v25  ;;  %v5343_v25 = vld [vmem:[#allocation4 + $0x20c] sm:$0xf]  ;;  %v4828_v52 = vld [vmem:[#allocation4 + $0x22c] sm:$0xf0] }
 0x38b   :  { %3720 = vmatmul.bf16.gmra.mxu1 %v4755_v28  ;;  %v3672_v47 = vpop.f32.mrf.mxu0 }
 0x38c   :  { %v6476_v3 = vadd.f32 %v3669_v1, %v3621_v13  ;;  %3769 = vmatmul.bf16.gmra.mxu2 %v4759_v18  ;;  %v4834_v18 = vld [vmem:[#allocation4 + $0x210] sm:$0xf]  ;;  %v4831_v13 = vor.u32 %v5343_v25, %v4828_v52  ;;  %v4698_v25 = vld [vmem:[#allocation4 + $0xf8] sm:$0xf] }
 0x38d   :  { %3818 = vmatmul.bf16.gmra.mxu3 %v4763_v30  ;;  %v4835_v7 = vor.u32 %v5348_v17, %v4834_v18 }
 0x38e   :  { %3867 = vmatmul.bf16.gmra.mxu0 %v4767_v16 }
 0x38f   :  { %v3574_v54 = vpop.f32.mrf.mxu2 }
 0x390   :  { %v3575_v2 = vadd.f32 %v3574_v54, %v3526_v39  ;;  %v3623_v40 = vpop.f32.mrf.mxu3  ;;  %v3527_v23 = vpop.f32.mrf.mxu1  ;;  %v4836_v39 = vld [vmem:[#allocation4 + $0x234] sm:$0xf0] }
 0x391   :  { %v3528_v31 = vadd.f32 %v3527_v23, %v5857_v43 }
 0x392   :  { %v3624_v53 = vadd.f32 %v3623_v40, %v3575_v2 }
 0x393   :  { %v3674_v0 = vpop.f32.mrf.mxu0 }
 0x394   :  { %v6479_v61 = vadd.f32 %v3672_v47, %v3624_v53  ;;  %v5344_v47 = vld [vmem:[#allocation4 + $0x214] sm:$0xf] }
 0x395   :  { %v4839_v40 = vor.u32 %v5344_v47, %v4836_v39 }
 0x397   :  { %v3576_v63 = vpop.f32.mrf.mxu2 }
 0x398   :  { %v3577_v38 = vadd.f32 %v3576_v63, %v3528_v31  ;;  %v3625_v24 = vpop.f32.mrf.mxu3  ;;  %v3530_v50 = vpop.f32.mrf.mxu1  ;;  %v4590_v31 = vld [vmem:[#allocation4 + $0x20] sm:$0xf] }
 0x399   :  { %v3531_v43 = vadd.f32 %v3530_v50, %v5871_v62 }
 0x39a   :  { %v3626_v20 = vadd.f32 %v3625_v24, %v3577_v38 }
 0x39b   :  { %3725 = vmatmul.bf16.gmra.mxu1 %v4791_v12  ;;  %v3677_v36 = vpop.f32.mrf.mxu0  ;;  %v4591_v12 = vor.u32 %v5286_v45, %v4590_v31 }
 0x39c   :  { %v6482_v29 = vadd.f32 %v3674_v0, %v3626_v20  ;;  %3774 = vmatmul.bf16.gmra.mxu2 %v4795_v44 }
 0x39d   :  { %3823 = vmatmul.bf16.gmra.mxu3 %v4799_v4 }
 0x39e   :  { %3872 = vmatmul.bf16.gmra.mxu0 %v4803_v27  ;;  %v4626_v27 = vld [vmem:[#allocation4 + $0x68] sm:$0xf] }
 0x39f   :  { %v3579_v22 = vpop.f32.mrf.mxu2 }
 0x3a0   :  { %v3580_v1 = vadd.f32 %v3579_v22, %v3531_v43  ;;  %v3628_v21 = vpop.f32.mrf.mxu3  ;;  %v3532_v5 = vpop.f32.mrf.mxu1 }
 0x3a1   :  { %v3533_v28 = vadd.f32 %v3532_v5, %v6653_v59  ;;  %v5304_v5 = vld [vmem:[#allocation4 + $0xd0] sm:$0xf0] }
 0x3a2   :  { %v3629_v33 = vadd.f32 %v3628_v21, %v3580_v1 }
 0x3a3   :  { %v3679_v46 = vpop.f32.mrf.mxu0 }
 0x3a4   :  { %v6485_v15 = vadd.f32 %v3677_v36, %v3629_v33  ;;  %v5295_v36 = vld [vmem:[#allocation4 + $0x88] sm:$0xf0] }
 0x3a7   :  { %v3581_v30 = vpop.f32.mrf.mxu2 }
 0x3a8   :  { %v3582_v32 = vadd.f32 %v3581_v30, %v3533_v28  ;;  %v3630_v62 = vpop.f32.mrf.mxu3  ;;  %v3535_v16 = vpop.f32.mrf.mxu1  ;;  %v4734_v30 = vld [vmem:[#allocation4 + $0x140] sm:$0xf] }
 0x3a9   :  { %v3536_v59 = vadd.f32 %v3535_v16, %v5899_v49  ;;  %v4770_v16 = vld [vmem:[#allocation4 + $0x188] sm:$0xf] }
 0x3aa   :  { %v3631_v54 = vadd.f32 %v3630_v62, %v3582_v32 }
 0x3ab   :  { %3730 = vmatmul.bf16.gmra.mxu1 %v4827_v37  ;;  %v3682_v53 = vpop.f32.mrf.mxu0 }
 0x3ac   :  { %v6488_v2 = vadd.f32 %v3679_v46, %v3631_v54  ;;  %3779 = vmatmul.bf16.gmra.mxu2 %v4831_v13 }
 0x3ad   :  { %3828 = vmatmul.bf16.gmra.mxu3 %v4835_v7 }
 0x3ae   :  { %3877 = vmatmul.bf16.gmra.mxu0 %v4839_v40 }
 0x3af   :  { %v3584_v23 = vpop.f32.mrf.mxu2 }
 0x3b0   :  { %v3585_v41 = vadd.f32 %v3584_v23, %v3536_v59  ;;  %v3633_v0 = vpop.f32.mrf.mxu3  ;;  %v3537_v56 = vpop.f32.mrf.mxu1  ;;  %v4806_v59 = vld [vmem:[#allocation4 + $0x1d0] sm:$0xf]  ;;  %v5340_v23 = vld [vmem:[#allocation4 + $0x1f0] sm:$0xf0] }
 0x3b1   :  { %v3538_v11 = vadd.f32 %v3537_v56, %v5949_v6  ;;  %v4627_v6 = vor.u32 %v5295_v36, %v4626_v27 }
 0x3b2   :  { %v3634_v60 = vadd.f32 %v3633_v0, %v3585_v41  ;;  %v4807_v41 = vor.u32 %v5340_v23, %v4806_v59 }
 0x3b3   :  { %v3684_v50 = vpop.f32.mrf.mxu0 }
 0x3b4   :  { %v6491_v14 = vadd.f32 %v3682_v53, %v3634_v60 }
 0x3b7   :  { %v3586_v63 = vpop.f32.mrf.mxu2 }
 0x3b8   :  { %v3587_v38 = vadd.f32 %v3586_v63, %v3538_v11  ;;  %v3635_v24 = vpop.f32.mrf.mxu3  ;;  %v3696_v44 = vpop.f32.mrf.mxu1  ;;  %v5349_v63 = vld [vmem:[#allocation4 + $0x238] sm:$0xf0] }
 0x3b9   :  { %v6495_v4 = vadd.f32 %v3696_v44, %v6449_v58  ;;  %v4662_v58 = vld [vmem:[#allocation4 + $0xb0] sm:$0xf] }
 0x3ba   :  { %v3636_v49 = vadd.f32 %v3635_v24, %v3587_v38  ;;  %v4663_v33 = vor.u32 %v5304_v5, %v4662_v58 }
 0x3bb   :  { %3891 = vmatmul.bf16.vlgmr.msra.gmra.mxu1 %v4591_v12  ;;  %v3843_v53 = vpop.f32.mrf.mxu0 }
 0x3bc   :  { %v6497_v9 = vadd.f32 %v3684_v50, %v3636_v49 }
 0x3c0   :  { %v3698_v8 = vpop.f32.mrf.mxu1 }
 0x3c1   :  { %v6500_v20 = vadd.f32 %v3698_v8, %v6452_v48 }
 0x3c8   :  { %v3701_v43 = vpop.f32.mrf.mxu1 }
 0x3c9   :  { %v6503_v22 = vadd.f32 %v3701_v43, %v6455_v19  ;;  %v5313_v19 = vld [vmem:[#allocation4 + $0x118] sm:$0xf0] }
 0x3ca   :  { %v4699_v52 = vor.u32 %v5313_v19, %v4698_v25 }
 0x3cb   :  { %3896 = vmatmul.bf16.gmra.mxu1 %v4627_v6 }
 0x3d0   :  { %v3703_v1 = vpop.f32.mrf.mxu1 }
 0x3d1   :  { %v6506_v21 = vadd.f32 %v3703_v1, %v6458_v10 }
 0x3d8   :  { %v3706_v57 = vpop.f32.mrf.mxu1 }
 0x3d9   :  { %v6509_v46 = vadd.f32 %v3706_v57, %v6461_v51  ;;  %v5322_v51 = vld [vmem:[#allocation4 + $0x160] sm:$0xf0] }
 0x3da   :  { %v4735_v32 = vor.u32 %v5322_v51, %v4734_v30 }
 0x3db   :  { %3901 = vmatmul.bf16.gmra.mxu1 %v4663_v33 }
 0x3e0   :  { %v3708_v48 = vpop.f32.mrf.mxu1 }
 0x3e1   :  { %v6512_v55 = vadd.f32 %v3708_v48, %v6464_v34 }
 0x3e8   :  { %v3711_v28 = vpop.f32.mrf.mxu1 }
 0x3e9   :  { %v6515_v18 = vadd.f32 %v3711_v28, %v6467_v26  ;;  %v5331_v26 = vld [vmem:[#allocation4 + $0x1a8] sm:$0xf0] }
 0x3ea   :  { %v4771_v7 = vor.u32 %v5331_v26, %v4770_v16 }
 0x3eb   :  { %3906 = vmatmul.bf16.gmra.mxu1 %v4699_v52 }
 0x3f0   :  { %v3713_v10 = vpop.f32.mrf.mxu1 }
 0x3f1   :  { %v6518_v17 = vadd.f32 %v3713_v10, %v6470_v42  ;;  %v3745_v42 = vpop.f32.mrf.mxu2 }
 0x3f2   :  { %v3746_v49 = vadd.f32 %v3745_v42, %v6495_v4 }
 0x3f8   :  { %v3716_v62 = vpop.f32.mrf.mxu1 }
 0x3f9   :  { %v6521_v37 = vadd.f32 %v3716_v62, %v6473_v35  ;;  %v3794_v35 = vpop.f32.mrf.mxu3 }
 0x3fb   :  { %3911 = vmatmul.bf16.gmra.mxu1 %v4735_v32 }
 0x400   :  { %v3718_v34 = vpop.f32.mrf.mxu1 }
 0x401   :  { %v6524_v13 = vadd.f32 %v3718_v34, %v6476_v3  ;;  %v3747_v3 = vpop.f32.mrf.mxu2  ;;  %v3796_v60 = vpop.f32.mrf.mxu3 }
 0x402   :  { %v3748_v58 = vadd.f32 %v3747_v3, %v6500_v20 }
 0x404   :  { %v3797_v57 = vadd.f32 %v3796_v60, %v3748_v58 }
 0x408   :  { %v3721_v47 = vpop.f32.mrf.mxu1 }
 0x409   :  { %v6527_v39 = vadd.f32 %v3721_v47, %v6479_v61  ;;  %v3845_v61 = vpop.f32.mrf.mxu0  ;;  %v3750_v11 = vpop.f32.mrf.mxu2 }
 0x40a   :  { %v3799_v38 = vpop.f32.mrf.mxu3  ;;  %v3846_v25 = vadd.f32 %v3845_v61, %v3797_v57  ;;  %v3751_v4 = vadd.f32 %v3750_v11, %v6503_v22 }
 0x40b   :  { %3916 = vmatmul.bf16.gmra.mxu1 %v4771_v7 }
 0x410   :  { %v3723_v54 = vpop.f32.mrf.mxu1 }
 0x411   :  { %v6530_v40 = vadd.f32 %v3723_v54, %v6482_v29  ;;  %v4842_v29 = vld [vmem:[#allocation4 + $0x218] sm:$0xf]  ;;  %v3848_v50 = vpop.f32.mrf.mxu0 }
 0x412   :  { %v4843_v24 = vor.u32 %v5349_v63, %v4842_v29  ;;  %v3801_v8 = vpop.f32.mrf.mxu3 }
 0x418   :  { %v3726_v0 = vpop.f32.mrf.mxu1 }
 0x419   :  { %v6533_v56 = vadd.f32 %v3726_v0, %v6485_v15  ;;  %v3752_v15 = vpop.f32.mrf.mxu2  ;;  %v3850_v6 = vpop.f32.mrf.mxu0 }
 0x41a   :  { %v3753_v51 = vadd.f32 %v3752_v15, %v6506_v21 }
 0x41b   :  { %3921 = vmatmul.bf16.gmra.mxu1 %v4807_v41 }
 0x41c   :  { %v3802_v16 = vadd.f32 %v3801_v8, %v3753_v51 }
 0x41e   :  { %v3851_v7 = vadd.f32 %v3850_v6, %v3802_v16 }
 0x420   :  { %v3728_v31 = vpop.f32.mrf.mxu1 }
 0x421   :  { %v6536_v45 = vadd.f32 %v3728_v31, %v6488_v2  ;;  %v3795_v2 = vadd.f32 %v3794_v35, %v3746_v49  ;;  %v3755_v43 = vpop.f32.mrf.mxu2  ;;  %v3853_v48 = vpop.f32.mrf.mxu0 }
 0x422   :  { %v3756_v47 = vadd.f32 %v3755_v43, %v6509_v46 }
 0x423   :  { %v3844_v1 = vadd.f32 %v3843_v53, %v3795_v2 }
 0x428   :  { %v3731_v12 = vpop.f32.mrf.mxu1 }
 0x429   :  { %v6539_v44 = vadd.f32 %v3731_v12, %v6491_v14  ;;  %v3804_v14 = vpop.f32.mrf.mxu3  ;;  %v3757_v19 = vpop.f32.mrf.mxu2 }
 0x42a   :  { %v3855_v32 = vpop.f32.mrf.mxu0  ;;  %v3805_v35 = vadd.f32 %v3804_v14, %v3756_v47  ;;  %v3758_v53 = vadd.f32 %v3757_v19, %v6512_v55 }
 0x42b   :  { %3926 = vmatmul.bf16.gmra.mxu1 %v4843_v24 }
 0x42c   :  { %v3854_v23 = vadd.f32 %v3853_v48, %v3805_v35 }
 0x430   :  { %v3733_v27 = vpop.f32.mrf.mxu1 }
 0x431   :  { %v6543_v36 = vadd.f32 %v3733_v27, %v6497_v9  ;;  %v3800_v9 = vadd.f32 %v3799_v38, %v3751_v4  ;;  %v3806_v10 = vpop.f32.mrf.mxu3  ;;  %v3760_v34 = vpop.f32.mrf.mxu2 }
 0x432   :  { %v3858_v54 = vpop.f32.mrf.mxu0  ;;  %v3807_v0 = vadd.f32 %v3806_v10, %v3758_v53  ;;  %v3761_v11 = vadd.f32 %v3760_v34, %v6515_v18 }
 0x433   :  { %v3849_v30 = vadd.f32 %v3848_v50, %v3800_v9 }
 0x434   :  { %v3856_v31 = vadd.f32 %v3855_v32, %v3807_v0 }
 0x438   :  { %v3892_v5 = vpop.f32.mrf.mxu1 }
 0x439   :  { %v3893_v33 = vadd.f32 %v3892_v5, %v3844_v1  ;;  %v3809_v26 = vpop.f32.mrf.mxu3  ;;  %v3762_v59 = vpop.f32.mrf.mxu2 }
 0x43a   :  { %v3860_v60 = vpop.f32.mrf.mxu0  ;;  %v3810_v38 = vadd.f32 %v3809_v26, %v3761_v11  ;;  %v3763_v50 = vadd.f32 %v3762_v59, %v6518_v17 }
 0x43b   :  { %3932 = vst [vmem:[#allocation11] sm:$0xff] %v3893_v33 }
 0x43c   :  { %v3859_v12 = vadd.f32 %v3858_v54, %v3810_v38 }
 0x440   :  { %v3894_v52 = vpop.f32.mrf.mxu1 }
 0x441   :  { %v3895_v28 = vadd.f32 %v3894_v52, %v3846_v25  ;;  %v3811_v21 = vpop.f32.mrf.mxu3  ;;  %v3765_v61 = vpop.f32.mrf.mxu2 }
 0x442   :  { %v3863_v24 = vpop.f32.mrf.mxu0  ;;  %v3812_v8 = vadd.f32 %v3811_v21, %v3763_v50  ;;  %v3766_v6 = vadd.f32 %v3765_v61, %v6521_v37 }
 0x443   :  { %3933 = vst [vmem:[#allocation11 + $0x8] sm:$0xff] %v3895_v28 }
 0x444   :  { %v3861_v2 = vadd.f32 %v3860_v60, %v3812_v8 }
 0x448   :  { %v3897_v20 = vpop.f32.mrf.mxu1 }
 0x449   :  { %v3898_v62 = vadd.f32 %v3897_v20, %v3849_v30  ;;  %v3814_v63 = vpop.f32.mrf.mxu3  ;;  %v3767_v55 = vpop.f32.mrf.mxu2 }
 0x44a   :  { %v3865_v43 = vpop.f32.mrf.mxu0  ;;  %v3815_v5 = vadd.f32 %v3814_v63, %v3766_v6  ;;  %v3768_v57 = vadd.f32 %v3767_v55, %v6524_v13 }
 0x44b   :  { %3934 = vst [vmem:[#allocation11 + $0x10] sm:$0xff] %v3898_v62 }
 0x44c   :  { %v3864_v14 = vadd.f32 %v3863_v24, %v3815_v5 }
 0x450   :  { %v3899_v22 = vpop.f32.mrf.mxu1 }
 0x451   :  { %v3900_v42 = vadd.f32 %v3899_v22, %v3851_v7  ;;  %v3816_v27 = vpop.f32.mrf.mxu3  ;;  %v3770_v58 = vpop.f32.mrf.mxu2 }
 0x452   :  { %v3868_v25 = vpop.f32.mrf.mxu0  ;;  %v3817_v4 = vadd.f32 %v3816_v27, %v3768_v57  ;;  %v3771_v28 = vadd.f32 %v3770_v58, %v6527_v39 }
 0x453   :  { %3935 = vst [vmem:[#allocation11 + $0x18] sm:$0xff] %v3900_v42 }
 0x454   :  { %v3866_v52 = vadd.f32 %v3865_v43, %v3817_v4 }
 0x458   :  { %v3902_v41 = vpop.f32.mrf.mxu1 }
 0x459   :  { %v3903_v3 = vadd.f32 %v3902_v41, %v3854_v23  ;;  %v3819_v33 = vpop.f32.mrf.mxu3  ;;  %v3772_v19 = vpop.f32.mrf.mxu2 }
 0x45a   :  { %v3820_v30 = vadd.f32 %v3819_v33, %v3771_v28  ;;  %v3870_v51 = vpop.f32.mrf.mxu0  ;;  %v3773_v62 = vadd.f32 %v3772_v19, %v6530_v40 }
 0x45b   :  { %3936 = vst [vmem:[#allocation11 + $0x20] sm:$0xff] %v3903_v3 }
 0x45c   :  { %v3869_v20 = vadd.f32 %v3868_v25, %v3820_v30 }
 0x460   :  { %v3904_v46 = vpop.f32.mrf.mxu1 }
 0x461   :  { %v3905_v29 = vadd.f32 %v3904_v46, %v3856_v31  ;;  %v3821_v37 = vpop.f32.mrf.mxu3  ;;  %v3775_v32 = vpop.f32.mrf.mxu2 }
 0x462   :  { %v3822_v26 = vadd.f32 %v3821_v37, %v3773_v62  ;;  %v3873_v7 = vpop.f32.mrf.mxu0  ;;  %v3776_v22 = vadd.f32 %v3775_v32, %v6533_v56 }
 0x463   :  { %3937 = vst [vmem:[#allocation11 + $0x28] sm:$0xff] %v3905_v29 }
 0x464   :  { %v3871_v47 = vadd.f32 %v3870_v51, %v3822_v26 }
 0x468   :  { %v3907_v15 = vpop.f32.mrf.mxu1 }
 0x469   :  { %v3908_v49 = vadd.f32 %v3907_v15, %v3859_v12  ;;  %v3824_v16 = vpop.f32.mrf.mxu3  ;;  %v3777_v39 = vpop.f32.mrf.mxu2 }
 0x46a   :  { %v3825_v35 = vadd.f32 %v3824_v16, %v3776_v22  ;;  %v3778_v53 = vadd.f32 %v3777_v39, %v6536_v45  ;;  %v3875_v21 = vpop.f32.mrf.mxu0 }
 0x46b   :  { %3938 = vst [vmem:[#allocation11 + $0x30] sm:$0xff] %v3908_v49 }
 0x46c   :  { %v3874_v23 = vadd.f32 %v3873_v7, %v3825_v35 }
 0x470   :  { %v3909_v18 = vpop.f32.mrf.mxu1 }
 0x471   :  { %v3910_v1 = vadd.f32 %v3909_v18, %v3861_v2  ;;  %v3826_v59 = vpop.f32.mrf.mxu3  ;;  %v3780_v3 = vpop.f32.mrf.mxu2 }
 0x472   :  { %v3827_v0 = vadd.f32 %v3826_v59, %v3778_v53  ;;  %v3781_v31 = vadd.f32 %v3780_v3, %v6539_v44  ;;  %v3878_v46 = vpop.f32.mrf.mxu0 }
 0x473   :  { %3939 = vst [vmem:[#allocation11 + $0x38] sm:$0xff] %v3910_v1 }
 0x474   :  { %v3876_v61 = vadd.f32 %v3875_v21, %v3827_v0 }
 0x478   :  { %v3912_v17 = vpop.f32.mrf.mxu1 }
 0x479   :  { %v3913_v48 = vadd.f32 %v3912_v17, %v3864_v14  ;;  %v3829_v60 = vpop.f32.mrf.mxu3  ;;  %v3782_v63 = vpop.f32.mrf.mxu2 }
 0x47a   :  { %v3830_v29 = vadd.f32 %v3829_v60, %v3781_v31  ;;  %v3783_v24 = vadd.f32 %v3782_v63, %v6543_v36  ;;  %v3880_v15 = vpop.f32.mrf.mxu0 }
 0x47b   :  { %3940 = vst [vmem:[#allocation11 + $0x40] sm:$0xff] %v3913_v48 }
 0x47c   :  { %v3879_v38 = vadd.f32 %v3878_v46, %v3830_v29 }
 0x480   :  { %v3914_v9 = vpop.f32.mrf.mxu1 }
 0x481   :  { %v3915_v10 = vadd.f32 %v3914_v9, %v3866_v52  ;;  %v3831_v45 = vpop.f32.mrf.mxu3 }
 0x482   :  { %v3832_v55 = vadd.f32 %v3831_v45, %v3783_v24 }
 0x483   :  { %3941 = vst [vmem:[#allocation11 + $0x48] sm:$0xff] %v3915_v10 }
 0x484   :  { %v3881_v44 = vadd.f32 %v3880_v15, %v3832_v55 }
 0x488   :  { %v3917_v13 = vpop.f32.mrf.mxu1 }
 0x489   :  { %v3918_v34 = vadd.f32 %v3917_v13, %v3869_v20 }
 0x48b   :  { %3942 = vst [vmem:[#allocation11 + $0x50] sm:$0xff] %v3918_v34 }
 0x490   :  { %v3919_v42 = vpop.f32.mrf.mxu1 }
 0x491   :  { %v3920_v54 = vadd.f32 %v3919_v42, %v3871_v47 }
 0x493   :  { %3943 = vst [vmem:[#allocation11 + $0x58] sm:$0xff] %v3920_v54 }
 0x498   :  { %v3922_v40 = vpop.f32.mrf.mxu1 }
 0x499   :  { %v3923_v41 = vadd.f32 %v3922_v40, %v3874_v23 }
 0x49b   :  { %3944 = vst [vmem:[#allocation11 + $0x60] sm:$0xff] %v3923_v41 }
 0x4a0   :  { %v3924_v56 = vpop.f32.mrf.mxu1 }
 0x4a1   :  { %v3925_v11 = vadd.f32 %v3924_v56, %v3876_v61 }
 0x4a3   :  { %3945 = vst [vmem:[#allocation11 + $0x68] sm:$0xff] %v3925_v11 }
 0x4a8   :  { %v3927_v12 = vpop.f32.mrf.mxu1 }
 0x4a9   :  { %v3928_v50 = vadd.f32 %v3927_v12, %v3879_v38 }
 0x4ab   :  { %3946 = vst [vmem:[#allocation11 + $0x70] sm:$0xff] %v3928_v50 }
 0x4b0   :  { %v3929_v49 = vpop.f32.mrf.mxu1 }
 0x4b1   :  { %v3930_v8 = vadd.f32 %v3929_v49, %v3881_v44 }
 0x4b3   :  { %3947 = vst [vmem:[#allocation11 + $0x78] sm:$0xff] %v3930_v8 }
 0x4b4   :  { %3960 = dma.vmem_to_hbm [thread:$0]  %s3953_s2, 2048, %s3955_s30, [#allocation10], %s5551_s17, %s5551_s17, %s5552_s18  }
 0x4b5   :  { %5548 = dma.done.wait [#allocation10], 2048  }
 0x4b6   :  { %5549 = vsyncadd [#allocation10], 4294965248 }
 0x4b7   :  { %3965 = vsyncpa [#allocation9], 1 }
 0x4b8   :  { %3966 = vsyncpa [#allocation10], 1 }
 0x4b9   :  { %3967 = vsyncmov [#allocation7] }
 0x4bc   :  { %s3968_s4 = vpop.sfrf %3967 }
 0x4bd   :  { %p5132_p0 = scmp.ne.s32.totalorder %s3968_s4, 0 }
 0x4bf   :  { %3972 = shalt.err (%p5132_p0)  }
 0x4c0   :  { %3974 = vsyncmov [#allocation7 + $0x1] }
 0x4c3   :  { %s3975_s3 = vpop.sfrf %3974 }
 0x4c4   :  { %p5133_p1 = scmp.ne.s32.totalorder %s3975_s3, 0 }
 0x4c6   :  { %3979 = shalt.err (%p5133_p1)  }

</bundles_post_ra>
